<compile_context>
chip_gen: v7x
topology: tpu7x:2x2x1
jax: 0.10.0
libtpu: 0.0.40
codegen_flags: <defaults>
</compile_context>

<pallas_src>
import functools

import jax
import jax.numpy as jnp
from jax.experimental import pallas as pl
from jax.experimental.pallas import tpu as pltpu

TM_DEFAULT = 256          # row tile (multiple of 8); 256 also fits v7x's 64 MiB VMEM
MXU_DTYPE = jnp.bfloat16  # matmul operand dtype (accumulation is always f32)
EPS = 1e-5


# --------------------------------------------------------------------------
# Kernel 1: y = relu(x*scale + bias) @ w  [+ residual]  (+ optional column
# partial sums / sums-of-squares used for the *next* BatchNorm's statistics)
# --------------------------------------------------------------------------
def _make_fused_matmul_kernel(*, m_total, residual_mode, want_stats, mxu_dtype):
    def kernel(*refs):
        x_ref, s_ref, b_ref, w_ref = refs[0], refs[1], refs[2], refs[3]
        pos = 4
        if residual_mode == "plain":
            sc_ref = refs[pos]; pos += 1
        elif residual_mode == "affine":
            rx_ref, rs_ref, rb_ref = refs[pos], refs[pos + 1], refs[pos + 2]
            pos += 3
        o_ref = refs[pos]; pos += 1
        if want_stats:
            ps_ref, pq_ref = refs[pos], refs[pos + 1]

        # fused bn+relu (per-channel affine) feeding the MXU
        a = jnp.maximum(x_ref[...] * s_ref[...] + b_ref[...], 0.0)
        y = jnp.dot(a.astype(mxu_dtype), w_ref[...].astype(mxu_dtype),
                    preferred_element_type=jnp.float32)

        if residual_mode == "plain":
            y = y + sc_ref[...]
        elif residual_mode == "affine":  # identity shortcut = relu(bn1(x))
            y = y + jnp.maximum(rx_ref[...] * rs_ref[...] + rb_ref[...], 0.0)

        o_ref[...] = y.astype(o_ref.dtype)

        if want_stats:
            # per-tile partial sum / sum-of-squares over valid rows only
            rows = (pl.program_id(0) * y.shape[0]
                    + jax.lax.broadcasted_iota(jnp.int32, (y.shape[0], 1), 0))
            ys = jnp.where(rows < m_total, y, 0.0)
            ps_ref[0] = jnp.sum(ys, axis=0, keepdims=True)
            pq_ref[0] = jnp.sum(ys * ys, axis=0, keepdims=True)

    return kernel


def _fused_affine_relu_matmul(x2d, scale, bias, w, *, residual=None,
                              residual_affine=None, want_stats=False,
                              tm=TM_DEFAULT, tn=None, mxu_dtype=MXU_DTYPE):
    M, K = x2d.shape
    Kw, Nc = w.shape
    assert K == Kw
    tm = min(tm, M)
    if tn is None:
        tn = Nc if Nc <= 128 else 128      # lane-dense output tiles
    gm, gn = pl.cdiv(M, tm), pl.cdiv(Nc, tn)

    s2 = jnp.asarray(scale, jnp.float32).reshape(1, K)
    b2 = jnp.asarray(bias, jnp.float32).reshape(1, K)

    in_specs = [pl.BlockSpec((tm, K), lambda i, j: (i, 0)),
                pl.BlockSpec((1, K), lambda i, j: (0, 0)),
                pl.BlockSpec((1, K), lambda i, j: (0, 0)),
                pl.BlockSpec((K, tn), lambda i, j: (0, j))]
    args = [x2d, s2, b2, w]

    residual_mode = None
    if residual is not None:
        residual_mode = "plain"
        in_specs.append(pl.BlockSpec((tm, tn), lambda i, j: (i, j)))
        args.append(residual)
    elif residual_affine is not None:
        residual_mode = "affine"
        rx, rs, rb = residual_affine
        in_specs += [pl.BlockSpec((tm, tn), lambda i, j: (i, j)),
                     pl.BlockSpec((1, tn), lambda i, j: (0, j)),
                     pl.BlockSpec((1, tn), lambda i, j: (0, j))]
        args += [rx, jnp.asarray(rs, jnp.float32).reshape(1, Nc),
                 jnp.asarray(rb, jnp.float32).reshape(1, Nc)]

    out_shape = [jax.ShapeDtypeStruct((M, Nc), jnp.float32)]
    out_specs = [pl.BlockSpec((tm, tn), lambda i, j: (i, j))]
    if want_stats:
        out_shape += [jax.ShapeDtypeStruct((gm, 1, Nc), jnp.float32)] * 2
        out_specs += [pl.BlockSpec((1, 1, tn), lambda i, j: (i, 0, j))] * 2

    kernel = _make_fused_matmul_kernel(m_total=M, residual_mode=residual_mode,
                                       want_stats=want_stats, mxu_dtype=mxu_dtype)
    outs = pl.pallas_call(
        kernel,
        out_shape=tuple(out_shape),
        grid=(gm, gn),
        in_specs=in_specs,
        out_specs=tuple(out_specs),
        compiler_params=pltpu.CompilerParams(
            dimension_semantics=("parallel", "parallel")),
    )(*args)
    if not isinstance(outs, (list, tuple)):
        outs = (outs,)
    return tuple(outs)


# --------------------------------------------------------------------------
# Kernel 2: fused bn+relu + 3x3 conv (pad=1, stride s) as 9 accumulated
# shifted matmuls on a halo'd image block; also emits bn3 partial stats.
# --------------------------------------------------------------------------
def _fused_bn_relu_conv3x3(x_nhwc, scale, bias, w_khw_io, *, stride,
                           mxu_dtype=MXU_DTYPE):
    N, H, W, C = x_nhwc.shape
    C2 = w_khw_io.shape[-1]
    Hp, Wp = H + 2, W + 2
    Ho = (H - 1) // stride + 1
    Wo = (W - 1) // stride + 1

    # 1-pixel spatial halo; the in-kernel mask re-zeroes the border AFTER the
    # affine+relu (relu(0*s+b) != 0 in general, so pre-activated padding is wrong).
    xpad = jnp.pad(x_nhwc, ((0, 0), (1, 1), (1, 1), (0, 0)))
    border_mask = jnp.pad(jnp.ones((H, W, 1), jnp.float32),
                          ((1, 1), (1, 1), (0, 0)))
    s2 = jnp.asarray(scale, jnp.float32).reshape(1, C)
    b2 = jnp.asarray(bias, jnp.float32).reshape(1, C)

    def kernel(x_ref, m_ref, s_ref, b_ref, w_ref, o_ref, ps_ref, pq_ref):
        x = x_ref[0]                                           # (Hp, Wp, C)
        a = (jnp.maximum(x * s_ref[...] + b_ref[...], 0.0)
             * m_ref[...]).astype(mxu_dtype)                   # halo'd activation
        acc = jnp.zeros((Ho * Wo, C2), jnp.float32)
        for kh in range(3):                                    # 9 shifted matmuls
            for kw in range(3):
                tap = a[kh:kh + (Ho - 1) * stride + 1:stride,
                        kw:kw + (Wo - 1) * stride + 1:stride, :]
                acc = acc + jnp.dot(tap.reshape(Ho * Wo, C),
                                    w_ref[kh, kw].astype(mxu_dtype),
                                    preferred_element_type=jnp.float32)
        o_ref[0] = acc
        ps_ref[0] = jnp.sum(acc, axis=0, keepdims=True)        # bn3 partial stats
        pq_ref[0] = jnp.sum(acc * acc, axis=0, keepdims=True)

    out, ps, pq = pl.pallas_call(
        kernel,
        out_shape=(jax.ShapeDtypeStruct((N, Ho * Wo, C2), jnp.float32),
                   jax.ShapeDtypeStruct((N, 1, C2), jnp.float32),
                   jax.ShapeDtypeStruct((N, 1, C2), jnp.float32)),
        grid=(N,),
        in_specs=[pl.BlockSpec((1, Hp, Wp, C), lambda n: (n, 0, 0, 0)),
                  pl.BlockSpec((Hp, Wp, 1), lambda n: (0, 0, 0)),
                  pl.BlockSpec((1, C), lambda n: (0, 0)),
                  pl.BlockSpec((1, C), lambda n: (0, 0)),
                  pl.BlockSpec((3, 3, C, C2), lambda n: (0, 0, 0, 0))],
        out_specs=(pl.BlockSpec((1, Ho * Wo, C2), lambda n: (n, 0, 0)),
                   pl.BlockSpec((1, 1, C2), lambda n: (n, 0, 0)),
                   pl.BlockSpec((1, 1, C2), lambda n: (n, 0, 0))),
        compiler_params=pltpu.CompilerParams(dimension_semantics=("parallel",)),
    )(xpad, border_mask, s2, b2, w_khw_io)
    return out, ps, pq


# ------------------------------- forward ----------------------------------
def prepare_params(params, mxu_dtype=MXU_DTYPE):
    """Hoist weight re-layouts / bf16 casts out of the forward path (done once)."""
    planes, cin = params["w1"].shape[:2]
    cout = params["w3"].shape[0]
    prep = {
        "g1": params["g1"], "b1": params["b1"],
        "g2": params["g2"], "b2": params["b2"],
        "g3": params["g3"], "b3": params["b3"],
        "w1_t": params["w1"].reshape(planes, cin).T.astype(mxu_dtype),
        "w2_t": jnp.transpose(params["w2"], (2, 3, 1, 0)).astype(mxu_dtype),
        "w3_t": params["w3"].reshape(cout, planes).T.astype(mxu_dtype),
    }
    if "wsc" in params:
        prep["wsc_t"] = params["wsc"].reshape(cout, cin).T.astype(mxu_dtype)
    return prep


def preact_bottleneck_forward(x_nchw, prepared, stride, *, tm=TM_DEFAULT,
                              mxu_dtype=MXU_DTYPE, eps=EPS):
    """Forward pass matching the PyTorch module (NCHW in/out, training-mode BN)."""
    N, Cin, H, W = x_nchw.shape
    planes = prepared["w1_t"].shape[1]
    Cout = 4 * planes
    has_sc = "wsc_t" in prepared

    x = jnp.transpose(x_nchw, (0, 2, 3, 1)).astype(jnp.float32)   # NHWC
    x2d = x.reshape(-1, Cin)
    M = N * H * W

    # bn1: one-pass batch stats (biased var) folded into per-channel scale/bias.
    mean1 = jnp.mean(x2d, axis=0)
    var1 = jnp.mean(x2d * x2d, axis=0) - mean1 * mean1
    s1 = prepared["g1"] * jax.lax.rsqrt(var1 + eps)
    c1 = prepared["b1"] - mean1 * s1

    # conv1 (1x1) fused with bn1+relu; emits bn2 partial statistics.
    out1, ps2, pq2 = _fused_affine_relu_matmul(
        x2d, s1, c1, prepared["w1_t"], want_stats=True, tm=tm, mxu_dtype=mxu_dtype)
    mean2 = jnp.sum(ps2, axis=(0, 1)) / M
    var2 = jnp.sum(pq2, axis=(0, 1)) / M - mean2 * mean2
    s2 = prepared["g2"] * jax.lax.rsqrt(var2 + eps)
    c2 = prepared["b2"] - mean2 * s2

    Ho = (H - 1) // stride + 1
    Wo = (W - 1) // stride + 1

    # shortcut branch: 1x1/stride conv fused with bn1+relu (identity handled later).
    if has_sc:
        xsc2d = x2d if stride == 1 else x[:, ::stride, ::stride, :].reshape(-1, Cin)
        (shortcut2d,) = _fused_affine_relu_matmul(
            xsc2d, s1, c1, prepared["wsc_t"], tm=tm, mxu_dtype=mxu_dtype)

    # conv2: 3x3/stride fused with bn2+relu; emits bn3 partial statistics.
    out2, ps3, pq3 = _fused_bn_relu_conv3x3(
        out1.reshape(N, H, W, planes), s2, c2, prepared["w2_t"],
        stride=stride, mxu_dtype=mxu_dtype)
    M2 = N * Ho * Wo
    mean3 = jnp.sum(ps3, axis=(0, 1)) / M2
    var3 = jnp.sum(pq3, axis=(0, 1)) / M2 - mean3 * mean3
    s3 = prepared["g3"] * jax.lax.rsqrt(var3 + eps)
    c3 = prepared["b3"] - mean3 * s3

    out2_2d = out2.reshape(M2, planes)

    # conv3 (1x1) fused with bn3+relu and the residual add.
    if has_sc:
        (out3,) = _fused_affine_relu_matmul(
            out2_2d, s3, c3, prepared["w3_t"], residual=shortcut2d,
            tm=tm, mxu_dtype=mxu_dtype)
    else:  # identity shortcut = relu(bn1(x)), applied inside the same kernel
        (out3,) = _fused_affine_relu_matmul(
            out2_2d, s3, c3, prepared["w3_t"], residual_affine=(x2d, s1, c1),
            tm=tm, mxu_dtype=mxu_dtype)

    return jnp.transpose(out3.reshape(N, Ho, Wo, Cout), (0, 3, 1, 2))


# --------------------------- parameters & reference ------------------------
def make_params(key, in_planes, planes, stride):
    expansion = 4
    ks = jax.random.split(key, 10)
    n = lambda k, shape, fan: (jax.random.normal(k, shape, jnp.float32)
                               * jnp.sqrt(2.0 / fan))
    p = {
        "g1": 1.0 + 0.1 * jax.random.normal(ks[0], (in_planes,), jnp.float32),
        "b1": 0.1 * jax.random.normal(ks[1], (in_planes,), jnp.float32),
        "g2": 1.0 + 0.1 * jax.random.normal(ks[2], (planes,), jnp.float32),
        "b2": 0.1 * jax.random.normal(ks[3], (planes,), jnp.float32),
        "g3": 1.0 + 0.1 * jax.random.normal(ks[4], (planes,), jnp.float32),
        "b3": 0.1 * jax.random.normal(ks[5], (planes,), jnp.float32),
        "w1": n(ks[6], (planes, in_planes, 1, 1), in_planes),
        "w2": n(ks[7], (planes, planes, 3, 3), 9 * planes),
        "w3": n(ks[8], (expansion * planes, planes, 1, 1), planes),
    }
    if stride != 1 or in_planes != expansion * planes:
        p["wsc"] = n(ks[9], (expansion * planes, in_planes, 1, 1), in_planes)
    return p


def reference_forward(x_nchw, params, stride):
    """Pure-JAX f32 reference in NCHW (mirrors the PyTorch graph, training BN)."""
    def bn_relu(x, g, b, eps=EPS):
        mean = x.mean(axis=(0, 2, 3), keepdims=True)
        var = ((x - mean) ** 2).mean(axis=(0, 2, 3), keepdims=True)
        xhat = (x - mean) * jax.lax.rsqrt(var + eps)
        return jnp.maximum(xhat * g[None, :, None, None] + b[None, :, None, None], 0.0)

    def conv(a, w, s, pad):
        return jax.lax.conv_general_dilated(
            a, w, (s, s), pad, dimension_numbers=("NCHW", "OIHW", "NCHW"))

    a1 = bn_relu(x_nchw, params["g1"], params["b1"])
    shortcut = conv(a1, params["wsc"], stride, "VALID") if "wsc" in params else a1
    out = conv(a1, params["w1"], 1, "VALID")
    out = conv(bn_relu(out, params["g2"], params["b2"]), params["w2"], stride,
               [(1, 1), (1, 1)])
    out = conv(bn_relu(out, params["g3"], params["b3"]), params["w3"], 1, "VALID")
    return out + shortcut


# ---------------------------------- test -----------------------------------
if __name__ == "__main__":
    key = jax.random.PRNGKey(0)
    kx1, kp1, kx2, kp2 = jax.random.split(key, 4)

    def check(x, params, stride, mxu_dtype, tol_abs, tol_rel):
        prepared = prepare_params(params, mxu_dtype=mxu_dtype)
        fwd = jax.jit(functools.partial(preact_bottleneck_forward,
                                        mxu_dtype=mxu_dtype),
                      static_argnums=(2,))
        out = jax.block_until_ready(fwd(x, prepared, stride))
        ref = jax.block_until_ready(reference_forward(x, params, stride))
        assert out.shape == ref.shape, (out.shape, ref.shape)
        max_err = float(jnp.max(jnp.abs(out - ref)))
        rel_err = float(jnp.linalg.norm(out - ref) / jnp.linalg.norm(ref))
        assert max_err < tol_abs and rel_err < tol_rel, (max_err, rel_err)
        return out

    # Case 1: conv shortcut (in_planes != 4*planes), stride 1.
    N, Cin, H, W, planes, stride = 2, 16, 16, 16, 8, 1
    x1 = jax.random.normal(kx1, (N, Cin, H, W), jnp.float32)
    p1 = make_params(kp1, Cin, planes, stride)
    # exact-semantics check with f32 MXU operands
    check(x1, p1, stride, jnp.float32, tol_abs=2e-3, tol_rel=1e-3)
    # performance mode: bf16 MXU operands, f32 accumulation (looser tolerance)
    out = check(x1, p1, stride, jnp.bfloat16, tol_abs=0.5, tol_rel=5e-2)
    assert out.shape == (N, 4 * planes, H, W)

    # Case 2: identity shortcut (in_planes == 4*planes), stride 1.
    Cin2, planes2 = 32, 8
    x2 = jax.random.normal(kx2, (N, Cin2, H, W), jnp.float32)
    p2 = make_params(kp2, Cin2, planes2, 1)
    check(x2, p2, 1, jnp.float32, tol_abs=2e-3, tol_rel=1e-3)
    check(x2, p2, 1, jnp.bfloat16, tol_abs=0.5, tol_rel=5e-2)

    print("KERNEL_OK")
</pallas_src>

<mosaic_0001>
module attributes {stable_mosaic.version = 11 : i64} {
  func.func @kernel(%arg0: i32, %arg1: i32, %arg2: memref<256x16xf32, #tpu.memory_space<vmem>>, %arg3: memref<1x16xf32, #tpu.memory_space<vmem>>, %arg4: memref<1x16xf32, #tpu.memory_space<vmem>>, %arg5: memref<16x8xf32, #tpu.memory_space<vmem>>, %arg6: memref<256x8xf32, #tpu.memory_space<vmem>>, %arg7: memref<1x1x8xf32, #tpu.memory_space<vmem>>, %arg8: memref<1x1x8xf32, #tpu.memory_space<vmem>>) attributes {dimension_semantics = [#tpu.dimension_semantics<parallel>, #tpu.dimension_semantics<parallel>], iteration_bounds = array<i64: 2, 1>, scalar_prefetch = 0 : i64, scratch_operands = 0 : i64, tpu.core_type = #tpu.core_type<tc>, window_params = [{transform_indices = @transform_0, window_bounds = array<i64: 256, 16>}, {pipeline_mode = #tpu.pipeline_mode<synchronous>, transform_indices = @transform_1, window_bounds = array<i64: 1, 16>}, {pipeline_mode = #tpu.pipeline_mode<synchronous>, transform_indices = @transform_2, window_bounds = array<i64: 1, 16>}, {transform_indices = @transform_3, window_bounds = array<i64: 16, 8>}, {transform_indices = @transform_4, window_bounds = array<i64: 256, 8>}, {transform_indices = @transform_5, window_bounds = array<i64: 1, 1, 8>}, {transform_indices = @transform_6, window_bounds = array<i64: 1, 1, 8>}]} {
    %c0 = arith.constant 0 : index
    %c0_0 = arith.constant 0 : index
    %0 = vector.load %arg2[%c0, %c0_0] : memref<256x16xf32, #tpu.memory_space<vmem>>, vector<256x16xf32>
    %c0_1 = arith.constant 0 : index
    %c0_2 = arith.constant 0 : index
    %1 = vector.load %arg3[%c0_1, %c0_2] : memref<1x16xf32, #tpu.memory_space<vmem>>, vector<1x16xf32>
    %2 = vector.broadcast %1 : vector<1x16xf32> to vector<256x16xf32>
    %3 = arith.mulf %0, %2 : vector<256x16xf32>
    %c0_3 = arith.constant 0 : index
    %c0_4 = arith.constant 0 : index
    %4 = vector.load %arg4[%c0_3, %c0_4] : memref<1x16xf32, #tpu.memory_space<vmem>>, vector<1x16xf32>
    %5 = vector.broadcast %4 : vector<1x16xf32> to vector<256x16xf32>
    %6 = arith.addf %3, %5 : vector<256x16xf32>
    %cst = arith.constant 0.000000e+00 : f32
    %7 = vector.broadcast %cst : f32 to vector<256x16xf32>
    %8 = arith.maximumf %6, %7 : vector<256x16xf32>
    %c0_5 = arith.constant 0 : index
    %c0_6 = arith.constant 0 : index
    %9 = vector.load %arg5[%c0_5, %c0_6] : memref<16x8xf32, #tpu.memory_space<vmem>>, vector<16x8xf32>
    %cst_7 = arith.constant dense<0.000000e+00> : vector<256x8xf32>
    %10 = tpu.matmul %8, %9, %cst_7 {dimension_numbers = #tpu.dot_dimension_numbers<[1], [0], [0], [1], [0, 0, 1, 1], [], []>} : vector<256x16xf32>, vector<16x8xf32>, vector<256x8xf32> -> vector<256x8xf32>
    %c0_8 = arith.constant 0 : index
    %c0_9 = arith.constant 0 : index
    %11 = vector.load %arg6[%c0_8, %c0_9] : memref<256x8xf32, #tpu.memory_space<vmem>>, vector<256x8xf32>
    tpu.vector_store %arg6[%c0_8, %c0_9], %10 {strides = array<i32>} : memref<256x8xf32, #tpu.memory_space<vmem>>, vector<256x8xf32>,
    %c256_i32 = arith.constant 256 : i32
    %12 = arith.muli %arg0, %c256_i32 : i32
    %13 = tpu.iota {dimensions = array<i32: 0>} : vector<256x1xi32>
    %14 = vector.broadcast %12 : i32 to vector<256x1xi32>
    %15 = arith.addi %14, %13 : vector<256x1xi32>
    %c512_i32 = arith.constant 512 : i32
    %16 = vector.broadcast %c512_i32 : i32 to vector<256x1xi32>
    %17 = arith.cmpi slt, %15, %16 : vector<256x1xi32>
    %cst_10 = arith.constant 0.000000e+00 : f32
    %18 = vector.shape_cast %17 : vector<256x1xi1> to vector<256x1xi1>
    %19 = vector.broadcast %18 : vector<256x1xi1> to vector<256x8xi1>
    %20 = vector.broadcast %cst_10 : f32 to vector<256x8xf32>
    %21 = arith.select %19, %10, %20 : vector<256x8xi1>, vector<256x8xf32>
    %cst_11 = arith.constant dense<0.000000e+00> : vector<8xf32>
    %22 = vector.multi_reduction <add>, %21, %cst_11 [0] : vector<256x8xf32> to vector<8xf32>
    %23 = vector.shape_cast %22 : vector<8xf32> to vector<1x8xf32>
    %c0_12 = arith.constant 0 : index
    %c0_13 = arith.constant 0 : index
    %c0_14 = arith.constant 0 : index
    %24 = vector.load %arg7[%c0_12, %c0_13, %c0_14] : memref<1x1x8xf32, #tpu.memory_space<vmem>>, vector<1x1x8xf32>
    %25 = vector.shape_cast %24 : vector<1x1x8xf32> to vector<1x8xf32>
    %26 = vector.shape_cast %23 : vector<1x8xf32> to vector<1x1x8xf32>
    tpu.vector_store %arg7[%c0_12, %c0_13, %c0_14], %26 {strides = array<i32>} : memref<1x1x8xf32, #tpu.memory_space<vmem>>, vector<1x1x8xf32>,
    %27 = arith.mulf %21, %21 : vector<256x8xf32>
    %cst_15 = arith.constant dense<0.000000e+00> : vector<8xf32>
    %28 = vector.multi_reduction <add>, %27, %cst_15 [0] : vector<256x8xf32> to vector<8xf32>
    %29 = vector.shape_cast %28 : vector<8xf32> to vector<1x8xf32>
    %c0_16 = arith.constant 0 : index
    %c0_17 = arith.constant 0 : index
    %c0_18 = arith.constant 0 : index
    %30 = vector.load %arg8[%c0_16, %c0_17, %c0_18] : memref<1x1x8xf32, #tpu.memory_space<vmem>>, vector<1x1x8xf32>
    %31 = vector.shape_cast %30 : vector<1x1x8xf32> to vector<1x8xf32>
    %32 = vector.shape_cast %29 : vector<1x8xf32> to vector<1x1x8xf32>
    tpu.vector_store %arg8[%c0_16, %c0_17, %c0_18], %32 {strides = array<i32>} : memref<1x1x8xf32, #tpu.memory_space<vmem>>, vector<1x1x8xf32>,
    return
  }
  func.func @transform_0(%arg0: i32, %arg1: i32) -> (i32, i32) {
    %c0_i32 = arith.constant 0 : i32
    %c0_i32_0 = arith.constant 0 : i32
    return %arg0, %c0_i32 : i32, i32
  }
  func.func @transform_1(%arg0: i32, %arg1: i32) -> (i32, i32) {
    %c0_i32 = arith.constant 0 : i32
    %c0_i32_0 = arith.constant 0 : i32
    %c0_i32_1 = arith.constant 0 : i32
    return %c0_i32, %c0_i32_0 : i32, i32
  }
  func.func @transform_2(%arg0: i32, %arg1: i32) -> (i32, i32) {
    %c0_i32 = arith.constant 0 : i32
    %c0_i32_0 = arith.constant 0 : i32
    %c0_i32_1 = arith.constant 0 : i32
    return %c0_i32, %c0_i32_0 : i32, i32
  }
  func.func @transform_3(%arg0: i32, %arg1: i32) -> (i32, i32) {
    %c0_i32 = arith.constant 0 : i32
    %c0_i32_0 = arith.constant 0 : i32
    return %c0_i32, %arg1 : i32, i32
  }
  func.func @transform_4(%arg0: i32, %arg1: i32) -> (i32, i32) {
    %c0_i32 = arith.constant 0 : i32
    return %arg0, %arg1 : i32, i32
  }
  func.func @transform_5(%arg0: i32, %arg1: i32) -> (i32, i32, i32) {
    %c0_i32 = arith.constant 0 : i32
    %c0_i32_0 = arith.constant 0 : i32
    return %arg0, %c0_i32, %arg1 : i32, i32, i32
  }
  func.func @transform_6(%arg0: i32, %arg1: i32) -> (i32, i32, i32) {
    %c0_i32 = arith.constant 0 : i32
    %c0_i32_0 = arith.constant 0 : i32
    return %arg0, %c0_i32, %arg1 : i32, i32, i32
  }
}

module attributes {stable_mosaic.version = 11 : i64} {
  func.func @kernel(%arg0: i32, %arg1: i32, %arg2: memref<256x16xf32, #tpu.memory_space<vmem>>, %arg3: memref<1x16xf32, #tpu.memory_space<vmem>>, %arg4: memref<1x16xf32, #tpu.memory_space<vmem>>, %arg5: memref<16x32xf32, #tpu.memory_space<vmem>>, %arg6: memref<256x32xf32, #tpu.memory_space<vmem>>) attributes {dimension_semantics = [#tpu.dimension_semantics<parallel>, #tpu.dimension_semantics<parallel>], iteration_bounds = array<i64: 2, 1>, scalar_prefetch = 0 : i64, scratch_operands = 0 : i64, tpu.core_type = #tpu.core_type<tc>, window_params = [{transform_indices = @transform_0, window_bounds = array<i64: 256, 16>}, {pipeline_mode = #tpu.pipeline_mode<synchronous>, transform_indices = @transform_1, window_bounds = array<i64: 1, 16>}, {pipeline_mode = #tpu.pipeline_mode<synchronous>, transform_indices = @transform_2, window_bounds = array<i64: 1, 16>}, {transform_indices = @transform_3, window_bounds = array<i64: 16, 32>}, {transform_indices = @transform_4, window_bounds = array<i64: 256, 32>}]} {
    %c0 = arith.constant 0 : index
    %c0_0 = arith.constant 0 : index
    %0 = vector.load %arg2[%c0, %c0_0] : memref<256x16xf32, #tpu.memory_space<vmem>>, vector<256x16xf32>
    %c0_1 = arith.constant 0 : index
    %c0_2 = arith.constant 0 : index
    %1 = vector.load %arg3[%c0_1, %c0_2] : memref<1x16xf32, #tpu.memory_space<vmem>>, vector<1x16xf32>
    %2 = vector.broadcast %1 : vector<1x16xf32> to vector<256x16xf32>
    %3 = arith.mulf %0, %2 : vector<256x16xf32>
    %c0_3 = arith.constant 0 : index
    %c0_4 = arith.constant 0 : index
    %4 = vector.load %arg4[%c0_3, %c0_4] : memref<1x16xf32, #tpu.memory_space<vmem>>, vector<1x16xf32>
    %5 = vector.broadcast %4 : vector<1x16xf32> to vector<256x16xf32>
    %6 = arith.addf %3, %5 : vector<256x16xf32>
    %cst = arith.constant 0.000000e+00 : f32
    %7 = vector.broadcast %cst : f32 to vector<256x16xf32>
    %8 = arith.maximumf %6, %7 : vector<256x16xf32>
    %c0_5 = arith.constant 0 : index
    %c0_6 = arith.constant 0 : index
    %9 = vector.load %arg5[%c0_5, %c0_6] : memref<16x32xf32, #tpu.memory_space<vmem>>, vector<16x32xf32>
    %cst_7 = arith.constant dense<0.000000e+00> : vector<256x32xf32>
    %10 = tpu.matmul %8, %9, %cst_7 {dimension_numbers = #tpu.dot_dimension_numbers<[1], [0], [0], [1], [0, 0, 1, 1], [], []>} : vector<256x16xf32>, vector<16x32xf32>, vector<256x32xf32> -> vector<256x32xf32>
    %c0_8 = arith.constant 0 : index
    %c0_9 = arith.constant 0 : index
    %11 = vector.load %arg6[%c0_8, %c0_9] : memref<256x32xf32, #tpu.memory_space<vmem>>, vector<256x32xf32>
    tpu.vector_store %arg6[%c0_8, %c0_9], %10 {strides = array<i32>} : memref<256x32xf32, #tpu.memory_space<vmem>>, vector<256x32xf32>,
    return
  }
  func.func @transform_0(%arg0: i32, %arg1: i32) -> (i32, i32) {
    %c0_i32 = arith.constant 0 : i32
    %c0_i32_0 = arith.constant 0 : i32
    return %arg0, %c0_i32 : i32, i32
  }
  func.func @transform_1(%arg0: i32, %arg1: i32) -> (i32, i32) {
    %c0_i32 = arith.constant 0 : i32
    %c0_i32_0 = arith.constant 0 : i32
    %c0_i32_1 = arith.constant 0 : i32
    return %c0_i32, %c0_i32_0 : i32, i32
  }
  func.func @transform_2(%arg0: i32, %arg1: i32) -> (i32, i32) {
    %c0_i32 = arith.constant 0 : i32
    %c0_i32_0 = arith.constant 0 : i32
    %c0_i32_1 = arith.constant 0 : i32
    return %c0_i32, %c0_i32_0 : i32, i32
  }
  func.func @transform_3(%arg0: i32, %arg1: i32) -> (i32, i32) {
    %c0_i32 = arith.constant 0 : i32
    %c0_i32_0 = arith.constant 0 : i32
    return %c0_i32, %arg1 : i32, i32
  }
  func.func @transform_4(%arg0: i32, %arg1: i32) -> (i32, i32) {
    %c0_i32 = arith.constant 0 : i32
    return %arg0, %arg1 : i32, i32
  }
}

module attributes {stable_mosaic.version = 11 : i64} {
  func.func @kernel(%arg0: i32, %arg1: i32, %arg2: memref<256x8xf32, #tpu.memory_space<vmem>>, %arg3: memref<1x8xf32, #tpu.memory_space<vmem>>, %arg4: memref<1x8xf32, #tpu.memory_space<vmem>>, %arg5: memref<8x32xf32, #tpu.memory_space<vmem>>, %arg6: memref<256x32xf32, #tpu.memory_space<vmem>>, %arg7: memref<256x32xf32, #tpu.memory_space<vmem>>) attributes {dimension_semantics = [#tpu.dimension_semantics<parallel>, #tpu.dimension_semantics<parallel>], iteration_bounds = array<i64: 2, 1>, scalar_prefetch = 0 : i64, scratch_operands = 0 : i64, tpu.core_type = #tpu.core_type<tc>, window_params = [{transform_indices = @transform_0, window_bounds = array<i64: 256, 8>}, {pipeline_mode = #tpu.pipeline_mode<synchronous>, transform_indices = @transform_1, window_bounds = array<i64: 1, 8>}, {pipeline_mode = #tpu.pipeline_mode<synchronous>, transform_indices = @transform_2, window_bounds = array<i64: 1, 8>}, {transform_indices = @transform_3, window_bounds = array<i64: 8, 32>}, {transform_indices = @transform_4, window_bounds = array<i64: 256, 32>}, {transform_indices = @transform_5, window_bounds = array<i64: 256, 32>}]} {
    %c0 = arith.constant 0 : index
    %c0_0 = arith.constant 0 : index
    %0 = vector.load %arg2[%c0, %c0_0] : memref<256x8xf32, #tpu.memory_space<vmem>>, vector<256x8xf32>
    %c0_1 = arith.constant 0 : index
    %c0_2 = arith.constant 0 : index
    %1 = vector.load %arg3[%c0_1, %c0_2] : memref<1x8xf32, #tpu.memory_space<vmem>>, vector<1x8xf32>
    %2 = vector.broadcast %1 : vector<1x8xf32> to vector<256x8xf32>
    %3 = arith.mulf %0, %2 : vector<256x8xf32>
    %c0_3 = arith.constant 0 : index
    %c0_4 = arith.constant 0 : index
    %4 = vector.load %arg4[%c0_3, %c0_4] : memref<1x8xf32, #tpu.memory_space<vmem>>, vector<1x8xf32>
    %5 = vector.broadcast %4 : vector<1x8xf32> to vector<256x8xf32>
    %6 = arith.addf %3, %5 : vector<256x8xf32>
    %cst = arith.constant 0.000000e+00 : f32
    %7 = vector.broadcast %cst : f32 to vector<256x8xf32>
    %8 = arith.maximumf %6, %7 : vector<256x8xf32>
    %c0_5 = arith.constant 0 : index
    %c0_6 = arith.constant 0 : index
    %9 = vector.load %arg5[%c0_5, %c0_6] : memref<8x32xf32, #tpu.memory_space<vmem>>, vector<8x32xf32>
    %cst_7 = arith.constant dense<0.000000e+00> : vector<256x32xf32>
    %10 = tpu.matmul %8, %9, %cst_7 {dimension_numbers = #tpu.dot_dimension_numbers<[1], [0], [0], [1], [0, 0, 1, 1], [], []>} : vector<256x8xf32>, vector<8x32xf32>, vector<256x32xf32> -> vector<256x32xf32>
    %c0_8 = arith.constant 0 : index
    %c0_9 = arith.constant 0 : index
    %11 = vector.load %arg6[%c0_8, %c0_9] : memref<256x32xf32, #tpu.memory_space<vmem>>, vector<256x32xf32>
    %12 = arith.addf %10, %11 : vector<256x32xf32>
    %c0_10 = arith.constant 0 : index
    %c0_11 = arith.constant 0 : index
    %13 = vector.load %arg7[%c0_10, %c0_11] : memref<256x32xf32, #tpu.memory_space<vmem>>, vector<256x32xf32>
    tpu.vector_store %arg7[%c0_10, %c0_11], %12 {strides = array<i32>} : memref<256x32xf32, #tpu.memory_space<vmem>>, vector<256x32xf32>,
    return
  }
  func.func @transform_0(%arg0: i32, %arg1: i32) -> (i32, i32) {
    %c0_i32 = arith.constant 0 : i32
    %c0_i32_0 = arith.constant 0 : i32
    return %arg0, %c0_i32 : i32, i32
  }
  func.func @transform_1(%arg0: i32, %arg1: i32) -> (i32, i32) {
    %c0_i32 = arith.constant 0 : i32
    %c0_i32_0 = arith.constant 0 : i32
    %c0_i32_1 = arith.constant 0 : i32
    return %c0_i32, %c0_i32_0 : i32, i32
  }
  func.func @transform_2(%arg0: i32, %arg1: i32) -> (i32, i32) {
    %c0_i32 = arith.constant 0 : i32
    %c0_i32_0 = arith.constant 0 : i32
    %c0_i32_1 = arith.constant 0 : i32
    return %c0_i32, %c0_i32_0 : i32, i32
  }
  func.func @transform_3(%arg0: i32, %arg1: i32) -> (i32, i32) {
    %c0_i32 = arith.constant 0 : i32
    %c0_i32_0 = arith.constant 0 : i32
    return %c0_i32, %arg1 : i32, i32
  }
  func.func @transform_4(%arg0: i32, %arg1: i32) -> (i32, i32) {
    %c0_i32 = arith.constant 0 : i32
    return %arg0, %arg1 : i32, i32
  }
  func.func @transform_5(%arg0: i32, %arg1: i32) -> (i32, i32) {
    %c0_i32 = arith.constant 0 : i32
    return %arg0, %arg1 : i32, i32
  }
}

module attributes {stable_mosaic.version = 11 : i64} {
  func.func @kernel(%arg0: i32, %arg1: memref<1x18x18x8xf32, #tpu.memory_space<vmem>>, %arg2: memref<18x18x1xf32, #tpu.memory_space<vmem>>, %arg3: memref<1x8xf32, #tpu.memory_space<vmem>>, %arg4: memref<1x8xf32, #tpu.memory_space<vmem>>, %arg5: memref<3x3x8x8xf32, #tpu.memory_space<vmem>>, %arg6: memref<1x256x8xf32, #tpu.memory_space<vmem>>, %arg7: memref<1x1x8xf32, #tpu.memory_space<vmem>>, %arg8: memref<1x1x8xf32, #tpu.memory_space<vmem>>) attributes {dimension_semantics = [#tpu.dimension_semantics<parallel>], iteration_bounds = array<i64: 2>, scalar_prefetch = 0 : i64, scratch_operands = 0 : i64, tpu.core_type = #tpu.core_type<tc>, window_params = [{transform_indices = @transform_0, window_bounds = array<i64: 1, 18, 18, 8>}, {pipeline_mode = #tpu.pipeline_mode<synchronous>, transform_indices = @transform_1, window_bounds = array<i64: 18, 18, 1>}, {pipeline_mode = #tpu.pipeline_mode<synchronous>, transform_indices = @transform_2, window_bounds = array<i64: 1, 8>}, {pipeline_mode = #tpu.pipeline_mode<synchronous>, transform_indices = @transform_3, window_bounds = array<i64: 1, 8>}, {pipeline_mode = #tpu.pipeline_mode<synchronous>, transform_indices = @transform_4, window_bounds = array<i64: 3, 3, 8, 8>}, {transform_indices = @transform_5, window_bounds = array<i64: 1, 256, 8>}, {transform_indices = @transform_6, window_bounds = array<i64: 1, 1, 8>}, {transform_indices = @transform_7, window_bounds = array<i64: 1, 1, 8>}]} {
    %c0 = arith.constant 0 : index
    %c0_0 = arith.constant 0 : index
    %c0_1 = arith.constant 0 : index
    %c0_2 = arith.constant 0 : index
    %0 = vector.load %arg1[%c0, %c0_0, %c0_1, %c0_2] : memref<1x18x18x8xf32, #tpu.memory_space<vmem>>, vector<1x18x18x8xf32>
    %1 = vector.shape_cast %0 : vector<1x18x18x8xf32> to vector<18x18x8xf32>
    %c0_3 = arith.constant 0 : index
    %c0_4 = arith.constant 0 : index
    %2 = vector.load %arg3[%c0_3, %c0_4] : memref<1x8xf32, #tpu.memory_space<vmem>>, vector<1x8xf32>
    %3 = vector.shape_cast %2 : vector<1x8xf32> to vector<1x1x8xf32>
    %4 = vector.broadcast %3 : vector<1x1x8xf32> to vector<18x18x8xf32>
    %5 = arith.mulf %1, %4 : vector<18x18x8xf32>
    %c0_5 = arith.constant 0 : index
    %c0_6 = arith.constant 0 : index
    %6 = vector.load %arg4[%c0_5, %c0_6] : memref<1x8xf32, #tpu.memory_space<vmem>>, vector<1x8xf32>
    %7 = vector.shape_cast %6 : vector<1x8xf32> to vector<1x1x8xf32>
    %8 = vector.broadcast %7 : vector<1x1x8xf32> to vector<18x18x8xf32>
    %9 = arith.addf %5, %8 : vector<18x18x8xf32>
    %cst = arith.constant 0.000000e+00 : f32
    %10 = vector.broadcast %cst : f32 to vector<18x18x8xf32>
    %11 = arith.maximumf %9, %10 : vector<18x18x8xf32>
    %c0_7 = arith.constant 0 : index
    %c0_8 = arith.constant 0 : index
    %c0_9 = arith.constant 0 : index
    %12 = vector.load %arg2[%c0_7, %c0_8, %c0_9] : memref<18x18x1xf32, #tpu.memory_space<vmem>>, vector<18x18x1xf32>
    %13 = vector.broadcast %12 : vector<18x18x1xf32> to vector<18x18x8xf32>
    %14 = arith.mulf %11, %13 : vector<18x18x8xf32>
    %cst_10 = arith.constant 0.000000e+00 : f32
    %15 = vector.broadcast %cst_10 : f32 to vector<256x8xf32>
    %16 = vector.extract_strided_slice %14 {offsets = [0, 0, 0], sizes = [16, 16, 8], strides = [1, 1, 1]} : vector<18x18x8xf32> to vector<16x16x8xf32>
    %17 = vector.shape_cast %16 : vector<16x16x8xf32> to vector<256x8xf32>
    %c0_11 = arith.constant 0 : index
    %c0_12 = arith.constant 0 : index
    %c0_13 = arith.constant 0 : index
    %c0_14 = arith.constant 0 : index
    %18 = vector.load %arg5[%c0_11, %c0_12, %c0_13, %c0_14] : memref<3x3x8x8xf32, #tpu.memory_space<vmem>>, vector<1x1x8x8xf32>
    %19 = vector.shape_cast %18 : vector<1x1x8x8xf32> to vector<8x8xf32>
    %cst_15 = arith.constant dense<0.000000e+00> : vector<256x8xf32>
    %20 = tpu.matmul %17, %19, %cst_15 {dimension_numbers = #tpu.dot_dimension_numbers<[1], [0], [0], [1], [0, 0, 1, 1], [], []>} : vector<256x8xf32>, vector<8x8xf32>, vector<256x8xf32> -> vector<256x8xf32>
    %21 = arith.addf %15, %20 : vector<256x8xf32>
    %22 = vector.extract_strided_slice %14 {offsets = [0, 1, 0], sizes = [16, 16, 8], strides = [1, 1, 1]} : vector<18x18x8xf32> to vector<16x16x8xf32>
    %23 = vector.shape_cast %22 : vector<16x16x8xf32> to vector<256x8xf32>
    %c0_16 = arith.constant 0 : index
    %c1 = arith.constant 1 : index
    %c0_17 = arith.constant 0 : index
    %c0_18 = arith.constant 0 : index
    %24 = vector.load %arg5[%c0_16, %c1, %c0_17, %c0_18] : memref<3x3x8x8xf32, #tpu.memory_space<vmem>>, vector<1x1x8x8xf32>
    %25 = vector.shape_cast %24 : vector<1x1x8x8xf32> to vector<8x8xf32>
    %cst_19 = arith.constant dense<0.000000e+00> : vector<256x8xf32>
    %26 = tpu.matmul %23, %25, %cst_19 {dimension_numbers = #tpu.dot_dimension_numbers<[1], [0], [0], [1], [0, 0, 1, 1], [], []>} : vector<256x8xf32>, vector<8x8xf32>, vector<256x8xf32> -> vector<256x8xf32>
    %27 = arith.addf %21, %26 : vector<256x8xf32>
    %28 = vector.extract_strided_slice %14 {offsets = [0, 2, 0], sizes = [16, 16, 8], strides = [1, 1, 1]} : vector<18x18x8xf32> to vector<16x16x8xf32>
    %29 = vector.shape_cast %28 : vector<16x16x8xf32> to vector<256x8xf32>
    %c0_20 = arith.constant 0 : index
    %c2 = arith.constant 2 : index
    %c0_21 = arith.constant 0 : index
    %c0_22 = arith.constant 0 : index
    %30 = vector.load %arg5[%c0_20, %c2, %c0_21, %c0_22] : memref<3x3x8x8xf32, #tpu.memory_space<vmem>>, vector<1x1x8x8xf32>
    %31 = vector.shape_cast %30 : vector<1x1x8x8xf32> to vector<8x8xf32>
    %cst_23 = arith.constant dense<0.000000e+00> : vector<256x8xf32>
    %32 = tpu.matmul %29, %31, %cst_23 {dimension_numbers = #tpu.dot_dimension_numbers<[1], [0], [0], [1], [0, 0, 1, 1], [], []>} : vector<256x8xf32>, vector<8x8xf32>, vector<256x8xf32> -> vector<256x8xf32>
    %33 = arith.addf %27, %32 : vector<256x8xf32>
    %34 = vector.extract_strided_slice %14 {offsets = [1, 0, 0], sizes = [16, 16, 8], strides = [1, 1, 1]} : vector<18x18x8xf32> to vector<16x16x8xf32>
    %35 = vector.shape_cast %34 : vector<16x16x8xf32> to vector<256x8xf32>
    %c1_24 = arith.constant 1 : index
    %c0_25 = arith.constant 0 : index
    %c0_26 = arith.constant 0 : index
    %c0_27 = arith.constant 0 : index
    %36 = vector.load %arg5[%c1_24, %c0_25, %c0_26, %c0_27] : memref<3x3x8x8xf32, #tpu.memory_space<vmem>>, vector<1x1x8x8xf32>
    %37 = vector.shape_cast %36 : vector<1x1x8x8xf32> to vector<8x8xf32>
    %cst_28 = arith.constant dense<0.000000e+00> : vector<256x8xf32>
    %38 = tpu.matmul %35, %37, %cst_28 {dimension_numbers = #tpu.dot_dimension_numbers<[1], [0], [0], [1], [0, 0, 1, 1], [], []>} : vector<256x8xf32>, vector<8x8xf32>, vector<256x8xf32> -> vector<256x8xf32>
    %39 = arith.addf %33, %38 : vector<256x8xf32>
    %40 = vector.extract_strided_slice %14 {offsets = [1, 1, 0], sizes = [16, 16, 8], strides = [1, 1, 1]} : vector<18x18x8xf32> to vector<16x16x8xf32>
    %41 = vector.shape_cast %40 : vector<16x16x8xf32> to vector<256x8xf32>
    %c1_29 = arith.constant 1 : index
    %c1_30 = arith.constant 1 : index
    %c0_31 = arith.constant 0 : index
    %c0_32 = arith.constant 0 : index
    %42 = vector.load %arg5[%c1_29, %c1_30, %c0_31, %c0_32] : memref<3x3x8x8xf32, #tpu.memory_space<vmem>>, vector<1x1x8x8xf32>
    %43 = vector.shape_cast %42 : vector<1x1x8x8xf32> to vector<8x8xf32>
    %cst_33 = arith.constant dense<0.000000e+00> : vector<256x8xf32>
    %44 = tpu.matmul %41, %43, %cst_33 {dimension_numbers = #tpu.dot_dimension_numbers<[1], [0], [0], [1], [0, 0, 1, 1], [], []>} : vector<256x8xf32>, vector<8x8xf32>, vector<256x8xf32> -> vector<256x8xf32>
    %45 = arith.addf %39, %44 : vector<256x8xf32>
    %46 = vector.extract_strided_slice %14 {offsets = [1, 2, 0], sizes = [16, 16, 8], strides = [1, 1, 1]} : vector<18x18x8xf32> to vector<16x16x8xf32>
    %47 = vector.shape_cast %46 : vector<16x16x8xf32> to vector<256x8xf32>
    %c1_34 = arith.constant 1 : index
    %c2_35 = arith.constant 2 : index
    %c0_36 = arith.constant 0 : index
    %c0_37 = arith.constant 0 : index
    %48 = vector.load %arg5[%c1_34, %c2_35, %c0_36, %c0_37] : memref<3x3x8x8xf32, #tpu.memory_space<vmem>>, vector<1x1x8x8xf32>
    %49 = vector.shape_cast %48 : vector<1x1x8x8xf32> to vector<8x8xf32>
    %cst_38 = arith.constant dense<0.000000e+00> : vector<256x8xf32>
    %50 = tpu.matmul %47, %49, %cst_38 {dimension_numbers = #tpu.dot_dimension_numbers<[1], [0], [0], [1], [0, 0, 1, 1], [], []>} : vector<256x8xf32>, vector<8x8xf32>, vector<256x8xf32> -> vector<256x8xf32>
    %51 = arith.addf %45, %50 : vector<256x8xf32>
    %52 = vector.extract_strided_slice %14 {offsets = [2, 0, 0], sizes = [16, 16, 8], strides = [1, 1, 1]} : vector<18x18x8xf32> to vector<16x16x8xf32>
    %53 = vector.shape_cast %52 : vector<16x16x8xf32> to vector<256x8xf32>
    %c2_39 = arith.constant 2 : index
    %c0_40 = arith.constant 0 : index
    %c0_41 = arith.constant 0 : index
    %c0_42 = arith.constant 0 : index
    %54 = vector.load %arg5[%c2_39, %c0_40, %c0_41, %c0_42] : memref<3x3x8x8xf32, #tpu.memory_space<vmem>>, vector<1x1x8x8xf32>
    %55 = vector.shape_cast %54 : vector<1x1x8x8xf32> to vector<8x8xf32>
    %cst_43 = arith.constant dense<0.000000e+00> : vector<256x8xf32>
    %56 = tpu.matmul %53, %55, %cst_43 {dimension_numbers = #tpu.dot_dimension_numbers<[1], [0], [0], [1], [0, 0, 1, 1], [], []>} : vector<256x8xf32>, vector<8x8xf32>, vector<256x8xf32> -> vector<256x8xf32>
    %57 = arith.addf %51, %56 : vector<256x8xf32>
    %58 = vector.extract_strided_slice %14 {offsets = [2, 1, 0], sizes = [16, 16, 8], strides = [1, 1, 1]} : vector<18x18x8xf32> to vector<16x16x8xf32>
    %59 = vector.shape_cast %58 : vector<16x16x8xf32> to vector<256x8xf32>
    %c2_44 = arith.constant 2 : index
    %c1_45 = arith.constant 1 : index
    %c0_46 = arith.constant 0 : index
    %c0_47 = arith.constant 0 : index
    %60 = vector.load %arg5[%c2_44, %c1_45, %c0_46, %c0_47] : memref<3x3x8x8xf32, #tpu.memory_space<vmem>>, vector<1x1x8x8xf32>
    %61 = vector.shape_cast %60 : vector<1x1x8x8xf32> to vector<8x8xf32>
    %cst_48 = arith.constant dense<0.000000e+00> : vector<256x8xf32>
    %62 = tpu.matmul %59, %61, %cst_48 {dimension_numbers = #tpu.dot_dimension_numbers<[1], [0], [0], [1], [0, 0, 1, 1], [], []>} : vector<256x8xf32>, vector<8x8xf32>, vector<256x8xf32> -> vector<256x8xf32>
    %63 = arith.addf %57, %62 : vector<256x8xf32>
    %64 = vector.extract_strided_slice %14 {offsets = [2, 2, 0], sizes = [16, 16, 8], strides = [1, 1, 1]} : vector<18x18x8xf32> to vector<16x16x8xf32>
    %65 = vector.shape_cast %64 : vector<16x16x8xf32> to vector<256x8xf32>
    %c2_49 = arith.constant 2 : index
    %c2_50 = arith.constant 2 : index
    %c0_51 = arith.constant 0 : index
    %c0_52 = arith.constant 0 : index
    %66 = vector.load %arg5[%c2_49, %c2_50, %c0_51, %c0_52] : memref<3x3x8x8xf32, #tpu.memory_space<vmem>>, vector<1x1x8x8xf32>
    %67 = vector.shape_cast %66 : vector<1x1x8x8xf32> to vector<8x8xf32>
    %cst_53 = arith.constant dense<0.000000e+00> : vector<256x8xf32>
    %68 = tpu.matmul %65, %67, %cst_53 {dimension_numbers = #tpu.dot_dimension_numbers<[1], [0], [0], [1], [0, 0, 1, 1], [], []>} : vector<256x8xf32>, vector<8x8xf32>, vector<256x8xf32> -> vector<256x8xf32>
    %69 = arith.addf %63, %68 : vector<256x8xf32>
    %c0_54 = arith.constant 0 : index
    %c0_55 = arith.constant 0 : index
    %c0_56 = arith.constant 0 : index
    %70 = vector.load %arg6[%c0_54, %c0_55, %c0_56] : memref<1x256x8xf32, #tpu.memory_space<vmem>>, vector<1x256x8xf32>
    %71 = vector.shape_cast %70 : vector<1x256x8xf32> to vector<256x8xf32>
    %72 = vector.shape_cast %69 : vector<256x8xf32> to vector<1x256x8xf32>
    tpu.vector_store %arg6[%c0_54, %c0_55, %c0_56], %72 {strides = array<i32>} : memref<1x256x8xf32, #tpu.memory_space<vmem>>, vector<1x256x8xf32>,
    %cst_57 = arith.constant dense<0.000000e+00> : vector<8xf32>
    %73 = vector.multi_reduction <add>, %69, %cst_57 [0] : vector<256x8xf32> to vector<8xf32>
    %74 = vector.shape_cast %73 : vector<8xf32> to vector<1x8xf32>
    %c0_58 = arith.constant 0 : index
    %c0_59 = arith.constant 0 : index
    %c0_60 = arith.constant 0 : index
    %75 = vector.load %arg7[%c0_58, %c0_59, %c0_60] : memref<1x1x8xf32, #tpu.memory_space<vmem>>, vector<1x1x8xf32>
    %76 = vector.shape_cast %75 : vector<1x1x8xf32> to vector<1x8xf32>
    %77 = vector.shape_cast %74 : vector<1x8xf32> to vector<1x1x8xf32>
    tpu.vector_store %arg7[%c0_58, %c0_59, %c0_60], %77 {strides = array<i32>} : memref<1x1x8xf32, #tpu.memory_space<vmem>>, vector<1x1x8xf32>,
    %78 = arith.mulf %69, %69 : vector<256x8xf32>
    %cst_61 = arith.constant dense<0.000000e+00> : vector<8xf32>
    %79 = vector.multi_reduction <add>, %78, %cst_61 [0] : vector<256x8xf32> to vector<8xf32>
    %80 = vector.shape_cast %79 : vector<8xf32> to vector<1x8xf32>
    %c0_62 = arith.constant 0 : index
    %c0_63 = arith.constant 0 : index
    %c0_64 = arith.constant 0 : index
    %81 = vector.load %arg8[%c0_62, %c0_63, %c0_64] : memref<1x1x8xf32, #tpu.memory_space<vmem>>, vector<1x1x8xf32>
    %82 = vector.shape_cast %81 : vector<1x1x8xf32> to vector<1x8xf32>
    %83 = vector.shape_cast %80 : vector<1x8xf32> to vector<1x1x8xf32>
    tpu.vector_store %arg8[%c0_62, %c0_63, %c0_64], %83 {strides = array<i32>} : memref<1x1x8xf32, #tpu.memory_space<vmem>>, vector<1x1x8xf32>,
    return
  }
  func.func @transform_0(%arg0: i32) -> (i32, i32, i32, i32) {
    %c0_i32 = arith.constant 0 : i32
    %c0_i32_0 = arith.constant 0 : i32
    %c0_i32_1 = arith.constant 0 : i32
    %c0_i32_2 = arith.constant 0 : i32
    return %arg0, %c0_i32, %c0_i32_0, %c0_i32_1 : i32, i32, i32, i32
  }
  func.func @transform_1(%arg0: i32) -> (i32, i32, i32) {
    %c0_i32 = arith.constant 0 : i32
    %c0_i32_0 = arith.constant 0 : i32
    %c0_i32_1 = arith.constant 0 : i32
    %c0_i32_2 = arith.constant 0 : i32
    return %c0_i32, %c0_i32_0, %c0_i32_1 : i32, i32, i32
  }
  func.func @transform_2(%arg0: i32) -> (i32, i32) {
    %c0_i32 = arith.constant 0 : i32
    %c0_i32_0 = arith.constant 0 : i32
    %c0_i32_1 = arith.constant 0 : i32
    return %c0_i32, %c0_i32_0 : i32, i32
  }
  func.func @transform_3(%arg0: i32) -> (i32, i32) {
    %c0_i32 = arith.constant 0 : i32
    %c0_i32_0 = arith.constant 0 : i32
    %c0_i32_1 = arith.constant 0 : i32
    return %c0_i32, %c0_i32_0 : i32, i32
  }
  func.func @transform_4(%arg0: i32) -> (i32, i32, i32, i32) {
    %c0_i32 = arith.constant 0 : i32
    %c0_i32_0 = arith.constant 0 : i32
    %c0_i32_1 = arith.constant 0 : i32
    %c0_i32_2 = arith.constant 0 : i32
    %c0_i32_3 = arith.constant 0 : i32
    return %c0_i32, %c0_i32_0, %c0_i32_1, %c0_i32_2 : i32, i32, i32, i32
  }
  func.func @transform_5(%arg0: i32) -> (i32, i32, i32) {
    %c0_i32 = arith.constant 0 : i32
    %c0_i32_0 = arith.constant 0 : i32
    %c0_i32_1 = arith.constant 0 : i32
    return %arg0, %c0_i32, %c0_i32_0 : i32, i32, i32
  }
  func.func @transform_6(%arg0: i32) -> (i32, i32, i32) {
    %c0_i32 = arith.constant 0 : i32
    %c0_i32_0 = arith.constant 0 : i32
    %c0_i32_1 = arith.constant 0 : i32
    return %arg0, %c0_i32, %c0_i32_0 : i32, i32, i32
  }
  func.func @transform_7(%arg0: i32) -> (i32, i32, i32) {
    %c0_i32 = arith.constant 0 : i32
    %c0_i32_0 = arith.constant 0 : i32
    %c0_i32_1 = arith.constant 0 : i32
    return %arg0, %c0_i32, %c0_i32_0 : i32, i32, i32
  }
}

</mosaic_0001>

<bundles_post_ra>
// kernel: preact_bottleneck_forward.4
= control target key start
LH: loop header
LB: loop body
LE: loop exit
PB: predicated region body
PF: predicated region fallthrough
CT: control target
= control target key end

     0   :  { %s1574_s21 = smov 0   ;;  %s1576_s22 = smov 0   ;;  %s2149_s0 = inlined_call_operand.vmem [shape: f32[512,16], index: 0, kind: input, shape index: {}]   ;;  %s2150_s1 = inlined_call_operand.vmem [shape: f32[1,16], index: 1, kind: input, shape index: {}]   ;;  %s2151_s2 = inlined_call_operand.vmem [shape: f32[1,16], index: 2, kind: input, shape index: {}]   ;;  %s2152_s3 = inlined_call_operand.vmem [shape: f32[16,8], index: 3, kind: input, shape index: {}]   ;;  %s2153_s4 = inlined_call_operand.vmem [shape: f32[512,8], index: 4, kind: output, shape index: {0}]   ;;  %s2154_s5 = inlined_call_operand.vmem [shape: f32[2,1,8], index: 5, kind: output, shape index: {1}]   ;;  %s2155_s6 = inlined_call_operand.vmem [shape: f32[2,1,8], index: 6, kind: output, shape index: {2}]  }
   0x1   :  { %s1578_s23 = smov 0  }
   0x2 LB: > { %s29_s24 = sadd.s32 1, %s1533_s22  ;;  %p1357_p0 = scmp.ge.s32.totalorder %s1537_s23, 1  ;;  %s1537_s23 = sphi %s1578_s23, %s17_s23   ;;  %s1533_s22 = sphi %s1576_s22, %s2157_s22   ;;  %s1529_s21 = sphi %s1574_s21, %s2156_s21  }
   0x3   : > { %p31_p1 = scmp.ge.s32.totalorder %s29_s24, 2  ;;  %p245_p2 = scmp.lt.s32.totalorder %s1537_s23, 3 }
   0x5   : > { %s2159_s24 = smov (%p31_p1, %s29_s24), 0  ;;  %p246_p3 = pnand %p1357_p0, %p245_p2 }
   0x6   : > { %v467_v0 = vld [vmem:[%s2152_s3] sm:$0xff] (!%p246_p3)  ;;  %v468_v1 = vld [vmem:[%s2152_s3 + $0x8] sm:$0xff] (!%p246_p3)  ;;  %s1358_s29 = sshll.u32 (!%p246_p3), %s1529_s21, 5  ;;  %vm469_vm0 = vcmask (!%p246_p3), 130048   ;;  %s1396_s14 = sshll.u32 (!%p246_p3), %s1529_s21, 8  ;;  %vm791_vm1 = vcmask (!%p246_p3), 64512  }
   0x7   : > { %249 = sbr.rel (%p246_p3) target bundleno = 319 (0x13f), region = 36  ;;  %v1485_v2 = vpack.c.bf16 (!%p246_p3), %v468_v1, %v467_v0  ;;  %p295_p4 = scmp.lt.s32.totalorder (!%p246_p3), %s1358_s29, 63  ;;  %v1607_v3 = vld [vmem:[%s2150_s1] ss:$0 sm:$0xff] (!%p246_p3) }
   0x8   : > { %v1619_v4 = vld [vmem:[%s2151_s2] ss:$0 sm:$0xff] (!%p246_p3)  ;;  %p313_p5 = scmp.lt.s32.totalorder (!%p246_p3), %s1529_s21, 1 }
   0x9   : > { %1486 = vmatprep.subr.bf16.mxu0 (!%p246_p3), %v1485_v2  ;;  %1489 = vmatprep.subr.bf16.mxu1 (!%p246_p3), %v1485_v2 }
   0xa   : > { %1488 = vmatpush3.bf16.msra.mxu0 (!%p246_p3), %v1485_v2  ;;  %1490 = vmatpush3.bf16.msra.mxu1 (!%p246_p3), %v1485_v2 }
   0xe   : > { %s2161_s29 = smov (!%p295_p4, %s1358_s29), 63  ;;  %s2163_s21 = smov (!%p313_p5, %s1529_s21), 1 }
   0xf   : > { %s1359_s30 = sshll.u32 %s2161_s29, 3  ;;  %s318_s20 = scalar_lea.vmem %s2154_s5, %s2163_s21 }
  0x10   : > { %s1614_s11 = scalar_lea.vmem %s2149_s0, %s1359_s30  ;;  %s1779_s17 = scalar_lea.vmem %s2153_s4, %s1359_s30 }
  0x11   : > { %v325_v5 = vld [vmem:[%s1614_s11] sm:$0xff]  ;;  %v326_v6 = vld [vmem:[%s1614_s11 + $0x8] sm:$0xff]  ;;  %v327_v7 = vld [vmem:[%s1614_s11 + $0x10] sm:$0xff]  ;;  %s324_s27 = scalar_lea.vmem %s2155_s6, %s2163_s21 }
  0x12   : > { %v364_v8 = vmul.f32 %v1607_v3, %v325_v5  ;;  %v365_v9 = vmul.f32 %v1607_v3, %v326_v6  ;;  %v366_v10 = vmul.f32 %v1607_v3, %v327_v7  ;;  %v328_v11 = vld [vmem:[%s1614_s11 + $0x18] sm:$0xff]  ;;  %v329_v12 = vld [vmem:[%s1614_s11 + $0x20] sm:$0xff]  ;;  %v330_v13 = vld [vmem:[%s1614_s11 + $0x28] sm:$0xff] }
  0x13   : > { %v367_v14 = vmul.f32 %v1607_v3, %v328_v11  ;;  %v368_v15 = vmul.f32 %v1607_v3, %v329_v12  ;;  %v331_v16 = vld [vmem:[%s1614_s11 + $0x30] sm:$0xff]  ;;  %v332_v17 = vld [vmem:[%s1614_s11 + $0x38] sm:$0xff]  ;;  %v369_v21 = vmul.f32 %v1607_v3, %v330_v13  ;;  %v333_v29 = vld [vmem:[%s1614_s11 + $0x40] sm:$0xff] }
  0x14   : > { %v403_v18 = vadd.f32 %v1619_v4, %v364_v8  ;;  %v404_v19 = vadd.f32 %v1619_v4, %v365_v9  ;;  %v405_v20 = vadd.f32 %v1619_v4, %v366_v10  ;;  %v370_v23 = vmul.f32 %v1607_v3, %v331_v16  ;;  %v334_v31 = vld [vmem:[%s1614_s11 + $0x48] sm:$0xff]  ;;  %v335_v36 = vld [vmem:[%s1614_s11 + $0x50] sm:$0xff]  ;;  %v336_v38 = vld [vmem:[%s1614_s11 + $0x58] sm:$0xff] }
  0x15   : > { %v406_v22 = vadd.f32 %v1619_v4, %v367_v14  ;;  %v371_v24 = vmul.f32 %v1607_v3, %v332_v17  ;;  %v407_v28 = vadd.f32 %v1619_v4, %v368_v15  ;;  %v408_v30 = vadd.f32 %v1619_v4, %v369_v21  ;;  %v341_v40 = vld [vmem:[%s1614_s11 + $0x80] sm:$0xff]  ;;  %v342_v41 = vld [vmem:[%s1614_s11 + $0x88] sm:$0xff]  ;;  %v343_v42 = vld [vmem:[%s1614_s11 + $0x90] sm:$0xff] }
  0x16   : > { %v435_v25 = vmax.f32 %v403_v18, 0.0  ;;  %v436_v26 = vmax.f32 %v404_v19, 0.0  ;;  %v437_v27 = vmax.f32 %v405_v20, 0.0  ;;  %v409_v33 = vadd.f32 %v1619_v4, %v370_v23  ;;  %v337_v44 = vld [vmem:[%s1614_s11 + $0x60] sm:$0xff]  ;;  %v344_v45 = vld [vmem:[%s1614_s11 + $0x98] sm:$0xff]  ;;  %v346_v55 = vld [vmem:[%s1614_s11 + $0xa8] sm:$0xff] }
  0x17   : > { %v438_v32 = vmax.f32 %v406_v22, 0.0  ;;  %v410_v34 = vadd.f32 %v1619_v4, %v371_v24  ;;  %v372_v35 = vmul.f32 %v1607_v3, %v333_v29  ;;  %v439_v37 = vmax.f32 %v407_v28, 0.0  ;;  %v345_v46 = vld [vmem:[%s1614_s11 + $0xa0] sm:$0xff]  ;;  %v347_v56 = vld [vmem:[%s1614_s11 + $0xb0] sm:$0xff]  ;;  %v338_v2 = vld [vmem:[%s1614_s11 + $0x68] sm:$0xff] }
  0x18   : > { %1437 = vmatprep.mubr.msk.f32.mxu0 %vm469_vm0, %v435_v25  ;;  %v373_v39 = vmul.f32 %v1607_v3, %v334_v31  ;;  %v374_v43 = vmul.f32 %v1607_v3, %v335_v36  ;;  %v440_v47 = vmax.f32 %v408_v30, 0.0  ;;  %v441_v48 = vmax.f32 %v409_v33, 0.0  ;;  %v339_v5 = vld [vmem:[%s1614_s11 + $0x70] sm:$0xff]  ;;  %v348_v13 = vld [vmem:[%s1614_s11 + $0xb8] sm:$0xff]  ;;  %v349_v14 = vld [vmem:[%s1614_s11 + $0xc0] sm:$0xff] }
  0x19   : > { %1438 = vmatmul.mubr.msk.f32.vlgmr.msra.gmra.mrb[0].mxu0 %vm469_vm0, %v436_v26  ;;  %v442_v49 = vmax.f32 %v410_v34, 0.0  ;;  %v411_v50 = vadd.f32 %v1619_v4, %v372_v35  ;;  %v375_v51 = vmul.f32 %v1607_v3, %v336_v38  ;;  %v380_v52 = vmul.f32 %v1607_v3, %v341_v40  ;;  %v340_v20 = vld [vmem:[%s1614_s11 + $0x78] sm:$0xff]  ;;  %v350_v28 = vld [vmem:[%s1614_s11 + $0xc8] sm:$0xff]  ;;  %v351_v29 = vld [vmem:[%s1614_s11 + $0xd0] sm:$0xff] }
  0x1a   : > { %1440 = vmatprep.mubr.msk.f32.mxu0 %vm469_vm0, %v437_v27  ;;  %v381_v53 = vmul.f32 %v1607_v3, %v342_v41  ;;  %v382_v54 = vmul.f32 %v1607_v3, %v343_v42  ;;  %v412_v57 = vadd.f32 %v1619_v4, %v373_v39  ;;  %v376_v58 = vmul.f32 %v1607_v3, %v337_v44  ;;  %v352_v41 = vld [vmem:[%s1614_s11 + $0xd8] sm:$0xff]  ;;  %v353_v42 = vld [vmem:[%s1614_s11 + $0xe0] sm:$0xff] }
  0x1b   : > { %v383_v59 = vmul.f32 %v1607_v3, %v344_v45  ;;  %v384_v60 = vmul.f32 %v1607_v3, %v345_v46  ;;  %v413_v61 = vadd.f32 %v1619_v4, %v374_v43  ;;  %v419_v62 = vadd.f32 %v1619_v4, %v380_v52  ;;  %v354_v52 = vld [vmem:[%s1614_s11 + $0xe8] sm:$0xff] }
  0x1c   : > { %v420_v63 = vadd.f32 %v1619_v4, %v381_v53  ;;  %v421_v0 = vadd.f32 %v1619_v4, %v382_v54  ;;  %v443_v1 = vmax.f32 %v411_v50, 0.0  ;;  %v385_v7 = vmul.f32 %v1607_v3, %v346_v55  ;;  %v355_v53 = vld [vmem:[%s1614_s11 + $0xf0] sm:$0xff] }
  0x1d   : > { %1441 = vmatmul.mubr.msk.f32.gmra.mrb[2].mxu0 %vm469_vm0, %v438_v32  ;;  %v422_v6 = vadd.f32 %v1619_v4, %v383_v59  ;;  %v386_v8 = vmul.f32 %v1607_v3, %v347_v56  ;;  %v451_v9 = vmax.f32 %v419_v62, 0.0  ;;  %v423_v12 = vadd.f32 %v1619_v4, %v384_v60 }
  0x1e   : > { %1443 = vmatprep.mubr.msk.f32.mxu0 %vm469_vm0, %v439_v37  ;;  %v452_v10 = vmax.f32 %v420_v63, 0.0  ;;  %v453_v11 = vmax.f32 %v421_v0, 0.0  ;;  %v414_v15 = vadd.f32 %v1619_v4, %v375_v51  ;;  %v415_v16 = vadd.f32 %v1619_v4, %v376_v58 }
  0x1f   : > { %v377_v17 = vmul.f32 %v1607_v3, %v338_v2  ;;  %v378_v18 = vmul.f32 %v1607_v3, %v339_v5  ;;  %1461 = vmatprep.mubr.msk.f32.mxu1 %vm469_vm0, %v451_v9  ;;  %v444_v19 = vmax.f32 %v412_v57, 0.0  ;;  %v454_v21 = vmax.f32 %v422_v6, 0.0 }
  0x20   : > { %1462 = vmatmul.mubr.msk.f32.vlgmr.msra.gmra.mrb[0].mxu1 %vm469_vm0, %v452_v10  ;;  %v424_v22 = vadd.f32 %v1619_v4, %v385_v7  ;;  %v387_v23 = vmul.f32 %v1607_v3, %v348_v13  ;;  %v445_v24 = vmax.f32 %v413_v61, 0.0  ;;  %v455_v25 = vmax.f32 %v423_v12, 0.0  ;;  %v356_v61 = vld [vmem:[%s1614_s11 + $0xf8] sm:$0xff] }
  0x21   : > { %1444 = vmatmul.mubr.msk.f32.gmra.mrb[4].mxu0 %vm469_vm0, %v440_v47  ;;  %1464 = vmatprep.mubr.msk.f32.mxu1 %vm469_vm0, %v453_v11  ;;  %v425_v26 = vadd.f32 %v1619_v4, %v386_v8  ;;  %v388_v27 = vmul.f32 %v1607_v3, %v349_v14  ;;  %v416_v30 = vadd.f32 %v1619_v4, %v377_v17  ;;  %v446_v33 = vmax.f32 %v414_v15, 0.0 }
  0x22   : > { %1446 = vmatprep.mubr.msk.f32.mxu0 %vm469_vm0, %v441_v48  ;;  %v417_v31 = vadd.f32 %v1619_v4, %v378_v18  ;;  %v379_v32 = vmul.f32 %v1607_v3, %v340_v20  ;;  %v456_v34 = vmax.f32 %v424_v22, 0.0  ;;  %v426_v35 = vadd.f32 %v1619_v4, %v387_v23 }
  0x23   : > { %v389_v36 = vmul.f32 %v1607_v3, %v350_v28  ;;  %v447_v37 = vmax.f32 %v415_v16, 0.0  ;;  %v457_v38 = vmax.f32 %v425_v26, 0.0  ;;  %v427_v39 = vadd.f32 %v1619_v4, %v388_v27 }
  0x24   : > { %1465 = vmatmul.mubr.msk.f32.gmra.mrb[2].mxu1 %vm469_vm0, %v454_v21  ;;  %v390_v40 = vmul.f32 %v1607_v3, %v351_v29  ;;  %v448_v43 = vmax.f32 %v416_v30, 0.0  ;;  %v418_v44 = vadd.f32 %v1619_v4, %v379_v32  ;;  %v458_v45 = vmax.f32 %v426_v35, 0.0 }
  0x25   : > { %1447 = vmatmul.mubr.msk.f32.gmra.mrb[6].mxu0 %vm469_vm0, %v442_v49  ;;  %1467 = vmatprep.mubr.msk.f32.mxu1 %vm469_vm0, %v455_v25  ;;  %v428_v46 = vadd.f32 %v1619_v4, %v389_v36  ;;  %v391_v47 = vmul.f32 %v1607_v3, %v352_v41  ;;  %v449_v48 = vmax.f32 %v417_v31, 0.0  ;;  %v459_v49 = vmax.f32 %v427_v39, 0.0 }
  0x26   : > { %1449 = vmatprep.mubr.msk.f32.mxu0 %vm469_vm0, %v443_v1  ;;  %v429_v50 = vadd.f32 %v1619_v4, %v390_v40  ;;  %v392_v51 = vmul.f32 %v1607_v3, %v353_v42  ;;  %v450_v54 = vmax.f32 %v418_v44, 0.0  ;;  %v393_v57 = vmul.f32 %v1607_v3, %v354_v52 }
  0x27   : > { %v460_v55 = vmax.f32 %v428_v46, 0.0  ;;  %v430_v56 = vadd.f32 %v1619_v4, %v391_v47  ;;  %v394_v60 = vmul.f32 %v1607_v3, %v355_v53  ;;  %v395_v0 = vmul.f32 %v1607_v3, %v356_v61 }
  0x28   : > { %1468 = vmatmul.mubr.msk.f32.gmra.mrb[4].mxu1 %vm469_vm0, %v456_v34  ;;  %v461_v58 = vmax.f32 %v429_v50, 0.0  ;;  %v431_v59 = vadd.f32 %v1619_v4, %v392_v51  ;;  %v432_v63 = vadd.f32 %v1619_v4, %v393_v57  ;;  %v825_v3 = vlaneseq }
  0x29   : > { %1450 = vmatmul.mubr.msk.f32.gmra.mrb[8].mxu0 %vm469_vm0, %v444_v19  ;;  %1470 = vmatprep.mubr.msk.f32.mxu1 %vm469_vm0, %v457_v38  ;;  %v462_v62 = vmax.f32 %v430_v56, 0.0  ;;  %v433_v2 = vadd.f32 %v1619_v4, %v394_v60  ;;  %v434_v6 = vadd.f32 %v1619_v4, %v395_v0  ;;  %v1753_v11 = vstv %s1396_s14 }
  0x2a   : > { %1452 = vmatprep.mubr.msk.f32.mxu0 %vm469_vm0, %v445_v24  ;;  %v463_v1 = vmax.f32 %v431_v59, 0.0  ;;  %v464_v5 = vmax.f32 %v432_v63, 0.0  ;;  %v1749_v9 = vshrl.u32 %v825_v3, 7 }
  0x2b   : > { %v465_v7 = vmax.f32 %v433_v2, 0.0  ;;  %v466_v8 = vmax.f32 %v434_v6, 0.0 }
  0x2c   : > { %1471 = vmatmul.mubr.msk.f32.gmra.mrb[6].mxu1 %vm469_vm0, %v458_v45  ;;  %v827_v10 = vadd.s32 8, %v1749_v9  ;;  %v829_v4 = vadd.s32 24, %v1749_v9  ;;  %v828_v12 = vadd.s32 16, %v1749_v9  ;;  %v831_v13 = vadd.s32 40, %v1749_v9 }
  0x2d   : > { %1453 = vmatmul.mubr.msk.f32.gmra.mrb[10].mxu0 %vm469_vm0, %v446_v33  ;;  %1473 = vmatprep.mubr.msk.f32.mxu1 %vm469_vm0, %v459_v49  ;;  %v830_v14 = vadd.s32 32, %v1749_v9  ;;  %v859_v16 = vadd.s32 %v1753_v11, %v1749_v9  ;;  %v833_v17 = vadd.s32 56, %v1749_v9  ;;  %v832_v20 = vadd.s32 48, %v1749_v9 }
  0x2e   : > { %1455 = vmatprep.mubr.msk.f32.mxu0 %vm469_vm0, %v447_v37  ;;  %v860_v15 = vadd.s32 %v1753_v11, %v827_v10  ;;  %v862_v18 = vadd.s32 %v1753_v11, %v829_v4  ;;  %v861_v19 = vadd.s32 %v1753_v11, %v828_v12  ;;  %v1767_v21 = vadd.s32 %v1753_v11, %v831_v13 }
  0x2f   : > { %v1770_v22 = vadd.s32 %v1753_v11, %v830_v14  ;;  %v835_v23 = vadd.s32 72, %v1749_v9  ;;  %v834_v24 = vadd.s32 64, %v1749_v9  ;;  %vm891_vm3 = vcmp.lt.s32.totalorder %v859_v16, 512 }
  0x30   : > { %1474 = vmatmul.mubr.msk.f32.gmra.mrb[8].mxu1 %vm469_vm0, %v460_v55  ;;  %vm892_vm2 = vcmp.lt.s32.totalorder %v860_v15, 512  ;;  %v1782_v25 = vadd.s32 %v1753_v11, %v833_v17  ;;  %vm894_vm4 = vcmp.lt.s32.totalorder %v862_v18, 512  ;;  %vm893_vm5 = vcmp.lt.s32.totalorder %v861_v19, 512 }
  0x31   : > { %1456 = vmatmul.mubr.msk.f32.gmra.mrb[12].mxu0 %vm469_vm0, %v448_v43  ;;  %1476 = vmatprep.mubr.msk.f32.mxu1 %vm469_vm0, %v461_v58  ;;  %v1785_v26 = vadd.s32 %v1753_v11, %v832_v20  ;;  %v837_v27 = vadd.s32 88, %v1749_v9  ;;  %vm896_vm6 = vcmp.lt.s32.totalorder %v1767_v21, 512  ;;  %vm895_vm7 = vcmp.lt.s32.totalorder %v1770_v22, 512 }
  0x32   : > { %1458 = vmatprep.mubr.msk.f32.mxu0 %vm469_vm0, %v449_v48  ;;  %v1791_v29 = vadd.s32 %v1753_v11, %v835_v23  ;;  %v836_v30 = vadd.s32 80, %v1749_v9  ;;  %v1797_v33 = vadd.s32 %v1753_v11, %v834_v24  ;;  %v839_v34 = vadd.s32 104, %v1749_v9 }
  0x33   : > { %v838_v35 = vadd.s32 96, %v1749_v9  ;;  %vm898_vm8 = vcmp.lt.s32.totalorder %v1782_v25, 512  ;;  %v841_v39 = vadd.s32 120, %v1749_v9  ;;  %vm897_vm9 = vcmp.lt.s32.totalorder %v1785_v26, 512 }
  0x34   : > { %1477 = vmatmul.mubr.msk.f32.gmra.mrb[10].mxu1 %vm469_vm0, %v462_v62  ;;  %v1810_v42 = vadd.s32 %v1753_v11, %v837_v27  ;;  %v840_v43 = vadd.s32 112, %v1749_v9  ;;  %v1815_v47 = vadd.s32 %v1753_v11, %v836_v30  ;;  %v843_v48 = vadd.s32 136, %v1749_v9 }
  0x35   : > { %1459 = vmatmul.mubr.msk.f32.gmra.mrb[14].mxu0 %vm469_vm0, %v450_v54  ;;  %1479 = vmatprep.mubr.msk.f32.mxu1 %vm469_vm0, %v463_v1  ;;  %v1823_v52 = vadd.s32 %v1753_v11, %v839_v34  ;;  %v842_v53 = vadd.s32 128, %v1749_v9  ;;  %vm900_vm10 = vcmp.lt.s32.totalorder %v1791_v29, 512  ;;  %v1831_v56 = vadd.s32 %v1753_v11, %v838_v35 }
  0x36   : > { %v1834_v57 = vadd.s32 %v1753_v11, %v841_v39  ;;  %vm899_vm11 = vcmp.lt.s32.totalorder %v1797_v33, 512  ;;  %v1839_v61 = vadd.s32 %v1753_v11, %v840_v43  ;;  %v1842_v0 = vadd.s32 %v1753_v11, %v843_v48 }
  0x37   : > { %v845_v1 = vadd.s32 152, %v1749_v9  ;;  %v844_v2 = vadd.s32 144, %v1749_v9  ;;  %v847_v3 = vadd.s32 168, %v1749_v9  ;;  %vm902_vm12 = vcmp.lt.s32.totalorder %v1810_v42, 512 }
  0x38   : > { %1480 = vmatmul.mubr.msk.f32.gmra.mrb[12].mxu1 %vm469_vm0, %v464_v5  ;;  %vm901_vm13 = vcmp.lt.s32.totalorder %v1815_v47, 512  ;;  %v846_v23 = vadd.s32 160, %v1749_v9  ;;  %vm904_vm14 = vcmp.lt.s32.totalorder %v1823_v52, 512  ;;  %v853_v47 = vadd.s32 216, %v1749_v9 }
  0x39   : > { %1482 = vmatprep.mubr.msk.f32.mxu1 %vm469_vm0, %v465_v7  ;;  %v1867_v21 = vadd.s32 %v1753_v11, %v845_v1  ;;  %v1870_v22 = vadd.s32 %v1753_v11, %v844_v2 }
  0x3c   : > { %1483 = vmatmul.mubr.msk.f32.gmra.mrb[14].mxu1 %vm469_vm0, %v466_v8  ;;  %v1852_v8 = vadd.s32 %v1753_v11, %v842_v53  ;;  %vm903_vm0 = vcmp.lt.s32.totalorder %v1831_v56, 512 }
  0x3e   : > { %vm907_vm15 = vcmp.lt.s32.totalorder %v1852_v8, 512 }
  0xec   : > { %v1439_v28 = vpop.f32.mrb[0].mxu0 }
  0xed   : > { %793 = vst.msk [vmem:[%s1779_s17 + $0x8] sm:$0xff] %vm791_vm1, %v1439_v28  ;;  %v988_v31 = vsel %vm892_vm2, %v1439_v28, 0.0  ;;  %v632_v32 = vpop.f32.mrb[1].mxu0  ;;  %vm908_vm2 = vcmp.lt.s32.totalorder %v1842_v0, 512 }
  0xee   : > { %v1020_v36 = vsel %vm791_vm1, %v988_v31, 0.0  ;;  %v1091_v37 = vmul.f32 %v988_v31, %v988_v31  ;;  %792 = vst.msk [vmem:[%s1779_s17] sm:$0xff] %vm791_vm1, %v632_v32  ;;  %v987_v38 = vsel %vm891_vm3, %v632_v32, 0.0  ;;  %v1884_v32 = vadd.s32 %v1753_v11, %v847_v3 }
  0xef   : > { %v1019_v40 = vsel %vm791_vm1, %v987_v38, 0.0  ;;  %v1090_v41 = vmul.f32 %v987_v38, %v987_v38  ;;  %vm906_vm3 = vcmp.lt.s32.totalorder %v1834_v57, 512  ;;  %v850_v3 = vadd.s32 192, %v1749_v9 }
  0xf0   : > { %v1123_v44 = vsel %vm791_vm1, %v1091_v37, 0.0  ;;  %v1021_v45 = vadd.f32 %v1020_v36, %v1019_v40  ;;  %v1442_v46 = vpop.f32.mrb[2].mxu0 }
  0xf1   : > { %v1122_v49 = vsel %vm791_vm1, %v1090_v41, 0.0  ;;  %795 = vst.msk [vmem:[%s1779_s17 + $0x18] sm:$0xff] %vm791_vm1, %v1442_v46  ;;  %v990_v50 = vsel %vm894_vm4, %v1442_v46, 0.0  ;;  %v642_v51 = vpop.f32.mrb[3].mxu0  ;;  %v848_v46 = vadd.s32 176, %v1749_v9  ;;  %vm909_vm4 = vcmp.lt.s32.totalorder %v1870_v22, 512 }
  0xf2   : > { %v1124_v54 = vadd.f32 %v1123_v44, %v1122_v49  ;;  %794 = vst.msk [vmem:[%s1779_s17 + $0x10] sm:$0xff] %vm791_vm1, %v642_v51  ;;  %v989_v55 = vsel %vm893_vm5, %v642_v51, 0.0  ;;  %v1093_v58 = vmul.f32 %v990_v50, %v990_v50  ;;  %v1024_v10 = vsel %vm791_vm1, %v990_v50, 0.0 }
  0xf3   : > { %v1022_v59 = vsel %vm791_vm1, %v989_v55, 0.0  ;;  %v1092_v60 = vmul.f32 %v989_v55, %v989_v55  ;;  %v1864_v20 = vpop.f32.mrb[0].mxu1  ;;  %v1902_v44 = vadd.s32 %v1753_v11, %v846_v23  ;;  %vm905_vm5 = vcmp.lt.s32.totalorder %v1839_v61, 512 }
  0xf4   : > { %v1023_v62 = vadd.f32 %v1022_v59, %v1021_v45  ;;  %v1445_v63 = vpop.f32.mrb[4].mxu0  ;;  %v1127_v14 = vsel %vm791_vm1, %v1093_v58, 0.0  ;;  %809 = vst.msk [vmem:[%s1779_s17 + $0x88] sm:$0xff] %vm791_vm1, %v1864_v20  ;;  %v1881_v31 = vpop.f32.mrb[1].mxu1  ;;  %v849_v45 = vadd.s32 184, %v1749_v9  ;;  %v854_v61 = vadd.s32 224, %v1749_v9 }
  0xf5   : > { %v1125_v5 = vsel %vm791_vm1, %v1092_v60, 0.0  ;;  %797 = vst.msk [vmem:[%s1779_s17 + $0x28] sm:$0xff] %vm791_vm1, %v1445_v63  ;;  %v992_v6 = vsel %vm896_vm6, %v1445_v63, 0.0  ;;  %v652_v7 = vpop.f32.mrb[5].mxu0  ;;  %808 = vst.msk [vmem:[%s1779_s17 + $0x80] sm:$0xff] %vm791_vm1, %v1881_v31  ;;  %vm910_vm6 = vcmp.lt.s32.totalorder %v1867_v21, 512 }
  0xf6   : > { %v1126_v4 = vadd.f32 %v1125_v5, %v1124_v54  ;;  %v1095_v12 = vmul.f32 %v992_v6, %v992_v6  ;;  %796 = vst.msk [vmem:[%s1779_s17 + $0x20] sm:$0xff] %vm791_vm1, %v652_v7  ;;  %v991_v13 = vsel %vm895_vm7, %v652_v7, 0.0  ;;  %v1025_v15 = vadd.f32 %v1024_v10, %v1023_v62 }
  0xf7   : > { %v1026_v16 = vsel %vm791_vm1, %v991_v13, 0.0  ;;  %v1094_v17 = vmul.f32 %v991_v13, %v991_v13  ;;  %v1028_v34 = vsel %vm791_vm1, %v992_v6, 0.0  ;;  %v1899_v26 = vpop.f32.mrb[2].mxu1  ;;  %v851_v54 = vadd.s32 200, %v1749_v9 }
  0xf8   : > { %v1128_v18 = vadd.f32 %v1127_v14, %v1126_v4  ;;  %v1448_v19 = vpop.f32.mrb[6].mxu0  ;;  %v1027_v24 = vadd.f32 %v1026_v16, %v1025_v15  ;;  %v1131_v35 = vsel %vm791_vm1, %v1095_v12, 0.0  ;;  %811 = vst.msk [vmem:[%s1779_s17 + $0x98] sm:$0xff] %vm791_vm1, %v1899_v26  ;;  %v1915_v53 = vpop.f32.mrb[3].mxu1  ;;  %v1934_v6 = vadd.s32 %v1753_v11, %v849_v45 }
  0xf9   : > { %v1129_v27 = vsel %vm791_vm1, %v1094_v17, 0.0  ;;  %799 = vst.msk [vmem:[%s1779_s17 + $0x38] sm:$0xff] %vm791_vm1, %v1448_v19  ;;  %v994_v28 = vsel %vm898_vm8, %v1448_v19, 0.0  ;;  %v662_v30 = vpop.f32.mrb[7].mxu0  ;;  %810 = vst.msk [vmem:[%s1779_s17 + $0x90] sm:$0xff] %vm791_vm1, %v1915_v53  ;;  %v1937_v7 = vadd.s32 %v1753_v11, %v848_v46  ;;  %v1951_v15 = vadd.s32 %v1753_v11, %v851_v54 }
  0xfa   : > { %v1130_v36 = vadd.f32 %v1129_v27, %v1128_v18  ;;  %798 = vst.msk [vmem:[%s1779_s17 + $0x30] sm:$0xff] %vm791_vm1, %v662_v30  ;;  %v993_v25 = vsel %vm897_vm9, %v662_v30, 0.0  ;;  %v1097_v37 = vmul.f32 %v994_v28, %v994_v28  ;;  %v1029_v38 = vadd.f32 %v1028_v34, %v1027_v24 }
  0xfb   : > { %v1030_v39 = vsel %vm791_vm1, %v993_v25, 0.0  ;;  %v1096_v40 = vmul.f32 %v993_v25, %v993_v25  ;;  %v1032_v55 = vsel %vm791_vm1, %v994_v28, 0.0  ;;  %v1931_v5 = vpop.f32.mrb[4].mxu1  ;;  %vm912_vm7 = vcmp.lt.s32.totalorder %v1884_v32, 512 }
  0xfc   : > { %v1132_v41 = vadd.f32 %v1131_v35, %v1130_v36  ;;  %v1451_v43 = vpop.f32.mrb[8].mxu0  ;;  %v1031_v48 = vadd.f32 %v1030_v39, %v1029_v38  ;;  %v1135_v60 = vsel %vm791_vm1, %v1097_v37, 0.0  ;;  %813 = vst.msk [vmem:[%s1779_s17 + $0xa8] sm:$0xff] %vm791_vm1, %v1931_v5  ;;  %v1948_v14 = vpop.f32.mrb[5].mxu1  ;;  %v1967_v35 = vadd.s32 %v1753_v11, %v850_v3 }
  0xfd   : > { %v1133_v49 = vsel %vm791_vm1, %v1096_v40, 0.0  ;;  %801 = vst.msk [vmem:[%s1779_s17 + $0x48] sm:$0xff] %vm791_vm1, %v1451_v43  ;;  %v996_v50 = vsel %vm900_vm10, %v1451_v43, 0.0  ;;  %v672_v51 = vpop.f32.mrb[9].mxu0  ;;  %812 = vst.msk [vmem:[%s1779_s17 + $0xa0] sm:$0xff] %vm791_vm1, %v1948_v14  ;;  %v852_v36 = vadd.s32 208, %v1749_v9 }
  0xfe   : > { %v1134_v58 = vadd.f32 %v1133_v49, %v1132_v41  ;;  %v1099_v59 = vmul.f32 %v996_v50, %v996_v50  ;;  %800 = vst.msk [vmem:[%s1779_s17 + $0x40] sm:$0xff] %vm791_vm1, %v672_v51  ;;  %v995_v29 = vsel %vm899_vm11, %v672_v51, 0.0  ;;  %v1033_v62 = vadd.f32 %v1032_v55, %v1031_v48 }
  0xff   : > { %v1034_v63 = vsel %vm791_vm1, %v995_v29, 0.0  ;;  %v1098_v1 = vmul.f32 %v995_v29, %v995_v29  ;;  %v1036_v16 = vsel %vm791_vm1, %v996_v50, 0.0  ;;  %v1964_v34 = vpop.f32.mrb[6].mxu1  ;;  %v1003_v40 = vsel %vm907_vm15, %v1881_v31, 0.0 }
 0x100   : > { %v1136_v2 = vadd.f32 %v1135_v60, %v1134_v58  ;;  %v1454_v33 = vpop.f32.mrb[10].mxu0  ;;  %v1035_v10 = vadd.f32 %v1034_v63, %v1033_v62  ;;  %v1139_v17 = vsel %vm791_vm1, %v1099_v59, 0.0  ;;  %vm911_vm8 = vcmp.lt.s32.totalorder %v1902_v44, 512  ;;  %815 = vst.msk [vmem:[%s1779_s17 + $0xb8] sm:$0xff] %vm791_vm1, %v1964_v34  ;;  %v1984_v41 = vpop.f32.mrb[7].mxu1 }
 0x101   : > { %v1137_v4 = vsel %vm791_vm1, %v1098_v1, 0.0  ;;  %803 = vst.msk [vmem:[%s1779_s17 + $0x58] sm:$0xff] %vm791_vm1, %v1454_v33  ;;  %v998_v12 = vsel %vm902_vm12, %v1454_v33, 0.0  ;;  %v682_v13 = vpop.f32.mrb[11].mxu0  ;;  %814 = vst.msk [vmem:[%s1779_s17 + $0xb0] sm:$0xff] %vm791_vm1, %v1984_v41  ;;  %v1004_v54 = vsel %vm908_vm2, %v1864_v20, 0.0  ;;  %v1106_v56 = vmul.f32 %v1003_v40, %v1003_v40 }
 0x102   : > { %v1138_v18 = vadd.f32 %v1137_v4, %v1136_v2  ;;  %802 = vst.msk [vmem:[%s1779_s17 + $0x50] sm:$0xff] %vm791_vm1, %v682_v13  ;;  %v997_v42 = vsel %vm901_vm13, %v682_v13, 0.0  ;;  %v1101_v19 = vmul.f32 %v998_v12, %v998_v12  ;;  %v1037_v23 = vadd.f32 %v1036_v16, %v1035_v10 }
 0x103   : > { %v1038_v24 = vsel %vm791_vm1, %v997_v42, 0.0  ;;  %v1100_v27 = vmul.f32 %v997_v42, %v997_v42  ;;  %v1040_v43 = vsel %vm791_vm1, %v998_v12, 0.0  ;;  %vm913_vm9 = vcmp.lt.s32.totalorder %v1937_v7, 512  ;;  %v2000_v55 = vpop.f32.mrb[8].mxu1 }
 0x104   : > { %v1140_v28 = vadd.f32 %v1139_v17, %v1138_v18  ;;  %v1457_v30 = vpop.f32.mrb[12].mxu0  ;;  %v1039_v25 = vadd.f32 %v1038_v24, %v1037_v23  ;;  %v1143_v8 = vsel %vm791_vm1, %v1101_v19, 0.0  ;;  %v2003_v58 = vadd.s32 %v1753_v11, %v853_v47  ;;  %817 = vst.msk [vmem:[%s1779_s17 + $0xc8] sm:$0xff] %vm791_vm1, %v2000_v55  ;;  %v2016_v62 = vpop.f32.mrb[9].mxu1 }
 0x105   : > { %v1141_v37 = vsel %vm791_vm1, %v1100_v27, 0.0  ;;  %805 = vst.msk [vmem:[%s1779_s17 + $0x68] sm:$0xff] %vm791_vm1, %v1457_v30  ;;  %v1000_v38 = vsel %vm904_vm14, %v1457_v30, 0.0  ;;  %v692_v39 = vpop.f32.mrb[13].mxu0  ;;  %v1005_v20 = vsel %vm909_vm4, %v1915_v53, 0.0  ;;  %vm914_vm10 = vcmp.lt.s32.totalorder %v1934_v6, 512 }
 0x106   : > { %v1142_v45 = vadd.f32 %v1141_v37, %v1140_v28  ;;  %v1103_v46 = vmul.f32 %v1000_v38, %v1000_v38  ;;  %804 = vst.msk [vmem:[%s1779_s17 + $0x60] sm:$0xff] %vm791_vm1, %v692_v39  ;;  %v999_v52 = vsel %vm903_vm0, %v692_v39, 0.0  ;;  %v1041_v31 = vadd.f32 %v1040_v43, %v1039_v25  ;;  %816 = vst.msk [vmem:[%s1779_s17 + $0xc0] sm:$0xff] %vm791_vm1, %v2016_v62 }
 0x107   : > { %v1042_v48 = vsel %vm791_vm1, %v999_v52, 0.0  ;;  %v1102_v49 = vmul.f32 %v999_v52, %v999_v52  ;;  %v1044_v63 = vsel %vm791_vm1, %v1000_v38, 0.0  ;;  %v2029_v4 = vpop.f32.mrb[10].mxu1  ;;  %v2032_v12 = vadd.s32 %v1753_v11, %v852_v36 }
 0x108   : > { %v1144_v50 = vadd.f32 %v1143_v8, %v1142_v45  ;;  %v1460_v51 = vpop.f32.mrb[14].mxu0  ;;  %v1043_v59 = vadd.f32 %v1042_v48, %v1041_v31  ;;  %v1147_v1 = vsel %vm791_vm1, %v1103_v46, 0.0  ;;  %v857_v13 = vadd.s32 248, %v1749_v9  ;;  %819 = vst.msk [vmem:[%s1779_s17 + $0xd8] sm:$0xff] %vm791_vm1, %v2029_v4  ;;  %v2041_v42 = vpop.f32.mrb[11].mxu1 }
 0x109   : > { %v1145_v29 = vsel %vm791_vm1, %v1102_v49, 0.0  ;;  %807 = vst.msk [vmem:[%s1779_s17 + $0x78] sm:$0xff] %vm791_vm1, %v1460_v51  ;;  %v1002_v60 = vsel %vm906_vm3, %v1460_v51, 0.0  ;;  %v702_v0 = vpop.f32.mrb[15].mxu0  ;;  %v1107_v18 = vmul.f32 %v1004_v54, %v1004_v54  ;;  %vm915_vm11 = vcmp.lt.s32.totalorder %v1967_v35, 512  ;;  %818 = vst.msk [vmem:[%s1779_s17 + $0xd0] sm:$0xff] %vm791_vm1, %v2041_v42 }
 0x10a   : > { %v1146_v2 = vadd.f32 %v1145_v29, %v1144_v50  ;;  %806 = vst.msk [vmem:[%s1779_s17 + $0x70] sm:$0xff] %vm791_vm1, %v702_v0  ;;  %v1001_v57 = vsel %vm905_vm5, %v702_v0, 0.0  ;;  %v1105_v22 = vmul.f32 %v1002_v60, %v1002_v60  ;;  %v1045_v53 = vadd.f32 %v1044_v63, %v1043_v59 }
 0x10b   : > { %v1046_v33 = vsel %vm791_vm1, %v1001_v57, 0.0  ;;  %v1104_v3 = vmul.f32 %v1001_v57, %v1001_v57  ;;  %v856_v19 = vadd.s32 240, %v1749_v9  ;;  %v1048_v23 = vsel %vm791_vm1, %v1002_v60, 0.0 }
 0x10c   : > { %v1148_v10 = vadd.f32 %v1147_v1, %v1146_v2  ;;  %v1047_v16 = vadd.f32 %v1046_v33, %v1045_v53  ;;  %v1050_v27 = vsel %vm791_vm1, %v1003_v40, 0.0  ;;  %v1108_v28 = vmul.f32 %v1005_v20, %v1005_v20  ;;  %v2061_v40 = vpop.f32.mrb[12].mxu1 }
 0x10d   : > { %v1149_v17 = vsel %vm791_vm1, %v1104_v3, 0.0  ;;  %v1151_v30 = vsel %vm791_vm1, %v1105_v22, 0.0  ;;  %v1153_v36 = vsel %vm791_vm1, %v1106_v56, 0.0  ;;  %v1006_v25 = vsel %vm910_vm6, %v1899_v26, 0.0  ;;  %821 = vst.msk [vmem:[%s1779_s17 + $0xe8] sm:$0xff] %vm791_vm1, %v2061_v40  ;;  %v2070_v32 = vpop.f32.mrb[13].mxu1 }
 0x10e   : > { %v1150_v24 = vadd.f32 %v1149_v17, %v1148_v10  ;;  %v1049_v47 = vadd.f32 %v1048_v23, %v1047_v16  ;;  %vm916_vm12 = vcmp.lt.s32.totalorder %v1951_v15, 512  ;;  %v1008_v38 = vsel %vm912_vm7, %v1931_v5, 0.0  ;;  %820 = vst.msk [vmem:[%s1779_s17 + $0xe0] sm:$0xff] %vm791_vm1, %v2070_v32 }
 0x10f   : > { %v1007_v39 = vsel %vm911_vm8, %v1948_v14, 0.0  ;;  %v890_v43 = vadd.s32 %v1753_v11, %v857_v13  ;;  %v1052_v45 = vsel %vm791_vm1, %v1004_v54, 0.0  ;;  %v1155_v21 = vsel %vm791_vm1, %v1107_v18, 0.0  ;;  %v1484_v56 = vpop.f32.mrb[14].mxu1 }
 0x110   : > { %v1152_v37 = vadd.f32 %v1151_v30, %v1150_v24  ;;  %v1051_v26 = vadd.f32 %v1050_v27, %v1049_v47  ;;  %vm917_vm13 = vcmp.lt.s32.totalorder %v2032_v12, 512  ;;  %v889_v5 = vadd.s32 %v1753_v11, %v856_v19  ;;  %823 = vst.msk [vmem:[%s1779_s17 + $0xf8] sm:$0xff] %vm791_vm1, %v1484_v56  ;;  %v782_v0 = vpop.f32.mrb[15].mxu1 }
 0x111   : > { %v1109_v14 = vmul.f32 %v1006_v25, %v1006_v25  ;;  %v1054_v46 = vsel %vm791_vm1, %v1005_v20, 0.0  ;;  %v1157_v52 = vsel %vm791_vm1, %v1108_v28, 0.0  ;;  %v1111_v31 = vmul.f32 %v1008_v38, %v1008_v38  ;;  %822 = vst.msk [vmem:[%s1779_s17 + $0xf0] sm:$0xff] %vm791_vm1, %v782_v0 }
 0x112   : > { %v1154_v44 = vadd.f32 %v1153_v36, %v1152_v37  ;;  %v1053_v8 = vadd.f32 %v1052_v45, %v1051_v26  ;;  %v1110_v48 = vmul.f32 %v1007_v39, %v1007_v39  ;;  %v1009_v49 = vsel %vm913_vm9, %v1984_v41, 0.0 }
 0x113   : > { %v855_v51 = vadd.s32 232, %v1749_v9  ;;  %v887_v54 = vadd.s32 %v1753_v11, %v854_v61  ;;  %vm922_vm14 = vcmp.lt.s32.totalorder %v890_v43, 512  ;;  %v1056_v59 = vsel %vm791_vm1, %v1006_v25, 0.0 }
 0x114   : > { %v1156_v50 = vadd.f32 %v1155_v21, %v1154_v44  ;;  %v1055_v29 = vadd.f32 %v1054_v46, %v1053_v8  ;;  %v1010_v60 = vsel %vm914_vm10, %v1964_v34, 0.0  ;;  %vm921_vm15 = vcmp.lt.s32.totalorder %v889_v5, 512 }
 0x115   : > { %v1159_v7 = vsel %vm791_vm1, %v1109_v14, 0.0  ;;  %v1058_v9 = vsel %vm791_vm1, %v1007_v39, 0.0  ;;  %v1112_v20 = vmul.f32 %v1009_v49, %v1009_v49  ;;  %v1060_v63 = vsel %vm791_vm1, %v1008_v38, 0.0 }
 0x116   : > { %v1158_v41 = vadd.f32 %v1157_v52, %v1156_v50  ;;  %v1163_v1 = vsel %vm791_vm1, %v1111_v31, 0.0  ;;  %v1057_v2 = vadd.f32 %v1056_v59, %v1055_v29  ;;  %v1161_v6 = vsel %vm791_vm1, %v1110_v48, 0.0 }
 0x117   : > { %v1113_v57 = vmul.f32 %v1010_v60, %v1010_v60  ;;  %v1011_v22 = vsel %vm915_vm11, %v2016_v62, 0.0  ;;  %v1018_v53 = vsel %vm922_vm14, %v1484_v56, 0.0  ;;  %v1062_v3 = vsel %vm791_vm1, %v1009_v49, 0.0 }
 0x118   : > { %v1160_v34 = vadd.f32 %v1159_v7, %v1158_v41  ;;  %v1059_v33 = vadd.f32 %v1058_v9, %v1057_v2  ;;  %v1080_v10 = vsel %vm791_vm1, %v1018_v53, 0.0  ;;  %v1121_v61 = vmul.f32 %v1018_v53, %v1018_v53 }
 0x119   : > { %v1165_v16 = vsel %vm791_vm1, %v1112_v20, 0.0  ;;  %v1012_v17 = vsel %vm916_vm12, %v2000_v55, 0.0  ;;  %v1017_v18 = vsel %vm921_vm15, %v782_v0, 0.0  ;;  %v1114_v35 = vmul.f32 %v1011_v22, %v1011_v22 }
 0x11a   : > { %v1162_v13 = vadd.f32 %v1161_v6, %v1160_v34  ;;  %v1061_v19 = vadd.f32 %v1060_v63, %v1059_v33  ;;  %v1183_v62 = vsel %vm791_vm1, %v1121_v61, 0.0  ;;  %v1120_v23 = vmul.f32 %v1017_v18, %v1017_v18 }
 0x11b   : > { %vm918_vm0 = vcmp.lt.s32.totalorder %v2003_v58, 512  ;;  %v1013_v27 = vsel %vm917_vm13, %v2041_v42, 0.0  ;;  %v888_v30 = vadd.s32 %v1753_v11, %v855_v51  ;;  %vm919_vm2 = vcmp.lt.s32.totalorder %v887_v54, 512 }
 0x11c   : > { %v1164_v24 = vadd.f32 %v1163_v1, %v1162_v13  ;;  %v1063_v28 = vadd.f32 %v1062_v3, %v1061_v19  ;;  %v1181_v15 = vsel %vm791_vm1, %v1120_v23, 0.0  ;;  %v1064_v55 = vsel %vm791_vm1, %v1010_v60, 0.0 }
 0x11d   : > { %v1115_v36 = vmul.f32 %v1012_v17, %v1012_v17  ;;  %v1066_v25 = vsel %vm791_vm1, %v1011_v22, 0.0  ;;  %v1167_v37 = vsel %vm791_vm1, %v1113_v57, 0.0  ;;  %v1169_v58 = vsel %vm791_vm1, %v1114_v35, 0.0 }
 0x11e   : > { %v1166_v47 = vadd.f32 %v1165_v16, %v1164_v24  ;;  %v1065_v38 = vadd.f32 %v1064_v55, %v1063_v28  ;;  %v1116_v39 = vmul.f32 %v1013_v27, %v1013_v27  ;;  %v1014_v42 = vsel %vm918_vm0, %v2029_v4, 0.0 }
 0x11f   : > { %v1015_v11 = vsel %vm919_vm2, %v2070_v32, 0.0  ;;  %vm920_vm3 = vcmp.lt.s32.totalorder %v888_v30, 512  ;;  %v1068_v45 = vsel %vm791_vm1, %v1012_v17, 0.0  ;;  %v1171_v21 = vsel %vm791_vm1, %v1115_v36, 0.0 }
 0x120   : > { %v1168_v12 = vadd.f32 %v1167_v37, %v1166_v47  ;;  %v1067_v43 = vadd.f32 %v1066_v25, %v1065_v38  ;;  %v1070_v5 = vsel %vm791_vm1, %v1013_v27, 0.0  ;;  %v1117_v44 = vmul.f32 %v1014_v42, %v1014_v42 }
 0x121   : > { %v1173_v46 = vsel %vm791_vm1, %v1116_v39, 0.0  ;;  %v1118_v52 = vmul.f32 %v1015_v11, %v1015_v11  ;;  %v1016_v31 = vsel %vm920_vm3, %v2061_v40, 0.0  ;;  %v1072_v32 = vsel %vm791_vm1, %v1014_v42, 0.0 }
 0x122   : > { %v1170_v26 = vadd.f32 %v1169_v58, %v1168_v12  ;;  %v1069_v14 = vadd.f32 %v1068_v45, %v1067_v43  ;;  %v1074_v49 = vsel %vm791_vm1, %v1015_v11, 0.0  ;;  %v1175_v50 = vsel %vm791_vm1, %v1117_v44, 0.0 }
 0x123   : > { %v1119_v51 = vmul.f32 %v1016_v31, %v1016_v31  ;;  %v1177_v56 = vsel %vm791_vm1, %v1118_v52, 0.0  ;;  %v1076_v60 = vsel %vm791_vm1, %v1016_v31, 0.0  ;;  %v1078_v40 = vsel %vm791_vm1, %v1017_v18, 0.0 }
 0x124   : > { %v1172_v8 = vadd.f32 %v1171_v21, %v1170_v26  ;;  %v1071_v4 = vadd.f32 %v1070_v5, %v1069_v14 }
 0x125   : > { %v1179_v7 = vsel %vm791_vm1, %v1119_v51, 0.0  ;;  %vm1088_vm1 = vcmask 57344  }
 0x126   : > { %v1174_v48 = vadd.f32 %v1173_v46, %v1172_v8  ;;  %v1073_v54 = vadd.f32 %v1072_v32, %v1071_v4 }
 0x128   : > { %v1176_v59 = vadd.f32 %v1175_v50, %v1174_v48  ;;  %v1075_v29 = vadd.f32 %v1074_v49, %v1073_v54 }
 0x12a   : > { %v1178_v0 = vadd.f32 %v1177_v56, %v1176_v59  ;;  %v1077_v41 = vadd.f32 %v1076_v60, %v1075_v29 }
 0x12c   : > { %v1180_v9 = vadd.f32 %v1179_v7, %v1178_v0  ;;  %v1079_v20 = vadd.f32 %v1078_v40, %v1077_v41 }
 0x12e   : > { %v1182_v63 = vadd.f32 %v1181_v15, %v1180_v9  ;;  %v1081_v1 = vadd.f32 %v1080_v10, %v1079_v20 }
 0x130   : > { %v1184_v2 = vadd.f32 %v1183_v62, %v1182_v63  ;;  %v1082_v6 = vrot.slane %v1081_v1, 4 }
 0x132   : > { %v1185_v34 = vrot.slane %v1184_v2, 4  ;;  %v1083_v57 = vadd.f32 %v1082_v6, %v1081_v1 }
 0x134   : > { %v1186_v22 = vadd.f32 %v1185_v34, %v1184_v2  ;;  %v1084_v53 = vrot.slane %v1083_v57, 2 }
 0x136   : > { %v1187_v33 = vrot.slane %v1186_v22, 2  ;;  %v1085_v3 = vadd.f32 %v1084_v53, %v1083_v57 }
 0x138   : > { %v1188_v61 = vadd.f32 %v1187_v33, %v1186_v22  ;;  %v1086_v13 = vrot.slane %v1085_v3, 1 }
 0x13a   : > { %v1189_v16 = vrot.slane %v1188_v61, 1  ;;  %v1087_v10 = vadd.f32 %v1086_v13, %v1085_v3 }
 0x13c   : > { %v1190_v17 = vadd.f32 %v1189_v16, %v1188_v61  ;;  %1089 = vst.msk [vmem:[%s318_s20] sm:$0x1] %vm1088_vm1, %v1087_v10 }
 0x13e   : > { %1191 = vst.msk [vmem:[%s324_s27] sm:$0x1] %vm1088_vm1, %v1190_v17 }
 0x13f PF: > { %s17_s23 = sadd.s32 1, %s1537_s23   ;;  %s2156_s21 = smov %s1533_s22 }
 0x140   : > { %p14_p6 = scmp.ge.s32.totalorder %s17_s23, 4   ;;  %s2157_s22 = smov %s2159_s24 }
 0x142   :  { %16 = sbr.rel (!%p14_p6) target bundleno = 2 (0x2), region = 93 }

// kernel: preact_bottleneck_forward.5
= control target key start
LH: loop header
LB: loop body
LE: loop exit
PB: predicated region body
PF: predicated region fallthrough
CT: control target
= control target key end

     0   :  { %s1038_s15 = smov 0   ;;  %s1040_s16 = smov 0   ;;  %s1290_s0 = inlined_call_operand.vmem [shape: f32[512,16], index: 0, kind: input, shape index: {}]   ;;  %s1291_s1 = inlined_call_operand.vmem [shape: f32[1,16], index: 1, kind: input, shape index: {}]   ;;  %s1292_s2 = inlined_call_operand.vmem [shape: f32[1,16], index: 2, kind: input, shape index: {}]   ;;  %s1293_s3 = inlined_call_operand.vmem [shape: f32[16,32], index: 3, kind: input, shape index: {}]   ;;  %s1294_s4 = inlined_call_operand.vmem [shape: f32[512,32], index: 4, kind: output, shape index: {}]  }
   0x1   :  { %s1042_s17 = smov 0  }
   0x2 LB: > { %s26_s18 = sadd.s32 1, %s1007_s16  ;;  %p832_p0 = scmp.ge.s32.totalorder %s1011_s17, 1  ;;  %s1011_s17 = sphi %s1042_s17, %s14_s17   ;;  %s1007_s16 = sphi %s1040_s16, %s1296_s16   ;;  %s1003_s15 = sphi %s1038_s15, %s1295_s15  }
   0x3   : > { %p28_p1 = scmp.ge.s32.totalorder %s26_s18, 2  ;;  %p186_p2 = scmp.lt.s32.totalorder %s1011_s17, 3 }
   0x5   : > { %s1298_s18 = smov (%p28_p1, %s26_s18), 0  ;;  %p187_p3 = pnand %p832_p0, %p186_p2 }
   0x6   : > { %v380_v0 = vld [vmem:[%s1293_s3] sm:$0xff] (!%p187_p3)  ;;  %v381_v1 = vld [vmem:[%s1293_s3 + $0x8] sm:$0xff] (!%p187_p3)  ;;  %s833_s23 = sshll.u32 (!%p187_p3), %s1003_s15, 5  ;;  %vm382_vm0 = vcmask (!%p187_p3), 130048   ;;  %vm704_vm1 = vcmask (!%p187_p3), 261120  }
   0x7   : > { %190 = sbr.rel (%p187_p3) target bundleno = 268 (0x10c), region = 36  ;;  %v959_v2 = vpack.c.bf16 (!%p187_p3), %v381_v1, %v380_v0  ;;  %p220_p4 = scmp.lt.s32.totalorder (!%p187_p3), %s833_s23, 63  ;;  %v1068_v3 = vld [vmem:[%s1291_s1] ss:$0 sm:$0xff] (!%p187_p3) }
   0x8   : > { %v1080_v4 = vld [vmem:[%s1292_s2] ss:$0 sm:$0xff] (!%p187_p3) }
   0x9   : > { %960 = vmatprep.subr.bf16.mxu0 (!%p187_p3), %v959_v2  ;;  %963 = vmatprep.subr.bf16.mxu1 (!%p187_p3), %v959_v2 }
   0xa   : > { %962 = vmatpush3.bf16.msra.mxu0 (!%p187_p3), %v959_v2  ;;  %964 = vmatpush3.bf16.msra.mxu1 (!%p187_p3), %v959_v2 }
   0xe   : > { %s1300_s23 = smov (!%p220_p4, %s833_s23), 63 }
   0xf   : > { %s834_s24 = sshll.u32 %s1300_s23, 3 }
  0x10   : > { %s1075_s29 = scalar_lea.vmem %s1290_s0, %s834_s24  ;;  %s1215_s8 = scalar_lea.vmem %s1294_s4, %s834_s24 }
  0x11   : > { %v238_v5 = vld [vmem:[%s1075_s29] sm:$0xff]  ;;  %v239_v7 = vld [vmem:[%s1075_s29 + $0x8] sm:$0xff]  ;;  %v240_v12 = vld [vmem:[%s1075_s29 + $0x10] sm:$0xff] }
  0x12   : > { %v254_v6 = vld [vmem:[%s1075_s29 + $0x80] sm:$0xff]  ;;  %v277_v8 = vmul.f32 %v1068_v3, %v238_v5  ;;  %v278_v10 = vmul.f32 %v1068_v3, %v239_v7  ;;  %v255_v11 = vld [vmem:[%s1075_s29 + $0x88] sm:$0xff]  ;;  %v256_v13 = vld [vmem:[%s1075_s29 + $0x90] sm:$0xff]  ;;  %v279_v15 = vmul.f32 %v1068_v3, %v240_v12 }
  0x13   : > { %v293_v9 = vmul.f32 %v1068_v3, %v254_v6  ;;  %v294_v14 = vmul.f32 %v1068_v3, %v255_v11  ;;  %v295_v16 = vmul.f32 %v1068_v3, %v256_v13  ;;  %v241_v17 = vld [vmem:[%s1075_s29 + $0x18] sm:$0xff]  ;;  %v242_v27 = vld [vmem:[%s1075_s29 + $0x20] sm:$0xff]  ;;  %v243_v29 = vld [vmem:[%s1075_s29 + $0x28] sm:$0xff] }
  0x14   : > { %v257_v18 = vld [vmem:[%s1075_s29 + $0x98] sm:$0xff]  ;;  %v316_v19 = vadd.f32 %v1080_v4, %v277_v8  ;;  %v317_v21 = vadd.f32 %v1080_v4, %v278_v10  ;;  %v280_v22 = vmul.f32 %v1068_v3, %v241_v17  ;;  %v318_v24 = vadd.f32 %v1080_v4, %v279_v15  ;;  %v258_v28 = vld [vmem:[%s1075_s29 + $0xa0] sm:$0xff]  ;;  %v259_v34 = vld [vmem:[%s1075_s29 + $0xa8] sm:$0xff] }
  0x15   : > { %v332_v20 = vadd.f32 %v1080_v4, %v293_v9  ;;  %v333_v23 = vadd.f32 %v1080_v4, %v294_v14  ;;  %v334_v25 = vadd.f32 %v1080_v4, %v295_v16  ;;  %v296_v26 = vmul.f32 %v1068_v3, %v257_v18  ;;  %v244_v35 = vld [vmem:[%s1075_s29 + $0x30] sm:$0xff]  ;;  %v245_v45 = vld [vmem:[%s1075_s29 + $0x38] sm:$0xff]  ;;  %v246_v58 = vld [vmem:[%s1075_s29 + $0x40] sm:$0xff] }
  0x16   : > { %v348_v30 = vmax.f32 %v316_v19, 0.0  ;;  %v349_v32 = vmax.f32 %v317_v21, 0.0  ;;  %v319_v33 = vadd.f32 %v1080_v4, %v280_v22  ;;  %v260_v36 = vld [vmem:[%s1075_s29 + $0xb0] sm:$0xff]  ;;  %v350_v38 = vmax.f32 %v318_v24, 0.0  ;;  %v261_v50 = vld [vmem:[%s1075_s29 + $0xb8] sm:$0xff]  ;;  %v262_v59 = vld [vmem:[%s1075_s29 + $0xc0] sm:$0xff] }
  0x17   : > { %v364_v31 = vmax.f32 %v332_v20, 0.0  ;;  %v365_v37 = vmax.f32 %v333_v23, 0.0  ;;  %v366_v39 = vmax.f32 %v334_v25, 0.0  ;;  %v335_v40 = vadd.f32 %v1080_v4, %v296_v26  ;;  %v247_v63 = vld [vmem:[%s1075_s29 + $0x48] sm:$0xff]  ;;  %v248_v1 = vld [vmem:[%s1075_s29 + $0x50] sm:$0xff]  ;;  %v249_v16 = vld [vmem:[%s1075_s29 + $0x58] sm:$0xff] }
  0x18   : > { %911 = vmatprep.mubr.msk.f32.mxu0 %vm382_vm0, %v348_v30  ;;  %v351_v41 = vmax.f32 %v319_v33, 0.0  ;;  %v281_v42 = vmul.f32 %v1068_v3, %v242_v27  ;;  %v297_v43 = vmul.f32 %v1068_v3, %v258_v28  ;;  %v282_v44 = vmul.f32 %v1068_v3, %v243_v29  ;;  %v263_v0 = vld [vmem:[%s1075_s29 + $0xc8] sm:$0xff]  ;;  %v264_v8 = vld [vmem:[%s1075_s29 + $0xd0] sm:$0xff]  ;;  %v265_v21 = vld [vmem:[%s1075_s29 + $0xd8] sm:$0xff] }
  0x19   : > { %935 = vmatprep.mubr.msk.f32.mxu1 %vm382_vm0, %v364_v31  ;;  %912 = vmatmul.mubr.msk.f32.vlgmr.msra.gmra.mrb[0].mxu0 %vm382_vm0, %v349_v32  ;;  %v367_v46 = vmax.f32 %v335_v40, 0.0  ;;  %v298_v47 = vmul.f32 %v1068_v3, %v259_v34  ;;  %v283_v48 = vmul.f32 %v1068_v3, %v244_v35  ;;  %v299_v49 = vmul.f32 %v1068_v3, %v260_v36  ;;  %v250_v26 = vld [vmem:[%s1075_s29 + $0x60] sm:$0xff]  ;;  %v251_v32 = vld [vmem:[%s1075_s29 + $0x68] sm:$0xff]  ;;  %v252_v36 = vld [vmem:[%s1075_s29 + $0x70] sm:$0xff] }
  0x1a   : > { %936 = vmatmul.mubr.msk.f32.vlgmr.msra.gmra.mrb[0].mxu1 %vm382_vm0, %v365_v37  ;;  %914 = vmatprep.mubr.msk.f32.mxu0 %vm382_vm0, %v350_v38  ;;  %v320_v51 = vadd.f32 %v1080_v4, %v281_v42  ;;  %v336_v52 = vadd.f32 %v1080_v4, %v297_v43  ;;  %v321_v53 = vadd.f32 %v1080_v4, %v282_v44  ;;  %v266_v27 = vld [vmem:[%s1075_s29 + $0xe0] sm:$0xff]  ;;  %v267_v33 = vld [vmem:[%s1075_s29 + $0xe8] sm:$0xff] }
  0x1b   : > { %938 = vmatprep.mubr.msk.f32.mxu1 %vm382_vm0, %v366_v39  ;;  %v337_v54 = vadd.f32 %v1080_v4, %v298_v47  ;;  %v322_v55 = vadd.f32 %v1080_v4, %v283_v48  ;;  %v338_v56 = vadd.f32 %v1080_v4, %v299_v49  ;;  %v284_v57 = vmul.f32 %v1068_v3, %v245_v45 }
  0x1c   : > { %v352_v60 = vmax.f32 %v320_v51, 0.0  ;;  %v368_v61 = vmax.f32 %v336_v52, 0.0  ;;  %v300_v62 = vmul.f32 %v1068_v3, %v261_v50  ;;  %v353_v2 = vmax.f32 %v321_v53, 0.0  ;;  %v253_v50 = vld [vmem:[%s1075_s29 + $0x78] sm:$0xff] }
  0x1d   : > { %915 = vmatmul.mubr.msk.f32.gmra.mrb[2].mxu0 %vm382_vm0, %v351_v41  ;;  %v369_v5 = vmax.f32 %v337_v54, 0.0  ;;  %v354_v6 = vmax.f32 %v322_v55, 0.0  ;;  %v323_v7 = vadd.f32 %v1080_v4, %v284_v57  ;;  %v370_v9 = vmax.f32 %v338_v56, 0.0  ;;  %v268_v41 = vld [vmem:[%s1075_s29 + $0xf0] sm:$0xff]  ;;  %v269_v51 = vld [vmem:[%s1075_s29 + $0xf8] sm:$0xff] }
  0x1e   : > { %939 = vmatmul.mubr.msk.f32.gmra.mrb[2].mxu1 %vm382_vm0, %v367_v46  ;;  %917 = vmatprep.mubr.msk.f32.mxu0 %vm382_vm0, %v352_v60  ;;  %v339_v10 = vadd.f32 %v1080_v4, %v300_v62  ;;  %v285_v11 = vmul.f32 %v1068_v3, %v246_v58  ;;  %v301_v12 = vmul.f32 %v1068_v3, %v262_v59 }
  0x1f   : > { %941 = vmatprep.mubr.msk.f32.mxu1 %vm382_vm0, %v368_v61  ;;  %v286_v13 = vmul.f32 %v1068_v3, %v247_v63  ;;  %v302_v14 = vmul.f32 %v1068_v3, %v263_v0  ;;  %v287_v15 = vmul.f32 %v1068_v3, %v248_v1  ;;  %v355_v17 = vmax.f32 %v323_v7, 0.0 }
  0x20   : > { %v324_v18 = vadd.f32 %v1080_v4, %v285_v11  ;;  %v340_v19 = vadd.f32 %v1080_v4, %v301_v12  ;;  %v303_v20 = vmul.f32 %v1068_v3, %v264_v8  ;;  %v371_v22 = vmax.f32 %v339_v10, 0.0 }
  0x21   : > { %918 = vmatmul.mubr.msk.f32.gmra.mrb[4].mxu0 %vm382_vm0, %v353_v2  ;;  %v325_v23 = vadd.f32 %v1080_v4, %v286_v13  ;;  %v341_v24 = vadd.f32 %v1080_v4, %v302_v14  ;;  %v326_v25 = vadd.f32 %v1080_v4, %v287_v15  ;;  %v288_v31 = vmul.f32 %v1068_v3, %v249_v16 }
  0x22   : > { %942 = vmatmul.mubr.msk.f32.gmra.mrb[4].mxu1 %vm382_vm0, %v369_v5  ;;  %920 = vmatprep.mubr.msk.f32.mxu0 %vm382_vm0, %v354_v6  ;;  %v356_v28 = vmax.f32 %v324_v18, 0.0  ;;  %v372_v29 = vmax.f32 %v340_v19, 0.0  ;;  %v342_v30 = vadd.f32 %v1080_v4, %v303_v20  ;;  %v304_v35 = vmul.f32 %v1068_v3, %v265_v21 }
  0x23   : > { %944 = vmatprep.mubr.msk.f32.mxu1 %vm382_vm0, %v370_v9  ;;  %v357_v34 = vmax.f32 %v325_v23, 0.0  ;;  %v373_v37 = vmax.f32 %v341_v24, 0.0  ;;  %v327_v38 = vadd.f32 %v1080_v4, %v288_v31  ;;  %v289_v39 = vmul.f32 %v1068_v3, %v250_v26 }
  0x24   : > { %v305_v40 = vmul.f32 %v1068_v3, %v266_v27  ;;  %v358_v42 = vmax.f32 %v326_v25, 0.0  ;;  %v343_v43 = vadd.f32 %v1080_v4, %v304_v35  ;;  %v290_v44 = vmul.f32 %v1068_v3, %v251_v32 }
  0x25   : > { %921 = vmatmul.mubr.msk.f32.gmra.mrb[6].mxu0 %vm382_vm0, %v355_v17  ;;  %v306_v45 = vmul.f32 %v1068_v3, %v267_v33  ;;  %v374_v46 = vmax.f32 %v342_v30, 0.0  ;;  %v328_v47 = vadd.f32 %v1080_v4, %v289_v39  ;;  %v291_v49 = vmul.f32 %v1068_v3, %v252_v36 }
  0x26   : > { %945 = vmatmul.mubr.msk.f32.gmra.mrb[6].mxu1 %vm382_vm0, %v371_v22  ;;  %923 = vmatprep.mubr.msk.f32.mxu0 %vm382_vm0, %v356_v28  ;;  %v344_v48 = vadd.f32 %v1080_v4, %v305_v40  ;;  %v307_v52 = vmul.f32 %v1068_v3, %v268_v41  ;;  %v359_v53 = vmax.f32 %v327_v38, 0.0  ;;  %v329_v54 = vadd.f32 %v1080_v4, %v290_v44 }
  0x27   : > { %947 = vmatprep.mubr.msk.f32.mxu1 %vm382_vm0, %v372_v29  ;;  %v375_v55 = vmax.f32 %v343_v43, 0.0  ;;  %v345_v56 = vadd.f32 %v1080_v4, %v306_v45  ;;  %v292_v57 = vmul.f32 %v1068_v3, %v253_v50  ;;  %v308_v58 = vmul.f32 %v1068_v3, %v269_v51 }
  0x28   : > { %v360_v59 = vmax.f32 %v328_v47, 0.0  ;;  %v376_v60 = vmax.f32 %v344_v48, 0.0  ;;  %v330_v61 = vadd.f32 %v1080_v4, %v291_v49  ;;  %v346_v62 = vadd.f32 %v1080_v4, %v307_v52 }
  0x29   : > { %924 = vmatmul.mubr.msk.f32.gmra.mrb[8].mxu0 %vm382_vm0, %v357_v34  ;;  %v361_v63 = vmax.f32 %v329_v54, 0.0  ;;  %v377_v0 = vmax.f32 %v345_v56, 0.0  ;;  %v331_v1 = vadd.f32 %v1080_v4, %v292_v57  ;;  %v347_v3 = vadd.f32 %v1080_v4, %v308_v58 }
  0x2a   : > { %948 = vmatmul.mubr.msk.f32.gmra.mrb[8].mxu1 %vm382_vm0, %v373_v37  ;;  %926 = vmatprep.mubr.msk.f32.mxu0 %vm382_vm0, %v358_v42  ;;  %v362_v2 = vmax.f32 %v330_v61, 0.0  ;;  %v378_v5 = vmax.f32 %v346_v62, 0.0 }
  0x2b   : > { %950 = vmatprep.mubr.msk.f32.mxu1 %vm382_vm0, %v374_v46  ;;  %v363_v6 = vmax.f32 %v331_v1, 0.0  ;;  %v379_v7 = vmax.f32 %v347_v3, 0.0 }
  0x2d   : > { %927 = vmatmul.mubr.msk.f32.gmra.mrb[10].mxu0 %vm382_vm0, %v359_v53 }
  0x2e   : > { %951 = vmatmul.mubr.msk.f32.gmra.mrb[10].mxu1 %vm382_vm0, %v375_v55  ;;  %929 = vmatprep.mubr.msk.f32.mxu0 %vm382_vm0, %v360_v59 }
  0x2f   : > { %953 = vmatprep.mubr.msk.f32.mxu1 %vm382_vm0, %v376_v60 }
  0x31   : > { %930 = vmatmul.mubr.msk.f32.gmra.mrb[12].mxu0 %vm382_vm0, %v361_v63 }
  0x32   : > { %954 = vmatmul.mubr.msk.f32.gmra.mrb[12].mxu1 %vm382_vm0, %v377_v0  ;;  %932 = vmatprep.mubr.msk.f32.mxu0 %vm382_vm0, %v362_v2 }
  0x33   : > { %956 = vmatprep.mubr.msk.f32.mxu1 %vm382_vm0, %v378_v5 }
  0x35   : > { %933 = vmatmul.mubr.msk.f32.gmra.mrb[14].mxu0 %vm382_vm0, %v363_v6 }
  0x36   : > { %957 = vmatmul.mubr.msk.f32.gmra.mrb[14].mxu1 %vm382_vm0, %v379_v7 }
  0xec   : > { %v913_v4 = vpop.f32.mrb[0].mxu0 }
  0xed   : > { %v937_v8 = vpop.f32.mrb[0].mxu1  ;;  %706 = vst.msk [vmem:[%s1215_s8 + $0x8] sm:$0xff] %vm704_vm1, %v913_v4  ;;  %v545_v9 = vpop.f32.mrb[1].mxu0 }
  0xee   : > { %722 = vst.msk [vmem:[%s1215_s8 + $0x88] sm:$0xff] %vm704_vm1, %v937_v8  ;;  %v625_v10 = vpop.f32.mrb[1].mxu1  ;;  %705 = vst.msk [vmem:[%s1215_s8] sm:$0xff] %vm704_vm1, %v545_v9 }
  0xef   : > { %721 = vst.msk [vmem:[%s1215_s8 + $0x80] sm:$0xff] %vm704_vm1, %v625_v10 }
  0xf0   : > { %v916_v11 = vpop.f32.mrb[2].mxu0 }
  0xf1   : > { %v940_v12 = vpop.f32.mrb[2].mxu1  ;;  %708 = vst.msk [vmem:[%s1215_s8 + $0x18] sm:$0xff] %vm704_vm1, %v916_v11  ;;  %v555_v13 = vpop.f32.mrb[3].mxu0 }
  0xf2   : > { %724 = vst.msk [vmem:[%s1215_s8 + $0x98] sm:$0xff] %vm704_vm1, %v940_v12  ;;  %v635_v14 = vpop.f32.mrb[3].mxu1  ;;  %707 = vst.msk [vmem:[%s1215_s8 + $0x10] sm:$0xff] %vm704_vm1, %v555_v13 }
  0xf3   : > { %723 = vst.msk [vmem:[%s1215_s8 + $0x90] sm:$0xff] %vm704_vm1, %v635_v14 }
  0xf4   : > { %v919_v15 = vpop.f32.mrb[4].mxu0 }
  0xf5   : > { %v943_v16 = vpop.f32.mrb[4].mxu1  ;;  %710 = vst.msk [vmem:[%s1215_s8 + $0x28] sm:$0xff] %vm704_vm1, %v919_v15  ;;  %v565_v17 = vpop.f32.mrb[5].mxu0 }
  0xf6   : > { %726 = vst.msk [vmem:[%s1215_s8 + $0xa8] sm:$0xff] %vm704_vm1, %v943_v16  ;;  %v645_v18 = vpop.f32.mrb[5].mxu1  ;;  %709 = vst.msk [vmem:[%s1215_s8 + $0x20] sm:$0xff] %vm704_vm1, %v565_v17 }
  0xf7   : > { %725 = vst.msk [vmem:[%s1215_s8 + $0xa0] sm:$0xff] %vm704_vm1, %v645_v18 }
  0xf8   : > { %v922_v19 = vpop.f32.mrb[6].mxu0 }
  0xf9   : > { %v946_v20 = vpop.f32.mrb[6].mxu1  ;;  %712 = vst.msk [vmem:[%s1215_s8 + $0x38] sm:$0xff] %vm704_vm1, %v922_v19  ;;  %v575_v21 = vpop.f32.mrb[7].mxu0 }
  0xfa   : > { %728 = vst.msk [vmem:[%s1215_s8 + $0xb8] sm:$0xff] %vm704_vm1, %v946_v20  ;;  %v655_v22 = vpop.f32.mrb[7].mxu1  ;;  %711 = vst.msk [vmem:[%s1215_s8 + $0x30] sm:$0xff] %vm704_vm1, %v575_v21 }
  0xfb   : > { %727 = vst.msk [vmem:[%s1215_s8 + $0xb0] sm:$0xff] %vm704_vm1, %v655_v22 }
  0xfc   : > { %v925_v23 = vpop.f32.mrb[8].mxu0 }
  0xfd   : > { %v949_v24 = vpop.f32.mrb[8].mxu1  ;;  %714 = vst.msk [vmem:[%s1215_s8 + $0x48] sm:$0xff] %vm704_vm1, %v925_v23  ;;  %v585_v25 = vpop.f32.mrb[9].mxu0 }
  0xfe   : > { %730 = vst.msk [vmem:[%s1215_s8 + $0xc8] sm:$0xff] %vm704_vm1, %v949_v24  ;;  %v665_v26 = vpop.f32.mrb[9].mxu1  ;;  %713 = vst.msk [vmem:[%s1215_s8 + $0x40] sm:$0xff] %vm704_vm1, %v585_v25 }
  0xff   : > { %729 = vst.msk [vmem:[%s1215_s8 + $0xc0] sm:$0xff] %vm704_vm1, %v665_v26 }
 0x100   : > { %v928_v27 = vpop.f32.mrb[10].mxu0 }
 0x101   : > { %v952_v28 = vpop.f32.mrb[10].mxu1  ;;  %716 = vst.msk [vmem:[%s1215_s8 + $0x58] sm:$0xff] %vm704_vm1, %v928_v27  ;;  %v595_v29 = vpop.f32.mrb[11].mxu0 }
 0x102   : > { %732 = vst.msk [vmem:[%s1215_s8 + $0xd8] sm:$0xff] %vm704_vm1, %v952_v28  ;;  %v675_v30 = vpop.f32.mrb[11].mxu1  ;;  %715 = vst.msk [vmem:[%s1215_s8 + $0x50] sm:$0xff] %vm704_vm1, %v595_v29 }
 0x103   : > { %731 = vst.msk [vmem:[%s1215_s8 + $0xd0] sm:$0xff] %vm704_vm1, %v675_v30 }
 0x104   : > { %v931_v31 = vpop.f32.mrb[12].mxu0 }
 0x105   : > { %v955_v32 = vpop.f32.mrb[12].mxu1  ;;  %718 = vst.msk [vmem:[%s1215_s8 + $0x68] sm:$0xff] %vm704_vm1, %v931_v31  ;;  %v605_v33 = vpop.f32.mrb[13].mxu0 }
 0x106   : > { %734 = vst.msk [vmem:[%s1215_s8 + $0xe8] sm:$0xff] %vm704_vm1, %v955_v32  ;;  %v685_v34 = vpop.f32.mrb[13].mxu1  ;;  %717 = vst.msk [vmem:[%s1215_s8 + $0x60] sm:$0xff] %vm704_vm1, %v605_v33 }
 0x107   : > { %733 = vst.msk [vmem:[%s1215_s8 + $0xe0] sm:$0xff] %vm704_vm1, %v685_v34 }
 0x108   : > { %v934_v35 = vpop.f32.mrb[14].mxu0 }
 0x109   : > { %v958_v36 = vpop.f32.mrb[14].mxu1  ;;  %720 = vst.msk [vmem:[%s1215_s8 + $0x78] sm:$0xff] %vm704_vm1, %v934_v35  ;;  %v615_v37 = vpop.f32.mrb[15].mxu0 }
 0x10a   : > { %736 = vst.msk [vmem:[%s1215_s8 + $0xf8] sm:$0xff] %vm704_vm1, %v958_v36  ;;  %v695_v38 = vpop.f32.mrb[15].mxu1  ;;  %719 = vst.msk [vmem:[%s1215_s8 + $0x70] sm:$0xff] %vm704_vm1, %v615_v37 }
 0x10b   : > { %735 = vst.msk [vmem:[%s1215_s8 + $0xf0] sm:$0xff] %vm704_vm1, %v695_v38 }
 0x10c PF: > { %s14_s17 = sadd.s32 1, %s1011_s17   ;;  %s1295_s15 = smov %s1007_s16 }
 0x10d   : > { %p11_p5 = scmp.ge.s32.totalorder %s14_s17, 4   ;;  %s1296_s16 = smov %s1298_s18 }
 0x10f   :  { %13 = sbr.rel (!%p11_p5) target bundleno = 2 (0x2), region = 69 }

// kernel: preact_bottleneck_forward.7
= control target key start
LH: loop header
LB: loop body
LE: loop exit
PB: predicated region body
PF: predicated region fallthrough
CT: control target
= control target key end

     0   :  { %10 = vsyncpa [#allocation3], 0  ;;  %s1615_s0 = inlined_call_operand.vmem [shape: f32[512,8], index: 0, kind: input, shape index: {}]   ;;  %s1616_s1 = inlined_call_operand.vmem [shape: f32[1,8], index: 1, kind: input, shape index: {}]   ;;  %s1617_s2 = inlined_call_operand.vmem [shape: f32[1,8], index: 2, kind: input, shape index: {}]   ;;  %s1618_s3 = inlined_call_operand.vmem [shape: f32[8,32], index: 3, kind: input, shape index: {}]   ;;  %s1619_s4 = inlined_call_operand.vmem [shape: f32[512,32], index: 4, kind: input, shape index: {}]   ;;  %s1620_s5 = inlined_call_operand.hbm [shape: f32[512,32], index: 5, kind: output, shape index: {}]  }
   0x1   :  { %12 = vsyncpa [#allocation3 + $0x1], 0  ;;  %s1243_s18 = smov 0   ;;  %s1245_s19 = smov 0  }
   0x2   :  { %s1247_s20 = smov 0   ;;  %s1249_s21 = smov 0  }
   0x3   :  { %s1251_s22 = smov 0   ;;  %s1253_s23 = smov 0  }
   0x4 LB: > { %s937_s24 = sadd.s32 4294967295, %s1208_s23   ;;  %s938_s25 = sadd.s32 4294967294, %s1208_s23   ;;  %s1208_s23 = sphi %s1253_s23, %s18_s23   ;;  %s1204_s22 = sphi %s1251_s22, %s1627_s22   ;;  %s1200_s21 = sphi %s1249_s21, %s1626_s21   ;;  %s1196_s20 = sphi %s1247_s20, %s1625_s20   ;;  %s1192_s19 = sphi %s1245_s19, %s1624_s19   ;;  %s1188_s18 = sphi %s1243_s18, %s1623_s18  }
   0x5   : > { %s30_s26 = sadd.s32 1, %s1204_s22  ;;  %s161_s27 = sadd.s32 1, %s1196_s20 }
   0x6   : > { %p32_p0 = scmp.ge.s32.totalorder %s30_s26, 2  ;;  %p171_p1 = scmp.ne.s32.totalorder %s1196_s20, %s1192_s19 }
   0x7   : > { %p172_p2 = scmp.eq.s32.totalorder %s937_s24, 1  ;;  %p177_p3 = scmp.ne.s32.totalorder %s1192_s19, %s1188_s18 }
   0x8   : > { %s1629_s26 = smov (%p32_p0, %s30_s26), 0  ;;  %p178_p5 = scmp.eq.s32.totalorder %s938_s25, 1 }
   0x9   : > { %p1283_p4 = por %p172_p2, %p171_p1  ;;  %s156_s29 = ssub.s32 %s1204_s22, %s1629_s26 }
   0xa   : > { %p942_p6 = scmp.ge.s32.totalorder %s1208_s23, 1  ;;  %p159_p7 = scmp.eq.s32.totalorder %s156_s29, 0 }
   0xb   : > { %p1290_p8 = por %p178_p5, %p177_p3  ;;  %p230_p9 = scmp.lt.s32.totalorder %s1208_s23, 3 }
   0xc   : > { %s1296_s6 = scalar_select %p159_p7, %s1196_s20, %s161_s27  }
   0xd   : > { %p231_p10 = pnand %p942_p6, %p230_p9 }
   0xe   : > { %v432_v0 = vld [vmem:[%s1618_s3] sm:$0xff] (!%p231_p10)  ;;  %s944_s9 = sshll.u32 (!%p231_p10), %s1200_s21, 5  ;;  %vm465_vm0 = vcmask (!%p231_p10), 64512   ;;  %s267_s24 = sand.u32 (!%p231_p10), 1, %s1192_s19   ;;  %vm787_vm1 = vcmask (!%p231_p10), 261120  }
   0xf   : > { %234 = sbr.rel (%p231_p10) target bundleno = 292 (0x124), region = 40  ;;  %1021 = vmatprep.subr.mxu0 (!%p231_p10), %v432_v0  ;;  %1071 = vmatprep.subr.mxu1 (!%p231_p10), %v432_v0  ;;  %p271_p11 = scmp.lt.s32.totalorder (!%p231_p10), %s944_s9, 63  ;;  %v1308_v1 = vld [vmem:[%s1616_s1] ss:$0 sm:$0xff] (!%p231_p10) }
  0x10   : > { %1022 = vmatpush3.msra.mxu0 (!%p231_p10), %v432_v0  ;;  %1072 = vmatpush3.msra.mxu1 (!%p231_p10), %v432_v0  ;;  %v1320_v2 = vld [vmem:[%s1617_s2] ss:$0 sm:$0xff] (!%p231_p10)  ;;  %s943_s7 = sshll.u32 (!%p231_p10), %s267_s24, 8  ;;  %s1569_s13 = scalar_lea.sflag (!%p231_p10), [#allocation3], %s267_s24 }
  0x11   : > { %s1466_s8 = scalar_lea.vmem (!%p231_p10), [#allocation2], %s943_s7 }
  0x16   : > { %s1631_s9 = smov (!%p271_p11, %s944_s9), 63 }
  0x17   : > { %s945_s10 = sshll.u32 %s1631_s9, 3  ;;  %s987_s9 = sshll.u32 %s1200_s21, 12 }
  0x18   : > { %s1315_s15 = scalar_lea.vmem %s1615_s0, %s945_s10  ;;  %s1456_s29 = scalar_lea.vmem %s1619_s4, %s945_s10 }
  0x19   : > { %v290_v3 = vld [vmem:[%s1315_s15] sm:$0xff]  ;;  %v291_v5 = vld [vmem:[%s1315_s15 + $0x8] sm:$0xff]  ;;  %v292_v10 = vld [vmem:[%s1315_s15 + $0x10] sm:$0xff]  ;;  %s835_s10 = sshll.u32 %s1466_s8, 4  ;;  %s1555_s12 = scalar_lea.hbm %s1620_s5, %s987_s9  ;;  %s1557_s10 = int_to_ptr.vmem [resolvable:$true] %s835_s10 }
  0x1a   : > { %v306_v4 = vld [vmem:[%s1315_s15 + $0x80] sm:$0xff]  ;;  %v329_v6 = vmul.f32 %v1308_v1, %v290_v3  ;;  %v330_v8 = vmul.f32 %v1308_v1, %v291_v5  ;;  %v307_v9 = vld [vmem:[%s1315_s15 + $0x88] sm:$0xff]  ;;  %v308_v11 = vld [vmem:[%s1315_s15 + $0x90] sm:$0xff]  ;;  %v331_v13 = vmul.f32 %v1308_v1, %v292_v10  ;;  %s1130_s14 = scalar_lea.vmem %s1557_s10, 4096 }
  0x1b   : > { %v345_v7 = vmul.f32 %v1308_v1, %v306_v4  ;;  %v346_v12 = vmul.f32 %v1308_v1, %v307_v9  ;;  %v347_v14 = vmul.f32 %v1308_v1, %v308_v11  ;;  %v293_v15 = vld [vmem:[%s1315_s15 + $0x18] sm:$0xff]  ;;  %v294_v25 = vld [vmem:[%s1315_s15 + $0x20] sm:$0xff]  ;;  %v295_v27 = vld [vmem:[%s1315_s15 + $0x28] sm:$0xff]  ;;  %p1131_p12 = scmp.ne.s32.totalorder %s1557_s10, %s1130_s14 }
  0x1c   : > { %v309_v16 = vld [vmem:[%s1315_s15 + $0x98] sm:$0xff]  ;;  %v368_v17 = vadd.f32 %v1320_v2, %v329_v6  ;;  %v369_v19 = vadd.f32 %v1320_v2, %v330_v8  ;;  %v332_v20 = vmul.f32 %v1308_v1, %v293_v15  ;;  %v370_v22 = vadd.f32 %v1320_v2, %v331_v13  ;;  %v310_v26 = vld [vmem:[%s1315_s15 + $0xa0] sm:$0xff]  ;;  %v311_v32 = vld [vmem:[%s1315_s15 + $0xa8] sm:$0xff] }
  0x1d   : > { %v384_v18 = vadd.f32 %v1320_v2, %v345_v7  ;;  %v385_v21 = vadd.f32 %v1320_v2, %v346_v12  ;;  %v386_v23 = vadd.f32 %v1320_v2, %v347_v14  ;;  %v348_v24 = vmul.f32 %v1308_v1, %v309_v16  ;;  %v296_v33 = vld [vmem:[%s1315_s15 + $0x30] sm:$0xff]  ;;  %v297_v43 = vld [vmem:[%s1315_s15 + $0x38] sm:$0xff]  ;;  %v298_v56 = vld [vmem:[%s1315_s15 + $0x40] sm:$0xff]  ;;  %p1132_p13 = pnand %p1131_p12, %p1283_p4 }
  0x1e   : > { %v400_v28 = vmax.f32 %v368_v17, 0.0  ;;  %v401_v30 = vmax.f32 %v369_v19, 0.0  ;;  %v371_v31 = vadd.f32 %v1320_v2, %v332_v20  ;;  %v312_v34 = vld [vmem:[%s1315_s15 + $0xb0] sm:$0xff]  ;;  %v402_v36 = vmax.f32 %v370_v22, 0.0  ;;  %v313_v48 = vld [vmem:[%s1315_s15 + $0xb8] sm:$0xff]  ;;  %v314_v57 = vld [vmem:[%s1315_s15 + $0xc0] sm:$0xff] }
  0x1f   : > { %v416_v29 = vmax.f32 %v384_v18, 0.0  ;;  %v417_v35 = vmax.f32 %v385_v21, 0.0  ;;  %v418_v37 = vmax.f32 %v386_v23, 0.0  ;;  %v387_v38 = vadd.f32 %v1320_v2, %v348_v24  ;;  %v299_v61 = vld [vmem:[%s1315_s15 + $0x48] sm:$0xff]  ;;  %v300_v63 = vld [vmem:[%s1315_s15 + $0x50] sm:$0xff]  ;;  %v301_v14 = vld [vmem:[%s1315_s15 + $0x58] sm:$0xff]  ;;  %p1133_p0 = pneg %p1132_p13 }
  0x20   : > { %1023 = vmatprep.mubr.msk.f32.mxu0 %vm465_vm0, %v400_v28  ;;  %v403_v39 = vmax.f32 %v371_v31, 0.0  ;;  %v333_v40 = vmul.f32 %v1308_v1, %v294_v25  ;;  %v349_v41 = vmul.f32 %v1308_v1, %v310_v26  ;;  %v334_v42 = vmul.f32 %v1308_v1, %v295_v27  ;;  %v315_v62 = vld [vmem:[%s1315_s15 + $0xc8] sm:$0xff]  ;;  %v316_v6 = vld [vmem:[%s1315_s15 + $0xd0] sm:$0xff]  ;;  %v317_v19 = vld [vmem:[%s1315_s15 + $0xd8] sm:$0xff] }
  0x21   : > { %1047 = vmatprep.mubr.msk.f32.mxu1 %vm465_vm0, %v416_v29  ;;  %1024 = vmatmul.mubr.msk.f32.vlgmr.msra.gmra.mrb[0].mxu0 %vm465_vm0, %v401_v30  ;;  %v419_v44 = vmax.f32 %v387_v38, 0.0  ;;  %v350_v45 = vmul.f32 %v1308_v1, %v311_v32  ;;  %v335_v46 = vmul.f32 %v1308_v1, %v296_v33  ;;  %v351_v47 = vmul.f32 %v1308_v1, %v312_v34  ;;  %v302_v24 = vld [vmem:[%s1315_s15 + $0x60] sm:$0xff]  ;;  %v303_v30 = vld [vmem:[%s1315_s15 + $0x68] sm:$0xff]  ;;  %v304_v34 = vld [vmem:[%s1315_s15 + $0x70] sm:$0xff] }
  0x22   : > { %1048 = vmatmul.mubr.msk.f32.vlgmr.msra.gmra.mrb[0].mxu1 %vm465_vm0, %v417_v35  ;;  %1026 = vmatprep.mubr.msk.f32.mxu0 %vm465_vm0, %v402_v36  ;;  %v372_v49 = vadd.f32 %v1320_v2, %v333_v40  ;;  %v388_v50 = vadd.f32 %v1320_v2, %v349_v41  ;;  %v373_v51 = vadd.f32 %v1320_v2, %v334_v42  ;;  %v318_v25 = vld [vmem:[%s1315_s15 + $0xe0] sm:$0xff]  ;;  %v319_v31 = vld [vmem:[%s1315_s15 + $0xe8] sm:$0xff] }
  0x23   : > { %1050 = vmatprep.mubr.msk.f32.mxu1 %vm465_vm0, %v418_v37  ;;  %v389_v52 = vadd.f32 %v1320_v2, %v350_v45  ;;  %v374_v53 = vadd.f32 %v1320_v2, %v335_v46  ;;  %v390_v54 = vadd.f32 %v1320_v2, %v351_v47  ;;  %v336_v55 = vmul.f32 %v1308_v1, %v297_v43 }
  0x24   : > { %v404_v58 = vmax.f32 %v372_v49, 0.0  ;;  %v420_v59 = vmax.f32 %v388_v50, 0.0  ;;  %v352_v60 = vmul.f32 %v1308_v1, %v313_v48  ;;  %v405_v0 = vmax.f32 %v373_v51, 0.0  ;;  %v305_v48 = vld [vmem:[%s1315_s15 + $0x78] sm:$0xff] }
  0x25   : > { %1027 = vmatmul.mubr.msk.f32.gmra.mrb[2].mxu0 %vm465_vm0, %v403_v39  ;;  %v421_v3 = vmax.f32 %v389_v52, 0.0  ;;  %v406_v4 = vmax.f32 %v374_v53, 0.0  ;;  %v375_v5 = vadd.f32 %v1320_v2, %v336_v55  ;;  %v422_v7 = vmax.f32 %v390_v54, 0.0  ;;  %v320_v39 = vld [vmem:[%s1315_s15 + $0xf0] sm:$0xff]  ;;  %v321_v49 = vld [vmem:[%s1315_s15 + $0xf8] sm:$0xff]  ;;  %s1210_s15 = smov [#allocation2]  }
  0x26   : > { %1051 = vmatmul.mubr.msk.f32.gmra.mrb[2].mxu1 %vm465_vm0, %v419_v44  ;;  %1029 = vmatprep.mubr.msk.f32.mxu0 %vm465_vm0, %v404_v58  ;;  %v391_v8 = vadd.f32 %v1320_v2, %v352_v60  ;;  %v337_v9 = vmul.f32 %v1308_v1, %v298_v56  ;;  %v353_v10 = vmul.f32 %v1308_v1, %v314_v57  ;;  %s1134_s16 = sshll.u32 %s1210_s15, 4  ;;  %s1135_s16 = int_to_ptr.vmem [resolvable:$false] %s1134_s16 }
  0x27   : > { %1053 = vmatprep.mubr.msk.f32.mxu1 %vm465_vm0, %v420_v59  ;;  %v338_v11 = vmul.f32 %v1308_v1, %v299_v61  ;;  %v354_v12 = vmul.f32 %v1308_v1, %v315_v62  ;;  %v339_v13 = vmul.f32 %v1308_v1, %v300_v63  ;;  %v407_v15 = vmax.f32 %v375_v5, 0.0  ;;  %s1136_s17 = scalar_lea.vmem %s1135_s16, 8192  ;;  %p1137_p1 = scmp.lt.s32.totalorder %s1557_s10, %s1135_s16 }
  0x28   : > { %v376_v16 = vadd.f32 %v1320_v2, %v337_v9  ;;  %v392_v17 = vadd.f32 %v1320_v2, %v353_v10  ;;  %v355_v18 = vmul.f32 %v1308_v1, %v316_v6  ;;  %v423_v20 = vmax.f32 %v391_v8, 0.0  ;;  %v450_v6 = vld [vmem:[%s1456_s29 + $0x88] sm:$0xff]  ;;  %v449_v8 = vld [vmem:[%s1456_s29 + $0x80] sm:$0xff]  ;;  %p1138_p2 = scmp.lt.s32.totalorder %s1136_s17, %s1130_s14 }
  0x29   : > { %1030 = vmatmul.mubr.msk.f32.gmra.mrb[4].mxu0 %vm465_vm0, %v405_v0  ;;  %v377_v21 = vadd.f32 %v1320_v2, %v338_v11  ;;  %v393_v22 = vadd.f32 %v1320_v2, %v354_v12  ;;  %v378_v23 = vadd.f32 %v1320_v2, %v339_v13  ;;  %v340_v29 = vmul.f32 %v1308_v1, %v301_v14 }
  0x2a   : > { %1054 = vmatmul.mubr.msk.f32.gmra.mrb[4].mxu1 %vm465_vm0, %v421_v3  ;;  %1032 = vmatprep.mubr.msk.f32.mxu0 %vm465_vm0, %v406_v4  ;;  %v408_v26 = vmax.f32 %v376_v16, 0.0  ;;  %v424_v27 = vmax.f32 %v392_v17, 0.0  ;;  %v394_v28 = vadd.f32 %v1320_v2, %v355_v18  ;;  %v356_v33 = vmul.f32 %v1308_v1, %v317_v19  ;;  %v436_v17 = vld [vmem:[%s1456_s29 + $0x18] sm:$0xff]  ;;  %v435_v19 = vld [vmem:[%s1456_s29 + $0x10] sm:$0xff]  ;;  %p1139_p3 = por %p1138_p2, %p1137_p1 }
  0x2b   : > { %1056 = vmatprep.mubr.msk.f32.mxu1 %vm465_vm0, %v422_v7  ;;  %v409_v32 = vmax.f32 %v377_v21, 0.0  ;;  %v425_v35 = vmax.f32 %v393_v22, 0.0  ;;  %v379_v36 = vadd.f32 %v1320_v2, %v340_v29  ;;  %v341_v37 = vmul.f32 %v1308_v1, %v302_v24  ;;  %v433_v7 = vld [vmem:[%s1456_s29] sm:$0xff]  ;;  %v452_v18 = vld [vmem:[%s1456_s29 + $0x98] sm:$0xff]  ;;  %v438_v29 = vld [vmem:[%s1456_s29 + $0x28] sm:$0xff] }
  0x2c   : > { %v357_v38 = vmul.f32 %v1308_v1, %v318_v25  ;;  %v410_v40 = vmax.f32 %v378_v23, 0.0  ;;  %v395_v41 = vadd.f32 %v1320_v2, %v356_v33  ;;  %v342_v42 = vmul.f32 %v1308_v1, %v303_v30  ;;  %v454_v30 = vld [vmem:[%s1456_s29 + $0xa8] sm:$0xff]  ;;  %p1140_p5 = pnand %p1139_p3, %p1133_p0 }
  0x2d   : > { %1033 = vmatmul.mubr.msk.f32.gmra.mrb[6].mxu0 %vm465_vm0, %v407_v15  ;;  %v358_v43 = vmul.f32 %v1308_v1, %v319_v31  ;;  %v426_v44 = vmax.f32 %v394_v28, 0.0  ;;  %v380_v45 = vadd.f32 %v1320_v2, %v341_v37  ;;  %v343_v47 = vmul.f32 %v1308_v1, %v304_v34  ;;  %v437_v31 = vld [vmem:[%s1456_s29 + $0x20] sm:$0xff] }
  0x2e   : > { %1057 = vmatmul.mubr.msk.f32.gmra.mrb[6].mxu1 %vm465_vm0, %v423_v20  ;;  %1035 = vmatprep.mubr.msk.f32.mxu0 %vm465_vm0, %v408_v26  ;;  %v396_v46 = vadd.f32 %v1320_v2, %v357_v38  ;;  %v359_v50 = vmul.f32 %v1308_v1, %v320_v39  ;;  %v411_v51 = vmax.f32 %v379_v36, 0.0  ;;  %v381_v52 = vadd.f32 %v1320_v2, %v342_v42  ;;  %v451_v20 = vld [vmem:[%s1456_s29 + $0x90] sm:$0xff]  ;;  %v456_v42 = vld [vmem:[%s1456_s29 + $0xb8] sm:$0xff] }
  0x2f   : > { %1059 = vmatprep.mubr.msk.f32.mxu1 %vm465_vm0, %v424_v27  ;;  %v427_v53 = vmax.f32 %v395_v41, 0.0  ;;  %v397_v54 = vadd.f32 %v1320_v2, %v358_v43  ;;  %v344_v55 = vmul.f32 %v1308_v1, %v305_v48  ;;  %v360_v56 = vmul.f32 %v1308_v1, %v321_v49  ;;  %v440_v41 = vld [vmem:[%s1456_s29 + $0x38] sm:$0xff]  ;;  %v439_v43 = vld [vmem:[%s1456_s29 + $0x30] sm:$0xff] }
  0x30   : > { %v412_v57 = vmax.f32 %v380_v45, 0.0  ;;  %v428_v58 = vmax.f32 %v396_v46, 0.0  ;;  %v382_v59 = vadd.f32 %v1320_v2, %v343_v47  ;;  %v398_v60 = vadd.f32 %v1320_v2, %v359_v50 }
  0x31   : > { %1036 = vmatmul.mubr.msk.f32.gmra.mrb[8].mxu0 %vm465_vm0, %v409_v32  ;;  %v413_v61 = vmax.f32 %v381_v52, 0.0  ;;  %v429_v62 = vmax.f32 %v397_v54, 0.0  ;;  %v383_v1 = vadd.f32 %v1320_v2, %v344_v55  ;;  %v399_v63 = vadd.f32 %v1320_v2, %v360_v56  ;;  %v434_v2 = vld [vmem:[%s1456_s29 + $0x8] sm:$0xff]  ;;  %v453_v32 = vld [vmem:[%s1456_s29 + $0xa0] sm:$0xff] }
  0x32   : > { %1060 = vmatmul.mubr.msk.f32.gmra.mrb[8].mxu1 %vm465_vm0, %v425_v35  ;;  %1038 = vmatprep.mubr.msk.f32.mxu0 %vm465_vm0, %v410_v40  ;;  %v414_v0 = vmax.f32 %v382_v59, 0.0  ;;  %v430_v3 = vmax.f32 %v398_v60, 0.0  ;;  %v458_v54 = vld [vmem:[%s1456_s29 + $0xc8] sm:$0xff]  ;;  %v441_v55 = vld [vmem:[%s1456_s29 + $0x40] sm:$0xff] }
  0x33   : > { %1062 = vmatprep.mubr.msk.f32.mxu1 %vm465_vm0, %v426_v44  ;;  %v415_v4 = vmax.f32 %v383_v1, 0.0  ;;  %v431_v5 = vmax.f32 %v399_v63, 0.0  ;;  %v455_v44 = vld [vmem:[%s1456_s29 + $0xb0] sm:$0xff]  ;;  %v457_v56 = vld [vmem:[%s1456_s29 + $0xc0] sm:$0xff] }
  0x35   : > { %1039 = vmatmul.mubr.msk.f32.gmra.mrb[10].mxu0 %vm465_vm0, %v411_v51 }
  0x36   : > { %1063 = vmatmul.mubr.msk.f32.gmra.mrb[10].mxu1 %vm465_vm0, %v427_v53  ;;  %1041 = vmatprep.mubr.msk.f32.mxu0 %vm465_vm0, %v412_v57  ;;  %v442_v53 = vld [vmem:[%s1456_s29 + $0x48] sm:$0xff] }
  0x37   : > { %1065 = vmatprep.mubr.msk.f32.mxu1 %vm465_vm0, %v428_v58 }
  0x39   : > { %1042 = vmatmul.mubr.msk.f32.gmra.mrb[12].mxu0 %vm465_vm0, %v413_v61 }
  0x3a   : > { %1066 = vmatmul.mubr.msk.f32.gmra.mrb[12].mxu1 %vm465_vm0, %v429_v62  ;;  %1044 = vmatprep.mubr.msk.f32.mxu0 %vm465_vm0, %v414_v0  ;;  %v444_v0 = vld [vmem:[%s1456_s29 + $0x58] sm:$0xff] }
  0x3b   : > { %1068 = vmatprep.mubr.msk.f32.mxu1 %vm465_vm0, %v430_v3  ;;  %v460_v3 = vld [vmem:[%s1456_s29 + $0xd8] sm:$0xff] }
  0x3d   : > { %1045 = vmatmul.mubr.msk.f32.gmra.mrb[14].mxu0 %vm465_vm0, %v415_v4  ;;  %v443_v4 = vld [vmem:[%s1456_s29 + $0x50] sm:$0xff] }
  0x3e   : > { %1069 = vmatmul.mubr.msk.f32.gmra.mrb[14].mxu1 %vm465_vm0, %v431_v5  ;;  %v459_v5 = vld [vmem:[%s1456_s29 + $0xd0] sm:$0xff] }
  0xf4   : > { %v1025_v9 = vpop.f32.mrb[0].mxu0 }
  0xf5   : > { %v1049_v10 = vpop.f32.mrb[0].mxu1  ;;  %v634_v11 = vadd.f32 %v1025_v9, %v434_v2  ;;  %v628_v13 = vpop.f32.mrb[1].mxu0 }
  0xf6   : > { %v714_v12 = vadd.f32 %v1049_v10, %v450_v6  ;;  %v708_v14 = vpop.f32.mrb[1].mxu1  ;;  %v629_v15 = vadd.f32 %v628_v13, %v433_v7  ;;  %v446_v13 = vld [vmem:[%s1456_s29 + $0x68] sm:$0xff] }
  0xf7   : > { %v709_v16 = vadd.f32 %v708_v14, %v449_v8  ;;  %789 = vst.msk [vmem:[%s1466_s8 + $0x8] sm:$0xff] %vm787_vm1, %v634_v11  ;;  %v462_v14 = vld [vmem:[%s1456_s29 + $0xe8] sm:$0xff] }
  0xf8   : > { %805 = vst.msk [vmem:[%s1466_s8 + $0x88] sm:$0xff] %vm787_vm1, %v714_v12  ;;  %788 = vst.msk [vmem:[%s1466_s8] sm:$0xff] %vm787_vm1, %v629_v15  ;;  %v1028_v21 = vpop.f32.mrb[2].mxu0  ;;  %v445_v15 = vld [vmem:[%s1456_s29 + $0x60] sm:$0xff] }
  0xf9   : > { %804 = vst.msk [vmem:[%s1466_s8 + $0x80] sm:$0xff] %vm787_vm1, %v709_v16  ;;  %v1052_v22 = vpop.f32.mrb[2].mxu1  ;;  %v644_v23 = vadd.f32 %v1028_v21, %v436_v17  ;;  %v638_v25 = vpop.f32.mrb[3].mxu0  ;;  %v461_v16 = vld [vmem:[%s1456_s29 + $0xe0] sm:$0xff] }
  0xfa   : > { %v724_v24 = vadd.f32 %v1052_v22, %v452_v18  ;;  %v718_v26 = vpop.f32.mrb[3].mxu1  ;;  %v639_v27 = vadd.f32 %v638_v25, %v435_v19  ;;  %v448_v25 = vld [vmem:[%s1456_s29 + $0x78] sm:$0xff] }
  0xfb   : > { %v719_v28 = vadd.f32 %v718_v26, %v451_v20  ;;  %791 = vst.msk [vmem:[%s1466_s8 + $0x18] sm:$0xff] %vm787_vm1, %v644_v23  ;;  %v464_v26 = vld [vmem:[%s1456_s29 + $0xf8] sm:$0xff] }
  0xfc   : > { %807 = vst.msk [vmem:[%s1466_s8 + $0x98] sm:$0xff] %vm787_vm1, %v724_v24  ;;  %790 = vst.msk [vmem:[%s1466_s8 + $0x10] sm:$0xff] %vm787_vm1, %v639_v27  ;;  %v1031_v33 = vpop.f32.mrb[4].mxu0  ;;  %v447_v27 = vld [vmem:[%s1456_s29 + $0x70] sm:$0xff] }
  0xfd   : > { %806 = vst.msk [vmem:[%s1466_s8 + $0x90] sm:$0xff] %vm787_vm1, %v719_v28  ;;  %v1055_v34 = vpop.f32.mrb[4].mxu1  ;;  %v654_v35 = vadd.f32 %v1031_v33, %v438_v29  ;;  %v648_v37 = vpop.f32.mrb[5].mxu0  ;;  %v463_v28 = vld [vmem:[%s1456_s29 + $0xf0] sm:$0xff] }
  0xfe   : > { %v734_v36 = vadd.f32 %v1055_v34, %v454_v30  ;;  %v728_v38 = vpop.f32.mrb[5].mxu1  ;;  %v649_v39 = vadd.f32 %v648_v37, %v437_v31 }
  0xff   : > { %v729_v40 = vadd.f32 %v728_v38, %v453_v32  ;;  %793 = vst.msk [vmem:[%s1466_s8 + $0x28] sm:$0xff] %vm787_vm1, %v654_v35 }
 0x100   : > { %809 = vst.msk [vmem:[%s1466_s8 + $0xa8] sm:$0xff] %vm787_vm1, %v734_v36  ;;  %792 = vst.msk [vmem:[%s1466_s8 + $0x20] sm:$0xff] %vm787_vm1, %v649_v39  ;;  %v1034_v45 = vpop.f32.mrb[6].mxu0 }
 0x101   : > { %808 = vst.msk [vmem:[%s1466_s8 + $0xa0] sm:$0xff] %vm787_vm1, %v729_v40  ;;  %v1058_v46 = vpop.f32.mrb[6].mxu1  ;;  %v664_v47 = vadd.f32 %v1034_v45, %v440_v41  ;;  %v658_v49 = vpop.f32.mrb[7].mxu0 }
 0x102   : > { %v744_v48 = vadd.f32 %v1058_v46, %v456_v42  ;;  %v738_v50 = vpop.f32.mrb[7].mxu1  ;;  %v659_v51 = vadd.f32 %v658_v49, %v439_v43 }
 0x103   : > { %v739_v52 = vadd.f32 %v738_v50, %v455_v44  ;;  %795 = vst.msk [vmem:[%s1466_s8 + $0x38] sm:$0xff] %vm787_vm1, %v664_v47 }
 0x104   : > { %811 = vst.msk [vmem:[%s1466_s8 + $0xb8] sm:$0xff] %vm787_vm1, %v744_v48  ;;  %794 = vst.msk [vmem:[%s1466_s8 + $0x30] sm:$0xff] %vm787_vm1, %v659_v51  ;;  %v1037_v57 = vpop.f32.mrb[8].mxu0 }
 0x105   : > { %810 = vst.msk [vmem:[%s1466_s8 + $0xb0] sm:$0xff] %vm787_vm1, %v739_v52  ;;  %v1061_v58 = vpop.f32.mrb[8].mxu1  ;;  %v674_v59 = vadd.f32 %v1037_v57, %v442_v53  ;;  %v668_v61 = vpop.f32.mrb[9].mxu0 }
 0x106   : > { %v754_v60 = vadd.f32 %v1061_v58, %v458_v54  ;;  %v748_v62 = vpop.f32.mrb[9].mxu1  ;;  %v669_v1 = vadd.f32 %v668_v61, %v441_v55 }
 0x107   : > { %v749_v63 = vadd.f32 %v748_v62, %v457_v56  ;;  %797 = vst.msk [vmem:[%s1466_s8 + $0x48] sm:$0xff] %vm787_vm1, %v674_v59 }
 0x108   : > { %813 = vst.msk [vmem:[%s1466_s8 + $0xc8] sm:$0xff] %vm787_vm1, %v754_v60  ;;  %796 = vst.msk [vmem:[%s1466_s8 + $0x40] sm:$0xff] %vm787_vm1, %v669_v1  ;;  %v1040_v2 = vpop.f32.mrb[10].mxu0 }
 0x109   : > { %812 = vst.msk [vmem:[%s1466_s8 + $0xc0] sm:$0xff] %vm787_vm1, %v749_v63  ;;  %v1064_v6 = vpop.f32.mrb[10].mxu1  ;;  %v684_v7 = vadd.f32 %v1040_v2, %v444_v0  ;;  %v678_v9 = vpop.f32.mrb[11].mxu0 }
 0x10a   : > { %v764_v8 = vadd.f32 %v1064_v6, %v460_v3  ;;  %v758_v10 = vpop.f32.mrb[11].mxu1  ;;  %v679_v11 = vadd.f32 %v678_v9, %v443_v4 }
 0x10b   : > { %v759_v12 = vadd.f32 %v758_v10, %v459_v5  ;;  %799 = vst.msk [vmem:[%s1466_s8 + $0x58] sm:$0xff] %vm787_vm1, %v684_v7 }
 0x10c   : > { %815 = vst.msk [vmem:[%s1466_s8 + $0xd8] sm:$0xff] %vm787_vm1, %v764_v8  ;;  %798 = vst.msk [vmem:[%s1466_s8 + $0x50] sm:$0xff] %vm787_vm1, %v679_v11  ;;  %v1043_v17 = vpop.f32.mrb[12].mxu0 }
 0x10d   : > { %814 = vst.msk [vmem:[%s1466_s8 + $0xd0] sm:$0xff] %vm787_vm1, %v759_v12  ;;  %v1067_v18 = vpop.f32.mrb[12].mxu1  ;;  %v694_v19 = vadd.f32 %v1043_v17, %v446_v13  ;;  %v688_v21 = vpop.f32.mrb[13].mxu0 }
 0x10e   : > { %v774_v20 = vadd.f32 %v1067_v18, %v462_v14  ;;  %v768_v22 = vpop.f32.mrb[13].mxu1  ;;  %v689_v23 = vadd.f32 %v688_v21, %v445_v15 }
 0x10f   : > { %v769_v24 = vadd.f32 %v768_v22, %v461_v16  ;;  %801 = vst.msk [vmem:[%s1466_s8 + $0x68] sm:$0xff] %vm787_vm1, %v694_v19 }
 0x110   : > { %817 = vst.msk [vmem:[%s1466_s8 + $0xe8] sm:$0xff] %vm787_vm1, %v774_v20  ;;  %800 = vst.msk [vmem:[%s1466_s8 + $0x60] sm:$0xff] %vm787_vm1, %v689_v23  ;;  %v1046_v29 = vpop.f32.mrb[14].mxu0 }
 0x111   : > { %816 = vst.msk [vmem:[%s1466_s8 + $0xe0] sm:$0xff] %vm787_vm1, %v769_v24  ;;  %v1070_v30 = vpop.f32.mrb[14].mxu1  ;;  %v704_v31 = vadd.f32 %v1046_v29, %v448_v25  ;;  %v698_v33 = vpop.f32.mrb[15].mxu0 }
 0x112   : > { %v784_v32 = vadd.f32 %v1070_v30, %v464_v26  ;;  %v778_v34 = vpop.f32.mrb[15].mxu1  ;;  %v699_v35 = vadd.f32 %v698_v33, %v447_v27 }
 0x113   : > { %v779_v36 = vadd.f32 %v778_v34, %v463_v28  ;;  %803 = vst.msk [vmem:[%s1466_s8 + $0x78] sm:$0xff] %vm787_vm1, %v704_v31 }
 0x114   : > { %819 = vst.msk [vmem:[%s1466_s8 + $0xf8] sm:$0xff] %vm787_vm1, %v784_v32  ;;  %802 = vst.msk [vmem:[%s1466_s8 + $0x70] sm:$0xff] %vm787_vm1, %v699_v35 }
 0x115   : > { %818 = vst.msk [vmem:[%s1466_s8 + $0xf0] sm:$0xff] %vm787_vm1, %v779_v36 }
 0x116   : > { %1143 = shalt.err (!%p1140_p5)
}
 0x117   : > { %s1144_s24 = scalar_lea.hbm %s1555_s12, 4096  ;;  %s1148_s29 = scalar_lea.hbm %s1620_s5, 8192 }
 0x118   : > { %p1145_p6 = scmp.ne.s32.totalorder %s1555_s12, %s1144_s24  ;;  %p1149_p10 = scmp.lt.u32.totalorder %s1555_s12, %s1620_s5 }
 0x119   : > { %p1150_p11 = scmp.lt.u32.totalorder %s1148_s29, %s1144_s24  ;;  %p1152_p13 = scmp.lt.u32.totalorder %s1144_s24, %s1555_s12 }
 0x11a   : > { %p1146_p7 = pnand %p1145_p6, %p1283_p4 }
 0x11b   : > { %p1151_p12 = por %p1150_p11, %p1149_p10 }
 0x11c   : > { %p1147_p9 = pneg %p1146_p7 }
 0x11d   : > { %p1153_p0 = por %p1152_p13, %p1151_p12 }
 0x11f   : > { %p1154_p1 = pnand %p1153_p0, %p1147_p9 }
 0x121   : > { %1157 = shalt.err (!%p1154_p1)
}
 0x122   : > { %s1211_s9 = smov 128   ;;  %s1212_s21 = smov 8  }
 0x123   : > { %1073 = dma.vmem_to_hbm [thread:$0]  (%p1283_p4), %s1557_s10, 4096, %s1555_s12, %s1569_s13, %s1211_s9, %s1211_s9, %s1212_s21  }
 0x124 PF: > { %p1079_p2 = scmp.ge.s32.totalorder %s1208_s23, 2  ;;  %s850_s11 = sand.u32 1, %s1188_s18  }
 0x125   : > { %s851_s14 = scalar_lea.sflag [#allocation3], %s850_s11 }
 0x126   : > { %p1076_p3 = pnand %p1079_p2, %p1290_p8 }
 0x128   : > { %1183 = dma.done.wait (!%p1076_p3), %s851_s14, 4096  }
 0x129   : > { %1185 = vsyncadd (!%p1076_p3), %s851_s14, 4294963200  ;;  %s18_s23 = sadd.s32 1, %s1208_s23   ;;  %s1623_s18 = smov %s1192_s19 }
 0x12a   : > { %p15_p5 = scmp.ge.s32.totalorder %s18_s23, 4   ;;  %s1624_s19 = smov %s1196_s20 }
 0x12b   : > { %s1625_s20 = smov %s1296_s6  ;;  %s1626_s21 = smov %s1204_s22 }
 0x12c   : > { %s1627_s22 = smov %s1629_s26  ;;  %17 = sbr.rel (!%p15_p5) target bundleno = 4 (0x4), region = 81 }
 0x133   :  { %856 = vsyncpa [#allocation3], 1 }
 0x134   :  { %858 = vsyncpa [#allocation3 + $0x1], 1 }

// kernel: preact_bottleneck_forward.6
= control target key start
LH: loop header
LB: loop body
LE: loop exit
PB: predicated region body
PF: predicated region fallthrough
CT: control target
= control target key end

     0   :  { %s5311_s24 = smov 0   ;;  %s6900_s0 = inlined_call_operand.vmem [shape: f32[2,18,18,8], index: 0, kind: input, shape index: {}]   ;;  %s6901_s1 = inlined_call_operand.vmem [shape: f32[18,18,1], index: 1, kind: input, shape index: {}]   ;;  %s6902_s2 = inlined_call_operand.vmem [shape: f32[1,8], index: 2, kind: input, shape index: {}]   ;;  %s6903_s3 = inlined_call_operand.vmem [shape: f32[1,8], index: 3, kind: input, shape index: {}]   ;;  %s6904_s4 = inlined_call_operand.vmem [shape: f32[3,3,8,8], index: 4, kind: input, shape index: {}]   ;;  %s6905_s5 = inlined_call_operand.vmem [shape: f32[2,256,8], index: 5, kind: output, shape index: {0}]   ;;  %s6906_s6 = inlined_call_operand.vmem [shape: f32[2,1,8], index: 6, kind: output, shape index: {1}]   ;;  %s6907_s7 = inlined_call_operand.vmem [shape: f32[2,1,8], index: 7, kind: output, shape index: {2}]  }
   0x1 LB: > { %s3933_s25 = sadd.s32 4294967295, %s5268_s24   ;;  %p3937_p0 = scmp.ge.s32.totalorder %s5268_s24, 1  ;;  %s5268_s24 = sphi %s5311_s24, %s18_s24  }
   0x2   : > { %p242_p1 = scmp.lt.s32.totalorder %s5268_s24, 3 }
   0x4   : > { %p243_p2 = pnand %p3937_p0, %p242_p1 }
   0x6   : > { %246 = sbr.rel (%p243_p2) target bundleno = 700 (0x2bc), region = 40 }
   0xd   : > { %v529_v0 = vld [vmem:[%s6901_s1 + $0x18] sm:$0xff]  ;;  %v526_v1 = vld [vmem:[%s6901_s1] sm:$0xff]  ;;  %v5270_v2 = vmov 0   ;;  %v527_v4 = vld [vmem:[%s6901_s1 + $0x8] sm:$0xff]  ;;  %p280_p3 = scmp.lt.s32.totalorder %s3933_s25, 1  ;;  %vm953_vm0 = vcmask 1046528  }
   0xe   : > { %5258 = vset.pattern.permute.xlu1 %v5270_v2  ;;  %5257 = vset.pattern.permute.xlu0 %v5270_v2  ;;  %v530_v3 = vld [vmem:[%s6901_s1 + $0x20] sm:$0xff]  ;;  %v531_v5 = vld [vmem:[%s6901_s1 + $0x28] sm:$0x3]  ;;  %v528_v6 = vld [vmem:[%s6901_s1 + $0x10] sm:$0x3]  ;;  %vm1036_vm1 = vcmask 64512  }
   0xf   : > { %597 = vperm.xlu1 %5258, %v529_v0   ;;  %582 = vperm.xlu0 %5257, %v526_v1   ;;  %v533_v7 = vld [vmem:[%s6901_s1 + $0x38] sm:$0xff]  ;;  %v532_v8 = vld [vmem:[%s6901_s1 + $0x30] sm:$0xff]  ;;  %v535_v9 = vld [vmem:[%s6901_s1 + $0x48] sm:$0xff]  ;;  %s7112_s25 = smov (!%p280_p3, %s3933_s25), 1  ;;  %vm1615_vm2 = vcmask 1045504   ;;  %vm3724_vm3 = vcmask 57344  }
  0x10   : > { %v534_v10 = vld [vmem:[%s6901_s1 + $0x40] sm:$0x3]  ;;  %v537_v11 = vld [vmem:[%s6901_s1 + $0x58] sm:$0x3]  ;;  %v536_v12 = vld [vmem:[%s6901_s1 + $0x50] sm:$0xff]  ;;  %s5247_s14 = smul.u32 432, %s7112_s25  ;;  %s292_s23 = scalar_lea.vmem %s6906_s6, %s7112_s25 }
  0x11   : > { %v3943_v13 = vld [vmem:[%s6904_s4 + $0x8] sm:$0xff]  ;;  %v4074_v14 = vld [vmem:[%s6904_s4 + $0x20] sm:$0xff]  ;;  %v541_v17 = vld [vmem:[%s6901_s1 + $0x78] sm:$0xff]  ;;  %s295_s28 = scalar_lea.vmem %s6907_s7, %s7112_s25 }
  0x12   : > { %4539 = vmatprep.subr.mxu1 %v3943_v13  ;;  %v539_v15 = vld [vmem:[%s6901_s1 + $0x68] sm:$0xff]  ;;  %v538_v16 = vld [vmem:[%s6901_s1 + $0x60] sm:$0xff]  ;;  %4739 = vmatprep.subr.mxu0 %v4074_v14  ;;  %v540_v18 = vld [vmem:[%s6901_s1 + $0x70] sm:$0x3]  ;;  %s5509_s17 = scalar_lea.vmem %s6900_s0, %s5247_s14 }
  0x13   : > { %602 = vperm.xlu1 %5258, %v530_v3   ;;  %587 = vperm.xlu0 %5257, %v527_v4   ;;  %v543_v19 = vld [vmem:[%s6901_s1 + $0x88] sm:$0x3]  ;;  %v542_v20 = vld [vmem:[%s6901_s1 + $0x80] sm:$0xff]  ;;  %v545_v21 = vld [vmem:[%s6901_s1 + $0x98] sm:$0xff] }
  0x14   : > { %4540 = vmatpush3.msra.mxu1 %v3943_v13  ;;  %4740 = vmatpush3.msra.mxu0 %v4074_v14  ;;  %v544_v22 = vld [vmem:[%s6901_s1 + $0x90] sm:$0xff]  ;;  %v547_v23 = vld [vmem:[%s6901_s1 + $0xa8] sm:$0xff]  ;;  %v546_v24 = vld [vmem:[%s6901_s1 + $0xa0] sm:$0x3] }
  0x15   : > { %v5394_v25 = vld [vmem:[%s6904_s4] sm:$0xff]  ;;  %v5399_v26 = vld [vmem:[%s6904_s4 + $0x28] sm:$0xff]  ;;  %v549_v27 = vld [vmem:[%s6901_s1 + $0xb8] sm:$0x3] }
  0x16   : > { %4589 = vmatprep.subr.mxu1 %v5394_v25  ;;  %4789 = vmatprep.subr.mxu0 %v5399_v26  ;;  %v548_v28 = vld [vmem:[%s6901_s1 + $0xb0] sm:$0xff]  ;;  %v551_v29 = vld [vmem:[%s6901_s1 + $0xc8] sm:$0xff]  ;;  %v550_v30 = vld [vmem:[%s6901_s1 + $0xc0] sm:$0xff] }
  0x17   : > { %607 = vperm.xlu1 %5258, %v531_v5   ;;  %592 = vperm.xlu0 %5257, %v528_v6   ;;  %v553_v31 = vld [vmem:[%s6901_s1 + $0xd8] sm:$0xff]  ;;  %v552_v32 = vld [vmem:[%s6901_s1 + $0xd0] sm:$0x3]  ;;  %v555_v33 = vld [vmem:[%s6901_s1 + $0xe8] sm:$0x3] }
  0x18   : > { %v554_v34 = vld [vmem:[%s6901_s1 + $0xe0] sm:$0xff]  ;;  %v557_v35 = vld [vmem:[%s6901_s1 + $0xf8] sm:$0xff]  ;;  %v556_v36 = vld [vmem:[%s6901_s1 + $0xf0] sm:$0xff] }
  0x19   : > { %v559_v37 = vld [vmem:[%s6901_s1 + $0x108] sm:$0xff]  ;;  %v558_v38 = vld [vmem:[%s6901_s1 + $0x100] sm:$0x3]  ;;  %v561_v39 = vld [vmem:[%s6901_s1 + $0x118] sm:$0x3] }
  0x1a   : > { %v560_v40 = vld [vmem:[%s6901_s1 + $0x110] sm:$0xff]  ;;  %v563_v41 = vld [vmem:[%s6901_s1 + $0x128] sm:$0xff]  ;;  %v562_v42 = vld [vmem:[%s6901_s1 + $0x120] sm:$0xff] }
  0x1b   : > { %617 = vperm.xlu1 %5258, %v533_v7   ;;  %612 = vperm.xlu0 %5257, %v532_v8   ;;  %v565_v43 = vld [vmem:[%s6901_s1 + $0x138] sm:$0xff]  ;;  %v564_v44 = vld [vmem:[%s6901_s1 + $0x130] sm:$0x3]  ;;  %v567_v45 = vld [vmem:[%s6901_s1 + $0x148] sm:$0x3] }
  0x1c   : > { %v566_v46 = vld [vmem:[%s6901_s1 + $0x140] sm:$0xff]  ;;  %v569_v47 = vld [vmem:[%s6901_s1 + $0x158] sm:$0xff]  ;;  %v568_v48 = vld [vmem:[%s6901_s1 + $0x150] sm:$0xff] }
  0x1d   : > { %v571_v49 = vld [vmem:[%s6901_s1 + $0x168] sm:$0xff]  ;;  %v570_v50 = vld [vmem:[%s6901_s1 + $0x160] sm:$0x3]  ;;  %v573_v51 = vld [vmem:[%s6901_s1 + $0x178] sm:$0x3] }
  0x1e   : > { %v572_v52 = vld [vmem:[%s6901_s1 + $0x170] sm:$0xff]  ;;  %v575_v53 = vld [vmem:[%s6901_s1 + $0x188] sm:$0xff]  ;;  %v574_v54 = vld [vmem:[%s6901_s1 + $0x180] sm:$0xff] }
  0x1f   : > { %627 = vperm.xlu1 %5258, %v535_v9   ;;  %622 = vperm.xlu0 %5257, %v534_v10   ;;  %v577_v55 = vld [vmem:[%s6901_s1 + $0x198] sm:$0xff]  ;;  %v576_v56 = vld [vmem:[%s6901_s1 + $0x190] sm:$0x3]  ;;  %v579_v57 = vld [vmem:[%s6901_s1 + $0x1a8] sm:$0x3] }
  0x20   : > { %v578_v58 = vld [vmem:[%s6901_s1 + $0x1a0] sm:$0xff]  ;;  %v299_v59 = vld [vmem:[%s5509_s17 + $0x18] sm:$0xff]  ;;  %v297_v63 = vld [vmem:[%s5509_s17 + $0x8] sm:$0xff] }
  0x21   : > { %v5515_v60 = vld [vmem:[%s6902_s2] ss:$0 sm:$0xff]  ;;  %v301_v5 = vld [vmem:[%s5509_s17 + $0x28] sm:$0x3]  ;;  %v298_v6 = vld [vmem:[%s5509_s17 + $0x10] sm:$0x3] }
  0x22   : > { %v296_v61 = vld [vmem:[%s5509_s17] sm:$0xff]  ;;  %v360_v0 = vmul.f32 %v5515_v60, %v299_v59  ;;  %v358_v4 = vmul.f32 %v5515_v60, %v297_v63  ;;  %v303_v13 = vld [vmem:[%s5509_s17 + $0x38] sm:$0xff]  ;;  %v302_v14 = vld [vmem:[%s5509_s17 + $0x30] sm:$0xff] }
  0x23   : > { %637 = vperm.xlu1 %5258, %v537_v11   ;;  %632 = vperm.xlu0 %5257, %v536_v12   ;;  %v300_v62 = vld [vmem:[%s5509_s17 + $0x20] sm:$0xff]  ;;  %v357_v1 = vmul.f32 %v5515_v60, %v296_v61  ;;  %v362_v11 = vmul.f32 %v5515_v60, %v301_v5  ;;  %v359_v12 = vmul.f32 %v5515_v60, %v298_v6 }
  0x24   : > { %v5525_v2 = vld [vmem:[%s6903_s3] ss:$0 sm:$0xff]  ;;  %v361_v3 = vmul.f32 %v5515_v60, %v300_v62 }
  0x25   : > { %v421_v7 = vadd.f32 %v5525_v2, %v360_v0  ;;  %v418_v8 = vadd.f32 %v5525_v2, %v357_v1  ;;  %v419_v10 = vadd.f32 %v5525_v2, %v358_v4  ;;  %v308_v59 = vld [vmem:[%s5509_s17 + $0x60] sm:$0xff] }
  0x26   : > { %v422_v9 = vadd.f32 %v5525_v2, %v361_v3  ;;  %v369_v5 = vmul.f32 %v5515_v60, %v308_v59 }
  0x27   : > { %647 = vperm.xlu1 %5258, %v539_v15   ;;  %642 = vperm.xlu0 %5257, %v538_v16   ;;  %v475_v15 = vmax.f32 %v421_v7, 0.0  ;;  %v472_v16 = vmax.f32 %v418_v8, 0.0 }
  0x2b   : > { %657 = vperm.xlu1 %5258, %v541_v17   ;;  %652 = vperm.xlu0 %5257, %v540_v18  }
  0x2f   : > { %667 = vperm.xlu1 %5258, %v543_v19   ;;  %662 = vperm.xlu0 %5257, %v542_v20   ;;  %v364_v19 = vmul.f32 %v5515_v60, %v303_v13  ;;  %v363_v20 = vmul.f32 %v5515_v60, %v302_v14 }
  0x33   : > { %677 = vperm.xlu1 %5258, %v545_v21   ;;  %672 = vperm.xlu0 %5257, %v544_v22   ;;  %v476_v21 = vmax.f32 %v422_v9, 0.0  ;;  %v473_v22 = vmax.f32 %v419_v10, 0.0  ;;  %v310_v10 = vld [vmem:[%s5509_s17 + $0x70] sm:$0x3] }
  0x37   : > { %687 = vperm.xlu1 %5258, %v547_v23   ;;  %682 = vperm.xlu0 %5257, %v546_v24   ;;  %v423_v23 = vadd.f32 %v5525_v2, %v362_v11  ;;  %v420_v24 = vadd.f32 %v5525_v2, %v359_v12 }
  0x3b   : > { %697 = vperm.xlu1 %5258, %v549_v27   ;;  %692 = vperm.xlu0 %5257, %v548_v28   ;;  %v304_v27 = vld [vmem:[%s5509_s17 + $0x40] sm:$0x3] }
  0x3f   : > { %707 = vperm.xlu1 %5258, %v551_v29   ;;  %702 = vperm.xlu0 %5257, %v550_v30   ;;  %v305_v30 = vld [vmem:[%s5509_s17 + $0x48] sm:$0xff] }
  0x43   : > { %717 = vperm.xlu1 %5258, %v553_v31   ;;  %712 = vperm.xlu0 %5257, %v552_v32   ;;  %v307_v31 = vld [vmem:[%s5509_s17 + $0x58] sm:$0x3] }
  0x47   : > { %727 = vperm.xlu1 %5258, %v555_v33   ;;  %722 = vperm.xlu0 %5257, %v554_v34   ;;  %v425_v34 = vadd.f32 %v5525_v2, %v364_v19 }
  0x4b   : > { %737 = vperm.xlu1 %5258, %v557_v35   ;;  %732 = vperm.xlu0 %5257, %v556_v36   ;;  %v424_v35 = vadd.f32 %v5525_v2, %v363_v20  ;;  %v365_v36 = vmul.f32 %v5515_v60, %v304_v27 }
  0x4f   : > { %747 = vperm.xlu1 %5258, %v559_v37   ;;  %742 = vperm.xlu0 %5257, %v558_v38  }
  0x53   : > { %757 = vperm.xlu1 %5258, %v561_v39   ;;  %752 = vperm.xlu0 %5257, %v560_v40   ;;  %v477_v39 = vmax.f32 %v423_v23, 0.0  ;;  %v474_v40 = vmax.f32 %v420_v24, 0.0  ;;  %v313_v23 = vld [vmem:[%s5509_s17 + $0x88] sm:$0x3]  ;;  %v5608_v24 = vld [vmem:[%s6904_s4 + $0x10] sm:$0xff] }
  0x57   : > { %767 = vperm.xlu1 %5258, %v563_v41   ;;  %762 = vperm.xlu0 %5257, %v562_v42   ;;  %v306_v41 = vld [vmem:[%s5509_s17 + $0x50] sm:$0xff]  ;;  %v366_v42 = vmul.f32 %v5515_v60, %v305_v30 }
  0x59   : > { %v427_v63 = vadd.f32 %v5525_v2, %v366_v42 }
  0x5b   : > { %777 = vperm.xlu1 %5258, %v565_v43   ;;  %772 = vperm.xlu0 %5257, %v564_v44   ;;  %v368_v43 = vmul.f32 %v5515_v60, %v307_v31  ;;  %v481_v13 = vmax.f32 %v427_v63, 0.0  ;;  %v316_v63 = vld [vmem:[%s5509_s17 + $0xa0] sm:$0x3] }
  0x5d   : > { %v429_v3 = vadd.f32 %v5525_v2, %v368_v43 }
  0x5f   : > { %787 = vperm.xlu1 %5258, %v567_v45   ;;  %782 = vperm.xlu0 %5257, %v566_v46   ;;  %v483_v20 = vmax.f32 %v429_v3, 0.0 }
  0x63   : > { %797 = vperm.xlu1 %5258, %v569_v47   ;;  %792 = vperm.xlu0 %5257, %v568_v48  }
  0x67   : > { %807 = vperm.xlu1 %5258, %v571_v49   ;;  %802 = vperm.xlu0 %5257, %v570_v50   ;;  %v479_v50 = vmax.f32 %v425_v34, 0.0 }
  0x6b   : > { %817 = vperm.xlu1 %5258, %v573_v51   ;;  %812 = vperm.xlu0 %5257, %v572_v52   ;;  %v478_v51 = vmax.f32 %v424_v35, 0.0  ;;  %v426_v52 = vadd.f32 %v5525_v2, %v365_v36  ;;  %v374_v36 = vmul.f32 %v5515_v60, %v313_v23 }
  0x6d   : > { %v480_v8 = vmax.f32 %v426_v52, 0.0 }
  0x6f   : > { %827 = vperm.xlu1 %5258, %v575_v53   ;;  %822 = vperm.xlu0 %5257, %v574_v54   ;;  %v367_v53 = vmul.f32 %v5515_v60, %v306_v41 }
  0x71   : > { %v428_v9 = vadd.f32 %v5525_v2, %v367_v53  ;;  %v435_v53 = vadd.f32 %v5525_v2, %v374_v36 }
  0x73   : > { %837 = vperm.xlu1 %5258, %v577_v55   ;;  %832 = vperm.xlu0 %5257, %v576_v56   ;;  %v482_v31 = vmax.f32 %v428_v9, 0.0 }
  0x77   : > { %847 = vperm.xlu1 %5258, %v579_v57   ;;  %842 = vperm.xlu0 %5257, %v578_v58   ;;  %v309_v58 = vld [vmem:[%s5509_s17 + $0x68] sm:$0xff] }
  0x78   : > { %v370_v4 = vmul.f32 %v5515_v60, %v309_v58 }
  0x8e   : > { %v598_v17 = vpop.permute.xlu1 %597  ;;  %v583_v18 = vpop.permute.xlu0 %582 }
  0x8f   : > { %v5544_v28 = vmul.f32 %v598_v17, %v475_v15  ;;  %v5546_v29 = vmul.f32 %v583_v18, %v472_v16  ;;  %v311_v16 = vld [vmem:[%s5509_s17 + $0x78] sm:$0xff]  ;;  %v5598_v17 = vld [vmem:[%s6904_s4 + $0x30] sm:$0xff] }
  0x91   : > { %6992 = vst [vmem:[#allocation2_spill] sm:$0xff] %v5544_v28  ;;  %v954_v44 = vrot.slane %v5546_v29, 1  ;;  %v959_v46 = vrot.slane %v5544_v28, 1 }
  0x92   : > { %v603_v32 = vpop.permute.xlu1 %602  ;;  %v588_v33 = vpop.permute.xlu0 %587 }
  0x93   : > { %v5553_v37 = vmul.f32 %v603_v32, %v476_v21  ;;  %v5555_v38 = vmul.f32 %v588_v33, %v473_v22  ;;  %v431_v21 = vadd.f32 %v5525_v2, %v370_v4  ;;  %v371_v22 = vmul.f32 %v5515_v60, %v310_v10  ;;  %v312_v33 = vld [vmem:[%s5509_s17 + $0x80] sm:$0xff]  ;;  %v317_v10 = vld [vmem:[%s5509_s17 + $0xa8] sm:$0xff] }
  0x94   : > { %v430_v32 = vadd.f32 %v5525_v2, %v369_v5  ;;  %v373_v42 = vmul.f32 %v5515_v60, %v312_v33  ;;  %v378_v23 = vmul.f32 %v5515_v60, %v317_v10  ;;  %v322_v10 = vld [vmem:[%s5509_s17 + $0xd0] sm:$0x3] }
  0x95   : > { %6993 = vst [vmem:[#allocation3_spill] sm:$0xff] %v5553_v37  ;;  %v955_v45 = vrot.slane %v5555_v38, 1  ;;  %v960_v47 = vrot.slane %v5553_v37, 1  ;;  %v432_v41 = vadd.f32 %v5525_v2, %v371_v22  ;;  %v318_v22 = vld [vmem:[%s5509_s17 + $0xb0] sm:$0xff] }
  0x96   : > { %v608_v48 = vpop.permute.xlu1 %607  ;;  %v593_v49 = vpop.permute.xlu0 %592  ;;  %v434_v59 = vadd.f32 %v5525_v2, %v373_v42 }
  0x97   : > { %v5566_v54 = vmul.f32 %v608_v48, %v477_v39  ;;  %v5568_v55 = vmul.f32 %v593_v49, %v474_v40  ;;  %v956_v56 = vsel %vm953_vm0, %v954_v44, %v955_v45  ;;  %v961_v57 = vsel %vm953_vm0, %v959_v46, %v960_v47  ;;  %v314_v48 = vld [vmem:[%s5509_s17 + $0x90] sm:$0xff] }
  0x98   : > { %4541 = vmatprep.mubr.msk.f32.mxu1 %vm1036_vm1, %v956_v56  ;;  %4741 = vmatprep.mubr.msk.f32.mxu0 %vm1036_vm1, %v961_v57  ;;  %v485_v40 = vmax.f32 %v431_v21, 0.0  ;;  %v484_v46 = vmax.f32 %v430_v32, 0.0  ;;  %v486_v58 = vmax.f32 %v432_v41, 0.0  ;;  %v319_v21 = vld [vmem:[%s5509_s17 + $0xb8] sm:$0x3] }
  0x99   : > { %v962_v61 = vrot.slane %v5566_v54, 1  ;;  %v957_v62 = vrot.slane %v5568_v55, 1 }
  0x9a   : > { %v618_v0 = vpop.permute.xlu1 %617  ;;  %v613_v1 = vpop.permute.xlu0 %612 }
  0x9b   : > { %v5582_v6 = vmul.f32 %v618_v0, %v479_v50  ;;  %v5584_v7 = vmul.f32 %v613_v1, %v478_v51  ;;  %v958_v11 = vsel %vm953_vm0, %v955_v45, %v957_v62  ;;  %v963_v12 = vsel %vm953_vm0, %v960_v47, %v962_v61  ;;  %v315_v47 = vld [vmem:[%s5509_s17 + $0x98] sm:$0xff] }
  0x9c   : > { %4542 = vmatmul.mubr.msk.f32.vlgmr.msra.gmra.mrb[0].mxu1 %vm1036_vm1, %v958_v11  ;;  %4742 = vmatmul.mubr.msk.f32.vlgmr.msra.gmra.mrb[0].mxu0 %vm1036_vm1, %v963_v12  ;;  %v376_v61 = vmul.f32 %v5515_v60, %v315_v47  ;;  %v375_v62 = vmul.f32 %v5515_v60, %v314_v48  ;;  %v377_v11 = vmul.f32 %v5515_v60, %v316_v63  ;;  %v321_v47 = vld [vmem:[%s5509_s17 + $0xc8] sm:$0xff]  ;;  %v320_v48 = vld [vmem:[%s5509_s17 + $0xc0] sm:$0xff] }
  0x9d   : > { %v964_v14 = vrot.slane %v5584_v7, 1  ;;  %v965_v15 = vrot.slane %v5582_v6, 1  ;;  %4544 = vmatprep.mubr.msk.f32.mxu1 %vm1036_vm1, %v961_v57  ;;  %4590 = vmatpush3.msra.mxu1 %v5394_v25  ;;  %v372_v25 = vmul.f32 %v5515_v60, %v311_v16 }
  0x9e   : > { %v628_v18 = vpop.permute.xlu1 %627  ;;  %v623_v19 = vpop.permute.xlu0 %622  ;;  %4790 = vmatpush3.msra.mxu0 %v5399_v26  ;;  %4639 = vmatprep.subr.mxu1 %v5608_v24  ;;  %v438_v33 = vadd.f32 %v5525_v2, %v377_v11 }
  0x9f   : > { %v5610_v27 = vmul.f32 %v623_v19, %v480_v8  ;;  %v5613_v30 = vsel %vm953_vm0, %v964_v14, %v965_v15  ;;  %4839 = vmatprep.subr.mxu0 %v5598_v17  ;;  %v5622_v34 = vmul.f32 %v628_v18, %v481_v13  ;;  %v433_v49 = vadd.f32 %v5525_v2, %v372_v25 }
  0xa0   : > { %6994 = vst [vmem:[#allocation4_spill] sm:$0xff] %v5613_v30  ;;  %4744 = vmatprep.mubr.msk.f32.mxu0 %vm1036_vm1, %v5613_v30  ;;  %4545 = vmatmul.mubr.msk.f32.gmra.mrb[2].mxu1 %vm1036_vm1, %v963_v12  ;;  %v489_v14 = vmax.f32 %v435_v53, 0.0  ;;  %v488_v19 = vmax.f32 %v434_v59, 0.0  ;;  %v492_v53 = vmax.f32 %v438_v33, 0.0 }
  0xa1   : > { %v967_v35 = vrot.slane %v5610_v27, 1  ;;  %4547 = vmatprep.mubr.msk.f32.mxu1 %vm1036_vm1, %v5613_v30  ;;  %v969_v51 = vrot.slane %v5622_v34, 1  ;;  %v487_v5 = vmax.f32 %v433_v49, 0.0  ;;  %v439_v49 = vadd.f32 %v5525_v2, %v378_v23 }
  0xa2   : > { %v638_v26 = vpop.permute.xlu1 %637  ;;  %v633_v39 = vpop.permute.xlu0 %632 }
  0xa3   : > { %v5632_v43 = vmul.f32 %v638_v26, %v483_v20  ;;  %v5634_v44 = vmul.f32 %v633_v39, %v482_v31  ;;  %v5637_v45 = vsel %vm953_vm0, %v965_v15, %v967_v35  ;;  %v437_v15 = vadd.f32 %v5525_v2, %v376_v61 }
  0xa4   : > { %6995 = vst [vmem:[#allocation5_spill] sm:$0xff] %v5637_v45  ;;  %4745 = vmatmul.mubr.msk.f32.gmra.mrb[2].mxu0 %vm1036_vm1, %v5637_v45  ;;  %4548 = vmatmul.mubr.msk.f32.gmra.mrb[4].mxu1 %vm1036_vm1, %v5637_v45  ;;  %v436_v20 = vadd.f32 %v5525_v2, %v375_v62  ;;  %v380_v26 = vmul.f32 %v5515_v60, %v319_v21  ;;  %v493_v11 = vmax.f32 %v439_v49, 0.0 }
  0xa5   : > { %v972_v50 = vrot.slane %v5632_v43, 1  ;;  %v970_v52 = vrot.slane %v5634_v44, 1  ;;  %v491_v36 = vmax.f32 %v437_v15, 0.0  ;;  %v379_v39 = vmul.f32 %v5515_v60, %v318_v22 }
  0xa6   : > { %v648_v56 = vpop.permute.xlu1 %647  ;;  %v643_v57 = vpop.permute.xlu0 %642  ;;  %v382_v61 = vmul.f32 %v5515_v60, %v321_v47  ;;  %v381_v62 = vmul.f32 %v5515_v60, %v320_v48  ;;  %v383_v22 = vmul.f32 %v5515_v60, %v322_v10  ;;  %v327_v47 = vld [vmem:[%s5509_s17 + $0xf8] sm:$0xff] }
  0xa7   : > { %v5654_v0 = vmul.f32 %v648_v56, %v485_v40  ;;  %v5656_v1 = vmul.f32 %v643_v57, %v484_v46  ;;  %v5659_v3 = vsel %vm953_vm0, %v969_v51, %v970_v52  ;;  %v5662_v4 = vsel %vm953_vm0, %v970_v52, %v972_v50 }
  0xa8   : > { %6996 = vst [vmem:[#allocation6_spill] sm:$0xff] %v5659_v3  ;;  %6997 = vst [vmem:[#allocation7_spill] sm:$0xff] %v5662_v4  ;;  %4550 = vmatprep.mubr.msk.f32.mxu1 %vm1036_vm1, %v5659_v3  ;;  %4747 = vmatprep.mubr.msk.f32.mxu0 %vm1036_vm1, %v5659_v3  ;;  %v490_v46 = vmax.f32 %v436_v20, 0.0  ;;  %v440_v59 = vadd.f32 %v5525_v2, %v379_v39  ;;  %v443_v21 = vadd.f32 %v5525_v2, %v382_v61 }
  0xa9   : > { %4551 = vmatmul.mubr.msk.f32.gmra.mrb[6].mxu1 %vm1036_vm1, %v5662_v4  ;;  %4748 = vmatmul.mubr.msk.f32.gmra.mrb[4].mxu0 %vm1036_vm1, %v5662_v4  ;;  %v974_v8 = vrot.slane %v5656_v1, 1  ;;  %v975_v9 = vrot.slane %v5654_v0, 1 }
  0xaa   : > { %v658_v12 = vpop.permute.xlu1 %657  ;;  %v653_v13 = vpop.permute.xlu0 %652  ;;  %v494_v33 = vmax.f32 %v440_v59, 0.0 }
  0xab   : > { %v5677_v16 = vmul.f32 %v653_v13, %v486_v58  ;;  %v5680_v18 = vsel %vm953_vm0, %v974_v8, %v975_v9  ;;  %v5690_v31 = vmul.f32 %v658_v12, %v487_v5  ;;  %v441_v58 = vadd.f32 %v5525_v2, %v380_v26 }
  0xac   : > { %6998 = vst [vmem:[#allocation8_spill] sm:$0xff] %v5680_v18  ;;  %4553 = vmatprep.mubr.msk.f32.mxu1 %vm1036_vm1, %v5680_v18  ;;  %4750 = vmatprep.mubr.msk.f32.mxu0 %vm1036_vm1, %v5680_v18 }
  0xad   : > { %v977_v32 = vrot.slane %v5677_v16, 1  ;;  %v979_v51 = vrot.slane %v5690_v31, 1  ;;  %v495_v20 = vmax.f32 %v441_v58, 0.0 }
  0xae   : > { %v668_v25 = vpop.permute.xlu1 %667  ;;  %v663_v35 = vpop.permute.xlu0 %662 }
  0xaf   : > { %v5696_v40 = vmul.f32 %v668_v25, %v489_v14  ;;  %v5698_v41 = vmul.f32 %v663_v35, %v488_v19  ;;  %v5701_v42 = vsel %vm953_vm0, %v975_v9, %v977_v32  ;;  %v323_v14 = vld [vmem:[%s5509_s17 + $0xd8] sm:$0xff]  ;;  %v442_v25 = vadd.f32 %v5525_v2, %v381_v62  ;;  %v325_v35 = vld [vmem:[%s5509_s17 + $0xe8] sm:$0x3]  ;;  %v328_v62 = vld [vmem:[%s5509_s17 + $0x100] sm:$0x3] }
  0xb0   : > { %6999 = vst [vmem:[#allocation9_spill] sm:$0xff] %v5701_v42  ;;  %4554 = vmatmul.mubr.msk.f32.gmra.mrb[8].mxu1 %vm1036_vm1, %v5701_v42  ;;  %4751 = vmatmul.mubr.msk.f32.gmra.mrb[6].mxu0 %vm1036_vm1, %v5701_v42  ;;  %v384_v26 = vmul.f32 %v5515_v60, %v323_v14 }
  0xb1   : > { %v982_v50 = vrot.slane %v5696_v40, 1  ;;  %v980_v52 = vrot.slane %v5698_v41, 1  ;;  %v496_v61 = vmax.f32 %v442_v25, 0.0  ;;  %v329_v25 = vld [vmem:[%s5509_s17 + $0x108] sm:$0xff] }
  0xb2   : > { %v678_v56 = vpop.permute.xlu1 %677  ;;  %v673_v57 = vpop.permute.xlu0 %672  ;;  %v445_v10 = vadd.f32 %v5525_v2, %v384_v26 }
  0xb3   : > { %v5717_v63 = vmul.f32 %v678_v56, %v491_v36  ;;  %v5719_v5 = vmul.f32 %v673_v57, %v490_v46  ;;  %v5722_v8 = vsel %vm953_vm0, %v979_v51, %v980_v52  ;;  %v5725_v9 = vsel %vm953_vm0, %v980_v52, %v982_v50  ;;  %v324_v36 = vld [vmem:[%s5509_s17 + $0xe0] sm:$0xff]  ;;  %v326_v56 = vld [vmem:[%s5509_s17 + $0xf0] sm:$0xff] }
  0xb4   : > { %7000 = vst [vmem:[#allocation10_spill] sm:$0xff] %v5722_v8  ;;  %7001 = vst [vmem:[#allocation11_spill] sm:$0xff] %v5725_v9  ;;  %4556 = vmatprep.mubr.msk.f32.mxu1 %vm1036_vm1, %v5722_v8  ;;  %4753 = vmatprep.mubr.msk.f32.mxu0 %vm1036_vm1, %v5722_v8  ;;  %v497_v50 = vmax.f32 %v443_v21, 0.0  ;;  %v444_v51 = vadd.f32 %v5525_v2, %v383_v22  ;;  %v386_v52 = vmul.f32 %v5515_v60, %v325_v35 }
  0xb5   : > { %4557 = vmatmul.mubr.msk.f32.gmra.mrb[10].mxu1 %vm1036_vm1, %v5725_v9  ;;  %4754 = vmatmul.mubr.msk.f32.gmra.mrb[8].mxu0 %vm1036_vm1, %v5725_v9  ;;  %v984_v12 = vrot.slane %v5719_v5, 1  ;;  %v985_v13 = vrot.slane %v5717_v63, 1  ;;  %v389_v35 = vmul.f32 %v5515_v60, %v328_v62 }
  0xb6   : > { %v688_v15 = vpop.permute.xlu1 %687  ;;  %v683_v19 = vpop.permute.xlu0 %682  ;;  %v498_v21 = vmax.f32 %v444_v51, 0.0  ;;  %v447_v22 = vadd.f32 %v5525_v2, %v386_v52 }
  0xb7   : > { %v5741_v23 = vmul.f32 %v683_v19, %v492_v53  ;;  %v5744_v32 = vsel %vm953_vm0, %v984_v12, %v985_v13  ;;  %v5754_v39 = vmul.f32 %v688_v15, %v493_v11  ;;  %v385_v53 = vmul.f32 %v5515_v60, %v324_v36 }
  0xb8   : > { %7002 = vst [vmem:[#allocation12_spill] sm:$0xff] %v5744_v32  ;;  %4559 = vmatprep.mubr.msk.f32.mxu1 %vm1036_vm1, %v5744_v32  ;;  %4756 = vmatprep.mubr.msk.f32.mxu0 %vm1036_vm1, %v5744_v32  ;;  %v388_v11 = vmul.f32 %v5515_v60, %v327_v47  ;;  %v387_v15 = vmul.f32 %v5515_v60, %v326_v56  ;;  %v334_v32 = vld [vmem:[%s5509_s17 + $0x130] sm:$0x3] }
  0xb9   : > { %v987_v46 = vrot.slane %v5741_v23, 1  ;;  %v989_v14 = vrot.slane %v5754_v39, 1  ;;  %v395_v8 = vmul.f32 %v5515_v60, %v334_v32 }
  0xba   : > { %v698_v48 = vpop.permute.xlu1 %697  ;;  %v693_v49 = vpop.permute.xlu0 %692  ;;  %v449_v51 = vadd.f32 %v5525_v2, %v388_v11  ;;  %v448_v56 = vadd.f32 %v5525_v2, %v387_v15  ;;  %v5810_v11 = vadd.f32 %v5525_v2, %v389_v35  ;;  %v1622_v15 = vrot.slane %v5553_v37, 2 }
  0xbb   : > { %v5762_v57 = vmul.f32 %v698_v48, %v495_v20  ;;  %v5764_v58 = vmul.f32 %v693_v49, %v494_v33  ;;  %v5767_v59 = vsel %vm953_vm0, %v985_v13, %v987_v46  ;;  %v446_v33 = vadd.f32 %v5525_v2, %v385_v53  ;;  %v331_v48 = vld [vmem:[%s5509_s17 + $0x118] sm:$0x3] }
  0xbc   : > { %7003 = vst [vmem:[#allocation13_spill] sm:$0xff] %v5767_v59  ;;  %4560 = vmatmul.mubr.msk.f32.gmra.mrb[12].mxu1 %vm1036_vm1, %v5767_v59  ;;  %4757 = vmatmul.mubr.msk.f32.gmra.mrb[10].mxu0 %vm1036_vm1, %v5767_v59  ;;  %v499_v49 = vmax.f32 %v445_v10, 0.0  ;;  %v501_v10 = vmax.f32 %v447_v22, 0.0  ;;  %v503_v22 = vmax.f32 %v449_v51, 0.0  ;;  %v332_v51 = vld [vmem:[%s5509_s17 + $0x120] sm:$0xff] }
  0xbd   : > { %v992_v12 = vrot.slane %v5762_v57, 1  ;;  %v990_v13 = vrot.slane %v5764_v58, 1 }
  0xbe   : > { %v708_v19 = vpop.permute.xlu1 %707  ;;  %v703_v20 = vpop.permute.xlu0 %702 }
  0xbf   : > { %v5784_v36 = vmul.f32 %v708_v19, %v497_v50  ;;  %v5786_v26 = vmul.f32 %v703_v20, %v496_v61  ;;  %v5789_v46 = vsel %vm953_vm0, %v989_v14, %v990_v13  ;;  %v5792_v47 = vsel %vm953_vm0, %v990_v13, %v992_v12  ;;  %v330_v50 = vld [vmem:[%s5509_s17 + $0x110] sm:$0xff] }
  0xc0   : > { %7004 = vst [vmem:[#allocation14_spill] sm:$0xff] %v5789_v46  ;;  %7005 = vst [vmem:[#allocation15_spill] sm:$0xff] %v5792_v47  ;;  %4562 = vmatprep.mubr.msk.f32.mxu1 %vm1036_vm1, %v5789_v46  ;;  %4759 = vmatprep.mubr.msk.f32.mxu0 %vm1036_vm1, %v5789_v46  ;;  %v390_v61 = vmul.f32 %v5515_v60, %v329_v25  ;;  %v392_v14 = vmul.f32 %v5515_v60, %v331_v48  ;;  %v500_v20 = vmax.f32 %v446_v33, 0.0  ;;  %v333_v48 = vld [vmem:[%s5509_s17 + $0x128] sm:$0xff] }
  0xc1   : > { %4563 = vmatmul.mubr.msk.f32.gmra.mrb[14].mxu1 %vm1036_vm1, %v5792_v47  ;;  %4760 = vmatmul.mubr.msk.f32.gmra.mrb[12].mxu0 %vm1036_vm1, %v5792_v47  ;;  %v994_v52 = vrot.slane %v5786_v26, 1  ;;  %v995_v53 = vrot.slane %v5784_v36, 1  ;;  %v391_v47 = vmul.f32 %v5515_v60, %v330_v50  ;;  %v502_v33 = vmax.f32 %v448_v56, 0.0 }
  0xc2   : > { %v718_v62 = vpop.permute.xlu1 %717  ;;  %v713_v12 = vpop.permute.xlu0 %712  ;;  %v5828_v35 = vadd.f32 %v5525_v2, %v390_v61  ;;  %v1624_v50 = vrot.slane %v5566_v54, 2  ;;  %v1621_v46 = vrot.slane %v5544_v28, 2  ;;  %v335_v54 = vld [vmem:[%s5509_s17 + $0x138] sm:$0xff] }
  0xc3   : > { %v5813_v13 = vmul.f32 %v713_v12, %v498_v21  ;;  %v5816_v19 = vsel %vm953_vm0, %v994_v52, %v995_v53  ;;  %v5824_v25 = vmul.f32 %v718_v62, %v499_v49  ;;  %v5835_v49 = vadd.f32 %v5525_v2, %v392_v14 }
  0xc4   : > { %7006 = vst [vmem:[#allocation16_spill] sm:$0xff] %v5816_v19  ;;  %4565 = vmatprep.mubr.msk.f32.mxu1 %vm1036_vm1, %v5816_v19  ;;  %4762 = vmatprep.mubr.msk.f32.mxu0 %vm1036_vm1, %v5816_v19  ;;  %v504_v19 = vmax.f32 %v5810_v11, 0.0  ;;  %v5846_v61 = vadd.f32 %v5525_v2, %v391_v47  ;;  %v5855_v11 = vsel %vm1615_vm2, %v1621_v46, %v1622_v15  ;;  %v1627_v14 = vrot.slane %v5582_v6, 2 }
  0xc5   : > { %v997_v21 = vrot.slane %v5813_v13, 1  ;;  %v5867_v46 = vsel %vm1615_vm2, %v1622_v15, %v1624_v50  ;;  %v505_v32 = vmax.f32 %v5828_v35, 0.0  ;;  %v507_v15 = vmax.f32 %v5835_v49, 0.0 }
  0xc6   : > { %v728_v52 = vpop.permute.xlu1 %727  ;;  %v723_v12 = vpop.permute.xlu0 %722  ;;  %7008 = vst [vmem:[#allocation18_spill] sm:$0xff] %v5867_v46 }
  0xc7   : > { %v5838_v62 = vmul.f32 %v728_v52, %v501_v10  ;;  %v5840_v59 = vmul.f32 %v723_v12, %v500_v20  ;;  %v5843_v56 = vsel %vm953_vm0, %v995_v53, %v997_v21  ;;  %v1626_v10 = vrot.slane %v5584_v7, 2 }
  0xc8   : > { %7007 = vst [vmem:[#allocation17_spill] sm:$0xff] %v5843_v56  ;;  %4566 = vmatmul.mubr.msk.f32.gmra.mrb[16].mxu1 %vm1036_vm1, %v5843_v56  ;;  %4763 = vmatmul.mubr.msk.f32.gmra.mrb[14].mxu0 %vm1036_vm1, %v5843_v56  ;;  %v394_v53 = vmul.f32 %v5515_v60, %v333_v48  ;;  %v999_v20 = vrot.slane %v5824_v25, 1  ;;  %v393_v52 = vmul.f32 %v5515_v60, %v332_v51  ;;  %v1629_v12 = vrot.slane %v5610_v27, 2 }
  0xc9   : > { %v1002_v47 = vrot.slane %v5838_v62, 1  ;;  %4791 = vmatprep.mubr.msk.f32.mxu0 %vm1036_vm1, %v5855_v11  ;;  %v1000_v21 = vrot.slane %v5840_v59, 1  ;;  %v396_v48 = vmul.f32 %v5515_v60, %v335_v54  ;;  %v5887_v27 = vsel %vm1615_vm2, %v1626_v10, %v1627_v14 }
  0xca   : > { %v738_v56 = vpop.permute.xlu1 %737  ;;  %v733_v9 = vpop.permute.xlu0 %732  ;;  %7011 = vst [vmem:[#allocation21_spill] sm:$0xff] %v5887_v27  ;;  %v455_v50 = vadd.f32 %v5525_v2, %v394_v53  ;;  %v454_v49 = vadd.f32 %v5525_v2, %v393_v52  ;;  %v5922_v3 = vsel %vm1615_vm2, %v1627_v14, %v1629_v12 }
  0xcb   : > { %v5872_v42 = vmul.f32 %v738_v56, %v503_v22  ;;  %v5874_v18 = vmul.f32 %v733_v9, %v502_v33  ;;  %v5877_v4 = vsel %vm953_vm0, %v999_v20, %v1000_v21  ;;  %v5880_v51 = vsel %vm953_vm0, %v1000_v21, %v1002_v47  ;;  %v5895_v22 = vld [vmem:[%s6904_s4 + $0x38] sm:$0xff]  ;;  %v337_v56 = vld [vmem:[%s5509_s17 + $0x148] sm:$0x3]  ;;  %7013 = vst [vmem:[#allocation23_spill] sm:$0xff] %v5922_v3 }
  0xcc   : > { %7009 = vst [vmem:[#allocation19_spill] sm:$0xff] %v5877_v4  ;;  %7010 = vst [vmem:[#allocation20_spill] sm:$0xff] %v5880_v51  ;;  %4568 = vmatprep.mubr.msk.f32.mxu1 %vm1036_vm1, %v5877_v4  ;;  %4792 = vmatmul.mubr.msk.f32.vlgmr.msra.gmra.mrb[0].mxu0 %vm1036_vm1, %v5867_v46  ;;  %v1632_v9 = vrot.slane %v5634_v44, 2  ;;  %v1631_v47 = vrot.slane %v5622_v34, 2  ;;  %v506_v20 = vmax.f32 %v5846_v61, 0.0  ;;  %v5910_v21 = vadd.f32 %v5525_v2, %v396_v48  ;;  %v336_v61 = vld [vmem:[%s5509_s17 + $0x140] sm:$0xff] }
  0xcd   : > { %4569 = vmatmul.mubr.msk.f32.gmra.mrb[18].mxu1 %vm1036_vm1, %v5880_v51  ;;  %4794 = vmatprep.mubr.msk.f32.mxu0 %vm1036_vm1, %v5887_v27  ;;  %v1004_v33 = vrot.slane %v5874_v18, 1  ;;  %v1005_v35 = vrot.slane %v5872_v42, 1  ;;  %v5913_v51 = vadd.f32 %v5525_v2, %v395_v8  ;;  %v1634_v4 = vrot.slane %v5632_v43, 2  ;;  %v342_v46 = vld [vmem:[%s5509_s17 + $0x170] sm:$0xff] }
  0xce   : > { %v748_v54 = vpop.permute.xlu1 %747  ;;  %v743_v10 = vpop.permute.xlu0 %742  ;;  %4840 = vmatpush3.msra.mxu0 %v5598_v17  ;;  %v5931_v17 = vsel %vm1615_vm2, %v1631_v47, %v1632_v9  ;;  %v1636_v43 = vrot.slane %v5656_v1, 2  ;;  %v1637_v8 = vrot.slane %v5654_v0, 2  ;;  %v509_v48 = vmax.f32 %v455_v50, 0.0 }
  0xcf   : > { %v5916_v53 = vmul.f32 %v743_v10, %v504_v19  ;;  %v5919_v52 = vsel %vm953_vm0, %v1004_v33, %v1005_v35  ;;  %4889 = vmatprep.subr.mxu0 %v5895_v22  ;;  %7014 = vst [vmem:[#allocation24_spill] sm:$0xff] %v5931_v17  ;;  %v398_v19 = vmul.f32 %v5515_v60, %v337_v56  ;;  %v508_v33 = vmax.f32 %v454_v49, 0.0  ;;  %v339_v10 = vld [vmem:[%s5509_s17 + $0x158] sm:$0xff] }
  0xd0   : > { %7012 = vst [vmem:[#allocation22_spill] sm:$0xff] %v5919_v52  ;;  %4571 = vmatprep.mubr.msk.f32.mxu1 %vm1036_vm1, %v5919_v52  ;;  %4795 = vmatmul.mubr.msk.f32.gmra.mrb[2].mxu0 %vm1036_vm1, %v5922_v3  ;;  %v5936_v14 = vmul.f32 %v748_v54, %v505_v32  ;;  %v1639_v47 = vrot.slane %v5677_v16, 2  ;;  %v511_v30 = vmax.f32 %v5910_v21, 0.0  ;;  %v510_v3 = vmax.f32 %v5913_v51, 0.0  ;;  %v338_v32 = vld [vmem:[%s5509_s17 + $0x150] sm:$0xff] }
  0xd1   : > { %v1007_v12 = vrot.slane %v5916_v53, 1  ;;  %4797 = vmatprep.mubr.msk.f32.mxu0 %vm1036_vm1, %v5931_v17  ;;  %v397_v56 = vmul.f32 %v5515_v60, %v336_v61  ;;  %v5955_v50 = vsel %vm1615_vm2, %v1632_v9, %v1634_v4  ;;  %v5962_v16 = vsel %vm1615_vm2, %v1636_v43, %v1637_v8 }
  0xd2   : > { %v758_v52 = vpop.permute.xlu1 %757  ;;  %v753_v45 = vpop.permute.xlu0 %752  ;;  %7016 = vst [vmem:[#allocation26_spill] sm:$0xff] %v5955_v50  ;;  %7017 = vst [vmem:[#allocation27_spill] sm:$0xff] %v5962_v16  ;;  %v1642_v51 = vrot.slane %v5698_v41, 2  ;;  %v1009_v4 = vrot.slane %v5936_v14, 1  ;;  %v399_v49 = vmul.f32 %v5515_v60, %v338_v32  ;;  %v5975_v61 = vsel %vm1615_vm2, %v1637_v8, %v1639_v47 }
  0xd3   : > { %v5947_v54 = vmul.f32 %v758_v52, %v507_v15  ;;  %v5949_v27 = vmul.f32 %v753_v45, %v506_v20  ;;  %v5952_v17 = vsel %vm953_vm0, %v1005_v35, %v1007_v12  ;;  %v459_v45 = vadd.f32 %v5525_v2, %v398_v19  ;;  %7018 = vst [vmem:[#allocation28_spill] sm:$0xff] %v5975_v61  ;;  %v340_v12 = vld [vmem:[%s5509_s17 + $0x160] sm:$0x3] }
  0xd4   : > { %7015 = vst [vmem:[#allocation25_spill] sm:$0xff] %v5952_v17  ;;  %4572 = vmatmul.mubr.msk.f32.gmra.mrb[20].mxu1 %vm1036_vm1, %v5952_v17  ;;  %4798 = vmatmul.mubr.msk.f32.gmra.mrb[4].mxu0 %vm1036_vm1, %v5955_v50  ;;  %v400_v15 = vmul.f32 %v5515_v60, %v339_v10  ;;  %v1644_v20 = vrot.slane %v5696_v40, 2  ;;  %v1641_v43 = vrot.slane %v5690_v31, 2  ;;  %v458_v19 = vadd.f32 %v5525_v2, %v397_v56  ;;  %v343_v50 = vld [vmem:[%s5509_s17 + $0x178] sm:$0x3] }
  0xd5   : > { %v1012_v35 = vrot.slane %v5947_v54, 1  ;;  %4800 = vmatprep.mubr.msk.f32.mxu0 %vm1036_vm1, %v5962_v16  ;;  %v1010_v9 = vrot.slane %v5949_v27, 1 }
  0xd6   : > { %v768_v21 = vpop.permute.xlu1 %767  ;;  %v763_v52 = vpop.permute.xlu0 %762  ;;  %v5995_v8 = vsel %vm1615_vm2, %v1641_v43, %v1642_v51  ;;  %v461_v47 = vadd.f32 %v5525_v2, %v400_v15  ;;  %v513_v15 = vmax.f32 %v459_v45, 0.0  ;;  %v512_v43 = vmax.f32 %v458_v19, 0.0 }
  0xd7   : > { %v5980_v10 = vmul.f32 %v768_v21, %v509_v48  ;;  %v5982_v17 = vmul.f32 %v763_v52, %v508_v33  ;;  %v5985_v16 = vsel %vm953_vm0, %v1009_v4, %v1010_v9  ;;  %v5988_v40 = vsel %vm953_vm0, %v1010_v9, %v1012_v35  ;;  %7021 = vst [vmem:[#allocation31_spill] sm:$0xff] %v5995_v8  ;;  %v341_v4 = vld [vmem:[%s5509_s17 + $0x168] sm:$0xff] }
  0xd8   : > { %7019 = vst [vmem:[#allocation29_spill] sm:$0xff] %v5985_v16  ;;  %7020 = vst [vmem:[#allocation30_spill] sm:$0xff] %v5988_v40  ;;  %4574 = vmatprep.mubr.msk.f32.mxu1 %vm1036_vm1, %v5985_v16  ;;  %4801 = vmatmul.mubr.msk.f32.gmra.mrb[6].mxu0 %vm1036_vm1, %v5975_v61  ;;  %v1646_v48 = vrot.slane %v5719_v5, 2  ;;  %v1647_v33 = vrot.slane %v5717_v63, 2  ;;  %v460_v35 = vadd.f32 %v5525_v2, %v399_v49  ;;  %v1649_v16 = vrot.slane %v5741_v23, 2 }
  0xd9   : > { %4575 = vmatmul.mubr.msk.f32.gmra.mrb[22].mxu1 %vm1036_vm1, %v5988_v40  ;;  %4803 = vmatprep.mubr.msk.f32.mxu0 %vm1036_vm1, %v5995_v8  ;;  %v1014_v56 = vrot.slane %v5982_v17, 1  ;;  %v1015_v32 = vrot.slane %v5980_v10, 1  ;;  %v401_v9 = vmul.f32 %v5515_v60, %v340_v12  ;;  %v6016_v8 = vsel %vm1615_vm2, %v1642_v51, %v1644_v20 }
  0xda   : > { %v778_v21 = vpop.permute.xlu1 %777  ;;  %v773_v52 = vpop.permute.xlu0 %772  ;;  %7023 = vst [vmem:[#allocation33_spill] sm:$0xff] %v6016_v8  ;;  %v6025_v45 = vsel %vm1615_vm2, %v1646_v48, %v1647_v33  ;;  %v515_v23 = vmax.f32 %v461_v47, 0.0  ;;  %v402_v49 = vmul.f32 %v5515_v60, %v341_v4  ;;  %v514_v20 = vmax.f32 %v460_v35, 0.0 }
  0xdb   : > { %v6010_v40 = vmul.f32 %v773_v52, %v510_v3  ;;  %v6013_v61 = vsel %vm953_vm0, %v1014_v56, %v1015_v32  ;;  %v1652_v3 = vrot.slane %v5764_v58, 2  ;;  %v6029_v19 = vmul.f32 %v778_v21, %v511_v30 }
  0xdc   : > { %7022 = vst [vmem:[#allocation32_spill] sm:$0xff] %v6013_v61  ;;  %4577 = vmatprep.mubr.msk.f32.mxu1 %vm1036_vm1, %v6013_v61  ;;  %4804 = vmatmul.mubr.msk.f32.gmra.mrb[8].mxu0 %vm1036_vm1, %v6016_v8  ;;  %v462_v12 = vadd.f32 %v5525_v2, %v401_v9  ;;  %v1654_v56 = vrot.slane %v5762_v57, 2  ;;  %v1651_v61 = vrot.slane %v5754_v39, 2  ;;  %v404_v47 = vmul.f32 %v5515_v60, %v343_v50 }
  0xdd   : > { %v1017_v51 = vrot.slane %v6010_v40, 1  ;;  %4806 = vmatprep.mubr.msk.f32.mxu0 %vm1036_vm1, %v6025_v45  ;;  %v403_v4 = vmul.f32 %v5515_v60, %v342_v46  ;;  %v6047_v35 = vsel %vm1615_vm2, %v1647_v33, %v1649_v16  ;;  %v1656_v46 = vrot.slane %v5786_v26, 2 }
  0xde   : > { %v788_v52 = vpop.permute.xlu1 %787  ;;  %v783_v48 = vpop.permute.xlu0 %782  ;;  %7025 = vst [vmem:[#allocation35_spill] sm:$0xff] %v6047_v35  ;;  %v6054_v57 = vsel %vm1615_vm2, %v1651_v61, %v1652_v3  ;;  %v1657_v50 = vrot.slane %v5784_v36, 2  ;;  %v463_v9 = vadd.f32 %v5525_v2, %v402_v49  ;;  %v1019_v16 = vrot.slane %v6029_v19, 1 }
  0xdf   : > { %v6039_v30 = vmul.f32 %v788_v52, %v513_v15  ;;  %v6041_v21 = vmul.f32 %v783_v48, %v512_v43  ;;  %v6044_v8 = vsel %vm953_vm0, %v1015_v32, %v1017_v51  ;;  %7026 = vst [vmem:[#allocation36_spill] sm:$0xff] %v6054_v57  ;;  %v516_v15 = vmax.f32 %v462_v12, 0.0 }
  0xe0   : > { %7024 = vst [vmem:[#allocation34_spill] sm:$0xff] %v6044_v8  ;;  %4578 = vmatmul.mubr.msk.f32.gmra.mrb[24].mxu1 %vm1036_vm1, %v6044_v8  ;;  %4807 = vmatmul.mubr.msk.f32.gmra.mrb[10].mxu0 %vm1036_vm1, %v6047_v35  ;;  %v1659_v43 = vrot.slane %v5813_v13, 2  ;;  %v6066_v52 = vsel %vm1615_vm2, %v1652_v3, %v1654_v56  ;;  %v465_v48 = vadd.f32 %v5525_v2, %v404_v47  ;;  %v1662_v3 = vrot.slane %v5840_v59, 2 }
  0xe1   : > { %v1022_v32 = vrot.slane %v6039_v30, 1  ;;  %4809 = vmatprep.mubr.msk.f32.mxu0 %vm1036_vm1, %v6054_v57  ;;  %v1020_v33 = vrot.slane %v6041_v21, 1  ;;  %v464_v49 = vadd.f32 %v5525_v2, %v403_v4  ;;  %v6085_v13 = vsel %vm1615_vm2, %v1656_v46, %v1657_v50 }
  0xe2   : > { %v798_v61 = vpop.permute.xlu1 %797  ;;  %v793_v51 = vpop.permute.xlu0 %792  ;;  %v1664_v47 = vrot.slane %v5838_v62, 2  ;;  %v1661_v46 = vrot.slane %v5824_v25, 2 }
  0xe3   : > { %v6070_v8 = vmul.f32 %v798_v61, %v515_v23  ;;  %v6072_v35 = vmul.f32 %v793_v51, %v514_v20  ;;  %v6075_v57 = vsel %vm953_vm0, %v1019_v16, %v1020_v33  ;;  %v6078_v12 = vsel %vm953_vm0, %v1020_v33, %v1022_v32 }
  0xe4   : > { %7027 = vst [vmem:[#allocation37_spill] sm:$0xff] %v6075_v57  ;;  %7028 = vst [vmem:[#allocation38_spill] sm:$0xff] %v6078_v12  ;;  %4580 = vmatprep.mubr.msk.f32.mxu1 %vm1036_vm1, %v6075_v57  ;;  %4810 = vmatmul.mubr.msk.f32.gmra.mrb[12].mxu0 %vm1036_vm1, %v6066_v52  ;;  %v517_v23 = vmax.f32 %v463_v9, 0.0  ;;  %v519_v16 = vmax.f32 %v465_v48, 0.0  ;;  %v6102_v51 = vsel %vm1615_vm2, %v1657_v50, %v1659_v43  ;;  %v518_v9 = vmax.f32 %v464_v49, 0.0 }
  0xe5   : > { %4581 = vmatmul.mubr.msk.f32.gmra.mrb[26].mxu1 %vm1036_vm1, %v6078_v12  ;;  %4812 = vmatprep.mubr.msk.f32.mxu0 %vm1036_vm1, %v6085_v13  ;;  %v1024_v20 = vrot.slane %v6072_v35, 1  ;;  %v1025_v56 = vrot.slane %v6070_v8, 1  ;;  %v6109_v62 = vsel %vm1615_vm2, %v1661_v46, %v1662_v3  ;;  %v1667_v48 = vrot.slane %v5872_v42, 2 }
  0xe6   : > { %v808_v4 = vpop.permute.xlu1 %807  ;;  %v803_v32 = vpop.permute.xlu0 %802  ;;  %v1669_v46 = vrot.slane %v5916_v53, 2 }
  0xe7   : > { %v6096_v33 = vmul.f32 %v803_v32, %v516_v15  ;;  %v6099_v61 = vsel %vm953_vm0, %v1024_v20, %v1025_v56  ;;  %v1666_v15 = vrot.slane %v5874_v18, 2  ;;  %v6113_v20 = vmul.f32 %v808_v4, %v517_v23  ;;  %v345_v4 = vld [vmem:[%s5509_s17 + $0x188] sm:$0xff] }
  0xe8   : > { %7029 = vst [vmem:[#allocation39_spill] sm:$0xff] %v6099_v61  ;;  %4583 = vmatprep.mubr.msk.f32.mxu1 %vm1036_vm1, %v6099_v61  ;;  %4813 = vmatmul.mubr.msk.f32.gmra.mrb[14].mxu0 %vm1036_vm1, %v6102_v51  ;;  %v6119_v32 = vsel %vm1615_vm2, %v1662_v3, %v1664_v47  ;;  %v1672_v3 = vrot.slane %v5949_v27, 2 }
  0xe9   : > { %7030 = vst [vmem:[#allocation40_spill] sm:$0xff] %v6113_v20  ;;  %v1027_v50 = vrot.slane %v6096_v33, 1  ;;  %4815 = vmatprep.mubr.msk.f32.mxu0 %vm1036_vm1, %v6109_v62  ;;  %v6135_v57 = vsel %vm1615_vm2, %v1666_v15, %v1667_v48  ;;  %v1029_v47 = vrot.slane %v6113_v20, 1  ;;  %v1674_v15 = vrot.slane %v5947_v54, 2  ;;  %v346_v54 = vld [vmem:[%s5509_s17 + $0x190] sm:$0x3] }
  0xea   : > { %v818_v43 = vpop.permute.xlu1 %817  ;;  %v813_v49 = vpop.permute.xlu0 %812  ;;  %7033 = vst [vmem:[#allocation43_spill] sm:$0xff] %v6135_v57 }
  0xeb   : > { %v6122_v61 = vmul.f32 %v818_v43, %v519_v16  ;;  %v6124_v12 = vmul.f32 %v813_v49, %v518_v9  ;;  %v6127_v23 = vsel %vm953_vm0, %v1025_v56, %v1027_v50  ;;  %v344_v56 = vld [vmem:[%s5509_s17 + $0x180] sm:$0xff]  ;;  %v406_v9 = vmul.f32 %v5515_v60, %v345_v4 }
  0xec   : > { %7032 = vst [vmem:[#allocation42_spill] sm:$0xff] %v6127_v23  ;;  %4584 = vmatmul.mubr.msk.f32.gmra.mrb[28].mxu1 %vm1036_vm1, %v6127_v23  ;;  %4816 = vmatmul.mubr.msk.f32.gmra.mrb[16].mxu0 %vm1036_vm1, %v6119_v32  ;;  %v1671_v50 = vrot.slane %v5936_v14, 2  ;;  %v6151_v49 = vsel %vm1615_vm2, %v1667_v48, %v1669_v46  ;;  %v1677_v48 = vrot.slane %v5980_v10, 2 }
  0xed   : > { %7031 = vst [vmem:[#allocation41_spill] sm:$0xff] %v6124_v12  ;;  %v1032_v53 = vrot.slane %v6122_v61, 1  ;;  %4818 = vmatprep.mubr.msk.f32.mxu0 %vm1036_vm1, %v6135_v57  ;;  %v1030_v16 = vrot.slane %v6124_v12, 1  ;;  %7035 = vst [vmem:[#allocation45_spill] sm:$0xff] %v6151_v49  ;;  %v405_v57 = vmul.f32 %v5515_v60, %v344_v56  ;;  %v1679_v60 = vrot.slane %v6010_v40, 2 }
  0xee   : > { %v6162_v4 = vsel %vm1615_vm2, %v1671_v50, %v1672_v3  ;;  %v467_v46 = vadd.f32 %v5525_v2, %v406_v9  ;;  %v1682_v40 = vrot.slane %v6041_v21, 2  ;;  %v6194_v9 = vld [vmem:[%s6904_s4 + $0x18] sm:$0xff] }
  0xef   : > { %v6148_v43 = vsel %vm953_vm0, %v1029_v47, %v1030_v16  ;;  %v6154_v23 = vsel %vm953_vm0, %v1030_v16, %v1032_v53  ;;  %7037 = vst [vmem:[#allocation47_spill] sm:$0xff] %v6162_v4  ;;  %v1676_v47 = vrot.slane %v5982_v17, 2  ;;  %v6178_v53 = vld [vmem:[%s6902_s2] ss:$0 sm:$0xff]  ;;  %v6182_v16 = vsel %vm1615_vm2, %v1672_v3, %v1674_v15 }
  0xf0   : > { %7034 = vst [vmem:[#allocation44_spill] sm:$0xff] %v6148_v43  ;;  %7036 = vst [vmem:[#allocation46_spill] sm:$0xff] %v6154_v23  ;;  %4586 = vmatprep.mubr.msk.f32.mxu1 %vm1036_vm1, %v6148_v43  ;;  %4819 = vmatmul.mubr.msk.f32.gmra.mrb[18].mxu0 %vm1036_vm1, %v6151_v49  ;;  %v407_v56 = vmul.f32 %v6178_v53, %v346_v54  ;;  %v466_v50 = vadd.f32 %v5525_v2, %v405_v57  ;;  %v823_v2 = vpop.permute.xlu0 %822  ;;  %v1681_v57 = vrot.slane %v6029_v19, 2  ;;  %v6208_v54 = vld [vmem:[%s6903_s3] ss:$0 sm:$0xff] }
  0xf1   : > { %4587 = vmatmul.mubr.msk.f32.gmra.mrb[30].mxu1 %vm1036_vm1, %v6154_v23  ;;  %4821 = vmatprep.mubr.msk.f32.mxu0 %vm1036_vm1, %v6162_v4  ;;  %v6188_v23 = vsel %vm1615_vm2, %v1676_v47, %v1677_v48  ;;  %v1684_v3 = vrot.slane %v6039_v30, 2  ;;  %v521_v15 = vmax.f32 %v467_v46, 0.0  ;;  %v6212_v43 = vsel %vm1615_vm2, %v1677_v48, %v1679_v60 }
  0xf2   : > { %4591 = vmatprep.mubr.msk.f32.mxu1 %vm1036_vm1, %v5546_v29  ;;  %7038 = vst [vmem:[#allocation48_spill] sm:$0xff] %v6188_v23  ;;  %v468_v47 = vadd.f32 %v6208_v54, %v407_v56  ;;  %7039 = vst [vmem:[#allocation49_spill] sm:$0xff] %v6212_v43  ;;  %v1686_v30 = vrot.slane %v6072_v35, 2  ;;  %v1687_v46 = vrot.slane %v6070_v8, 2  ;;  %v1689_v48 = vrot.slane %v6096_v33, 2 }
  0xf3   : > { %v6230_v56 = vsel %vm1615_vm2, %v1682_v40, %v1684_v3  ;;  %v1691_v33 = vrot.slane %v6113_v20, 2 }
  0xf4   : > { %4822 = vmatmul.mubr.msk.f32.gmra.mrb[20].mxu0 %vm1036_vm1, %v6182_v16  ;;  %v522_v60 = vmax.f32 %v468_v47, 0.0  ;;  %7041 = vst [vmem:[#allocation51_spill] sm:$0xff] %v6230_v56 }
  0xf5   : > { %4592 = vmatmul.mubr.msk.f32.vlgmr.msra.gmra.mrb[0].mxu1 %vm1036_vm1, %v5555_v38  ;;  %4824 = vmatprep.mubr.msk.f32.mxu0 %vm1036_vm1, %v6188_v23  ;;  %v828_v23 = vpop.permute.xlu1 %827 }
  0xf6   : > { %4640 = vmatpush3.msra.mxu1 %v5608_v24  ;;  %4594 = vmatprep.mubr.msk.f32.mxu1 %vm1036_vm1, %v5544_v28  ;;  %v520_v24 = vmax.f32 %v466_v50, 0.0  ;;  %v6218_v28 = vsel %vm1615_vm2, %v1681_v57, %v1682_v40  ;;  %v6232_v50 = vmul.f32 %v828_v23, %v521_v15  ;;  %v1694_v23 = vrot.slane %v6122_v61, 2 }
  0xf7   : > { %4689 = vmatprep.subr.mxu1 %v6194_v9  ;;  %7040 = vst [vmem:[#allocation50_spill] sm:$0xff] %v6218_v28 }
  0xf8   : > { %4825 = vmatmul.mubr.msk.f32.gmra.mrb[22].mxu0 %vm1036_vm1, %v6212_v43  ;;  %v6234_v57 = vmul.f32 %v823_v2, %v520_v24  ;;  %v833_v43 = vpop.permute.xlu0 %832  ;;  %v6253_v2 = vsel %vm1615_vm2, %v1687_v46, %v1689_v48  ;;  %v2554_v47 = vrot.slane %v6232_v50, 2  ;;  %v1619_v48 = vrot.slane %v5568_v55, 2  ;;  %v348_v55 = vld [vmem:[%s5509_s17 + $0x1a0] sm:$0xff] }
  0xf9   : > { %4595 = vmatmul.mubr.msk.f32.gmra.mrb[2].mxu1 %vm1036_vm1, %v5553_v37  ;;  %4827 = vmatprep.mubr.msk.f32.mxu0 %vm1036_vm1, %v6218_v28  ;;  %v6239_v37 = vsel %vm1615_vm2, %v1686_v30, %v1687_v46  ;;  %v1692_v28 = vrot.slane %v6124_v12, 2  ;;  %v6250_v40 = vmul.f32 %v833_v43, %v522_v60  ;;  %7043 = vst [vmem:[#allocation53_spill] sm:$0xff] %v6253_v2  ;;  %v1616_v46 = vrot.slane %v5546_v29, 2 }
  0xfa   : > { %4597 = vmatprep.mubr.msk.f32.mxu1 %vm1036_vm1, %v5584_v7  ;;  %7042 = vst [vmem:[#allocation52_spill] sm:$0xff] %v6239_v37  ;;  %v2553_v15 = vrot.slane %v6234_v57, 2 }
  0xfb   : > { %v6258_v3 = vsel %vm1615_vm2, %v1691_v33, %v1692_v28  ;;  %v2556_v61 = vrot.slane %v6250_v40, 2  ;;  %v6270_v43 = vsel %vm1615_vm2, %v1692_v28, %v1694_v23  ;;  %v6299_v28 = vld [vmem:[%s6904_s4 + $0x40] sm:$0xff]  ;;  %v347_v33 = vld [vmem:[%s5509_s17 + $0x198] sm:$0xff] }
  0xfc   : > { %4828 = vmatmul.mubr.msk.f32.gmra.mrb[24].mxu0 %vm1036_vm1, %v6230_v56  ;;  %7044 = vst [vmem:[#allocation54_spill] sm:$0xff] %v6258_v3  ;;  %7045 = vst [vmem:[#allocation55_spill] sm:$0xff] %v6270_v43  ;;  %v6275_v24 = vsel %vm1615_vm2, %v2553_v15, %v2554_v47  ;;  %v408_v29 = vmul.f32 %v6178_v53, %v347_v33  ;;  %v6399_v23 = vld [vmem:[%s6904_s4 + $0x20] sm:$0xff] }
  0xfd   : > { %4598 = vmatmul.mubr.msk.f32.gmra.mrb[4].mxu1 %vm1036_vm1, %v5582_v6  ;;  %4830 = vmatprep.mubr.msk.f32.mxu0 %vm1036_vm1, %v6239_v37  ;;  %7046 = vst [vmem:[#allocation56_spill] sm:$0xff] %v6275_v24  ;;  %v6284_v30 = vsel %vm1615_vm2, %v2554_v47, %v2556_v61  ;;  %v7048_v15 = vld [vmem:[#allocation18_spill] sm:$0xff]  ;;  %v7050_v61 = vld [vmem:[#allocation23_spill] sm:$0xff] }
  0xfe   : > { %4600 = vmatprep.mubr.msk.f32.mxu1 %vm1036_vm1, %v5622_v34  ;;  %7047 = vst [vmem:[#allocation57_spill] sm:$0xff] %v6284_v30  ;;  %v469_v47 = vadd.f32 %v6208_v54, %v408_v29  ;;  %v7053_v29 = vld [vmem:[#allocation27_spill] sm:$0xff] }
 0x100   : > { %4831 = vmatmul.mubr.msk.f32.gmra.mrb[26].mxu0 %vm1036_vm1, %v6253_v2 }
 0x101   : > { %4601 = vmatmul.mubr.msk.f32.gmra.mrb[6].mxu1 %vm1036_vm1, %v5634_v44  ;;  %4833 = vmatprep.mubr.msk.f32.mxu0 %vm1036_vm1, %v6258_v3 }
 0x102   : > { %4603 = vmatprep.mubr.msk.f32.mxu1 %vm1036_vm1, %v5656_v1 }
 0x104   : > { %4834 = vmatmul.mubr.msk.f32.gmra.mrb[28].mxu0 %vm1036_vm1, %v6270_v43 }
 0x105   : > { %4604 = vmatmul.mubr.msk.f32.gmra.mrb[8].mxu1 %vm1036_vm1, %v5654_v0  ;;  %4836 = vmatprep.mubr.msk.f32.mxu0 %vm1036_vm1, %v6275_v24  ;;  %v7061_v24 = vld [vmem:[#allocation36_spill] sm:$0xff] }
 0x106   : > { %4606 = vmatprep.mubr.msk.f32.mxu1 %vm1036_vm1, %v5690_v31 }
 0x108   : > { %4837 = vmatmul.mubr.msk.f32.gmra.mrb[30].mxu0 %vm1036_vm1, %v6284_v30  ;;  %v7055_v30 = vld [vmem:[#allocation31_spill] sm:$0xff] }
 0x109   : > { %4607 = vmatmul.mubr.msk.f32.gmra.mrb[10].mxu1 %vm1036_vm1, %v5698_v41  ;;  %4841 = vmatprep.mubr.msk.f32.mxu0 %vm1036_vm1, %v5584_v7 }
 0x10a   : > { %4609 = vmatprep.mubr.msk.f32.mxu1 %vm1036_vm1, %v5719_v5 }
 0x10c   : > { %4842 = vmatmul.mubr.msk.f32.vlgmr.msra.gmra.mrb[0].mxu0 %vm1036_vm1, %v5582_v6 }
 0x10d   : > { %4610 = vmatmul.mubr.msk.f32.gmra.mrb[12].mxu1 %vm1036_vm1, %v5717_v63  ;;  %4844 = vmatprep.mubr.msk.f32.mxu0 %vm1036_vm1, %v5622_v34 }
 0x10e   : > { %4612 = vmatprep.mubr.msk.f32.mxu1 %vm1036_vm1, %v5754_v39  ;;  %4890 = vmatpush3.msra.mxu0 %v5895_v22  ;;  %v1617_v22 = vrot.slane %v5555_v38, 2 }
 0x10f   : > { %4939 = vmatprep.subr.mxu0 %v6299_v28 }
 0x110   : > { %4845 = vmatmul.mubr.msk.f32.gmra.mrb[2].mxu0 %vm1036_vm1, %v5634_v44  ;;  %v1618_v38 = vsel %vm1615_vm2, %v1616_v46, %v1617_v22  ;;  %v1620_v60 = vsel %vm1615_vm2, %v1617_v22, %v1619_v48  ;;  %v7051_v46 = vld [vmem:[#allocation24_spill] sm:$0xff]  ;;  %v523_v48 = vmax.f32 %v469_v47, 0.0 }
 0x111   : > { %4613 = vmatmul.mubr.msk.f32.gmra.mrb[14].mxu1 %vm1036_vm1, %v5764_v58  ;;  %4847 = vmatprep.mubr.msk.f32.mxu0 %vm1036_vm1, %v5656_v1 }
 0x112   : > { %4615 = vmatprep.mubr.msk.f32.mxu1 %vm1036_vm1, %v5786_v26 }
 0x114   : > { %4848 = vmatmul.mubr.msk.f32.gmra.mrb[4].mxu0 %vm1036_vm1, %v5654_v0 }
 0x115   : > { %4616 = vmatmul.mubr.msk.f32.gmra.mrb[16].mxu1 %vm1036_vm1, %v5784_v36  ;;  %4850 = vmatprep.mubr.msk.f32.mxu0 %vm1036_vm1, %v5690_v31 }
 0x116   : > { %4618 = vmatprep.mubr.msk.f32.mxu1 %vm1036_vm1, %v5824_v25 }
 0x118   : > { %4851 = vmatmul.mubr.msk.f32.gmra.mrb[6].mxu0 %vm1036_vm1, %v5698_v41 }
 0x119   : > { %4619 = vmatmul.mubr.msk.f32.gmra.mrb[18].mxu1 %vm1036_vm1, %v5840_v59  ;;  %4853 = vmatprep.mubr.msk.f32.mxu0 %vm1036_vm1, %v5719_v5 }
 0x11a   : > { %4621 = vmatprep.mubr.msk.f32.mxu1 %vm1036_vm1, %v5874_v18 }
 0x11c   : > { %4854 = vmatmul.mubr.msk.f32.gmra.mrb[8].mxu0 %vm1036_vm1, %v5717_v63 }
 0x11d   : > { %4622 = vmatmul.mubr.msk.f32.gmra.mrb[20].mxu1 %vm1036_vm1, %v5872_v42  ;;  %4856 = vmatprep.mubr.msk.f32.mxu0 %vm1036_vm1, %v5754_v39 }
 0x11e   : > { %4624 = vmatprep.mubr.msk.f32.mxu1 %vm1036_vm1, %v5936_v14 }
 0x120   : > { %4857 = vmatmul.mubr.msk.f32.gmra.mrb[10].mxu0 %vm1036_vm1, %v5764_v58 }
 0x121   : > { %4625 = vmatmul.mubr.msk.f32.gmra.mrb[22].mxu1 %vm1036_vm1, %v5949_v27  ;;  %4859 = vmatprep.mubr.msk.f32.mxu0 %vm1036_vm1, %v5786_v26 }
 0x122   : > { %4627 = vmatprep.mubr.msk.f32.mxu1 %vm1036_vm1, %v5982_v17 }
 0x124   : > { %4860 = vmatmul.mubr.msk.f32.gmra.mrb[12].mxu0 %vm1036_vm1, %v5784_v36 }
 0x125   : > { %4628 = vmatmul.mubr.msk.f32.gmra.mrb[24].mxu1 %vm1036_vm1, %v5980_v10  ;;  %4862 = vmatprep.mubr.msk.f32.mxu0 %vm1036_vm1, %v5824_v25 }
 0x126   : > { %4630 = vmatprep.mubr.msk.f32.mxu1 %vm1036_vm1, %v6029_v19 }
 0x128   : > { %4863 = vmatmul.mubr.msk.f32.gmra.mrb[14].mxu0 %vm1036_vm1, %v5840_v59 }
 0x129   : > { %4631 = vmatmul.mubr.msk.f32.gmra.mrb[26].mxu1 %vm1036_vm1, %v6041_v21  ;;  %4865 = vmatprep.mubr.msk.f32.mxu0 %vm1036_vm1, %v5874_v18 }
 0x12a   : > { %4633 = vmatprep.mubr.msk.f32.mxu1 %vm1036_vm1, %v6072_v35 }
 0x12c   : > { %4866 = vmatmul.mubr.msk.f32.gmra.mrb[16].mxu0 %vm1036_vm1, %v5872_v42 }
 0x12d   : > { %4634 = vmatmul.mubr.msk.f32.gmra.mrb[28].mxu1 %vm1036_vm1, %v6070_v8  ;;  %4868 = vmatprep.mubr.msk.f32.mxu0 %vm1036_vm1, %v5936_v14 }
 0x12e   : > { %4636 = vmatprep.mubr.msk.f32.mxu1 %vm1036_vm1, %v6113_v20 }
 0x130   : > { %4869 = vmatmul.mubr.msk.f32.gmra.mrb[18].mxu0 %vm1036_vm1, %v5949_v27 }
 0x131   : > { %4637 = vmatmul.mubr.msk.f32.gmra.mrb[30].mxu1 %vm1036_vm1, %v6124_v12  ;;  %4871 = vmatprep.mubr.msk.f32.mxu0 %vm1036_vm1, %v5982_v17 }
 0x132   : > { %4641 = vmatprep.mubr.msk.f32.mxu1 %vm1036_vm1, %v1618_v38  ;;  %v838_v38 = vpop.permute.xlu1 %837 }
 0x134   : > { %4872 = vmatmul.mubr.msk.f32.gmra.mrb[20].mxu0 %vm1036_vm1, %v5980_v10 }
 0x135   : > { %4642 = vmatmul.mubr.msk.f32.vlgmr.msra.gmra.mrb[0].mxu1 %vm1036_vm1, %v1620_v60  ;;  %4874 = vmatprep.mubr.msk.f32.mxu0 %vm1036_vm1, %v6029_v19  ;;  %v7052_v60 = vld [vmem:[#allocation26_spill] sm:$0xff] }
 0x136   : > { %4690 = vmatpush3.msra.mxu1 %v6194_v9  ;;  %4644 = vmatprep.mubr.msk.f32.mxu1 %vm1036_vm1, %v5855_v11  ;;  %v409_v11 = vmul.f32 %v6178_v53, %v348_v55  ;;  %v7049_v9 = vld [vmem:[#allocation21_spill] sm:$0xff]  ;;  %v6429_v55 = vmul.f32 %v838_v38, %v523_v48  ;;  %v7057_v48 = vld [vmem:[#allocation4_spill] sm:$0xff] }
 0x137   : > { %4989 = vmatprep.subr.mxu1 %v6399_v23  ;;  %v7058_v38 = vld [vmem:[#allocation5_spill] sm:$0xff] }
 0x138   : > { %4875 = vmatmul.mubr.msk.f32.gmra.mrb[22].mxu0 %vm1036_vm1, %v6041_v21  ;;  %v470_v22 = vadd.f32 %v6208_v54, %v409_v11  ;;  %v7054_v11 = vld [vmem:[#allocation28_spill] sm:$0xff] }
 0x139   : > { %4645 = vmatmul.mubr.msk.f32.gmra.mrb[2].mxu1 %vm1036_vm1, %v7048_v15  ;;  %4877 = vmatprep.mubr.msk.f32.mxu0 %vm1036_vm1, %v6072_v35  ;;  %v843_v15 = vpop.permute.xlu0 %842 }
 0x13a   : > { %4647 = vmatprep.mubr.msk.f32.mxu1 %vm1036_vm1, %v7049_v9  ;;  %v524_v33 = vmax.f32 %v470_v22, 0.0  ;;  %v7056_v22 = vld [vmem:[#allocation33_spill] sm:$0xff] }
 0x13c   : > { %4878 = vmatmul.mubr.msk.f32.gmra.mrb[24].mxu0 %vm1036_vm1, %v6070_v8  ;;  %v6437_v47 = vmul.f32 %v843_v15, %v524_v33  ;;  %v7059_v33 = vld [vmem:[#allocation35_spill] sm:$0xff]  ;;  %v7060_v15 = vld [vmem:[#allocation6_spill] sm:$0xff] }
 0x13d   : > { %4648 = vmatmul.mubr.msk.f32.gmra.mrb[4].mxu1 %vm1036_vm1, %v7050_v61  ;;  %4880 = vmatprep.mubr.msk.f32.mxu0 %vm1036_vm1, %v6113_v20  ;;  %v7078_v20 = vld [vmem:[#allocation20_spill] sm:$0xff] }
 0x13e   : > { %4650 = vmatprep.mubr.msk.f32.mxu1 %vm1036_vm1, %v7051_v46 }
 0x140   : > { %4881 = vmatmul.mubr.msk.f32.gmra.mrb[26].mxu0 %vm1036_vm1, %v6124_v12  ;;  %v7062_v12 = vld [vmem:[#allocation7_spill] sm:$0xff] }
 0x141   : > { %4651 = vmatmul.mubr.msk.f32.gmra.mrb[6].mxu1 %vm1036_vm1, %v7052_v60  ;;  %4883 = vmatprep.mubr.msk.f32.mxu0 %vm1036_vm1, %v6234_v57 }
 0x142   : > { %4653 = vmatprep.mubr.msk.f32.mxu1 %vm1036_vm1, %v7053_v29 }
 0x144   : > { %4884 = vmatmul.mubr.msk.f32.gmra.mrb[28].mxu0 %vm1036_vm1, %v6232_v50 }
 0x145   : > { %4654 = vmatmul.mubr.msk.f32.gmra.mrb[8].mxu1 %vm1036_vm1, %v7054_v11  ;;  %4886 = vmatprep.mubr.msk.f32.mxu0 %vm1036_vm1, %v6429_v55 }
 0x146   : > { %4656 = vmatprep.mubr.msk.f32.mxu1 %vm1036_vm1, %v7055_v30 }
 0x148   : > { %4887 = vmatmul.mubr.msk.f32.gmra.mrb[30].mxu0 %vm1036_vm1, %v6437_v47 }
 0x149   : > { %4657 = vmatmul.mubr.msk.f32.gmra.mrb[10].mxu1 %vm1036_vm1, %v7056_v22  ;;  %4891 = vmatprep.mubr.msk.f32.mxu0 %vm1036_vm1, %v7057_v48  ;;  %v7063_v48 = vld [vmem:[#allocation8_spill] sm:$0xff] }
 0x14a   : > { %4659 = vmatprep.mubr.msk.f32.mxu1 %vm1036_vm1, %v6025_v45 }
 0x14c   : > { %4892 = vmatmul.mubr.msk.f32.vlgmr.msra.gmra.mrb[0].mxu0 %vm1036_vm1, %v7058_v38  ;;  %v7064_v38 = vld [vmem:[#allocation9_spill] sm:$0xff] }
 0x14d   : > { %4660 = vmatmul.mubr.msk.f32.gmra.mrb[12].mxu1 %vm1036_vm1, %v7059_v33  ;;  %4894 = vmatprep.mubr.msk.f32.mxu0 %vm1036_vm1, %v7060_v15  ;;  %v7065_v15 = vld [vmem:[#allocation10_spill] sm:$0xff] }
 0x14e   : > { %4662 = vmatprep.mubr.msk.f32.mxu1 %vm1036_vm1, %v7061_v24  ;;  %4940 = vmatpush3.msra.mxu0 %v6299_v28  ;;  %v7067_v28 = vld [vmem:[#allocation12_spill] sm:$0xff] }
 0x150   : > { %4895 = vmatmul.mubr.msk.f32.gmra.mrb[2].mxu0 %vm1036_vm1, %v7062_v12  ;;  %v7066_v12 = vld [vmem:[#allocation11_spill] sm:$0xff] }
 0x151   : > { %4663 = vmatmul.mubr.msk.f32.gmra.mrb[14].mxu1 %vm1036_vm1, %v6066_v52  ;;  %4897 = vmatprep.mubr.msk.f32.mxu0 %vm1036_vm1, %v7063_v48  ;;  %v7068_v48 = vld [vmem:[#allocation43_spill] sm:$0xff] }
 0x152   : > { %4665 = vmatprep.mubr.msk.f32.mxu1 %vm1036_vm1, %v6085_v13 }
 0x154   : > { %4898 = vmatmul.mubr.msk.f32.gmra.mrb[4].mxu0 %vm1036_vm1, %v7064_v38  ;;  %v7069_v38 = vld [vmem:[#allocation13_spill] sm:$0xff] }
 0x155   : > { %4666 = vmatmul.mubr.msk.f32.gmra.mrb[16].mxu1 %vm1036_vm1, %v6102_v51  ;;  %4900 = vmatprep.mubr.msk.f32.mxu0 %vm1036_vm1, %v7065_v15  ;;  %v7070_v15 = vld [vmem:[#allocation14_spill] sm:$0xff] }
 0x156   : > { %4668 = vmatprep.mubr.msk.f32.mxu1 %vm1036_vm1, %v6109_v62 }
 0x158   : > { %4901 = vmatmul.mubr.msk.f32.gmra.mrb[6].mxu0 %vm1036_vm1, %v7066_v12  ;;  %v7071_v12 = vld [vmem:[#allocation15_spill] sm:$0xff] }
 0x159   : > { %4669 = vmatmul.mubr.msk.f32.gmra.mrb[18].mxu1 %vm1036_vm1, %v6119_v32  ;;  %4903 = vmatprep.mubr.msk.f32.mxu0 %vm1036_vm1, %v7067_v28  ;;  %v7072_v28 = vld [vmem:[#allocation16_spill] sm:$0xff] }
 0x15a   : > { %4671 = vmatprep.mubr.msk.f32.mxu1 %vm1036_vm1, %v7068_v48 }
 0x15c   : > { %4904 = vmatmul.mubr.msk.f32.gmra.mrb[8].mxu0 %vm1036_vm1, %v7069_v38  ;;  %v7073_v38 = vld [vmem:[#allocation48_spill] sm:$0xff] }
 0x15d   : > { %4672 = vmatmul.mubr.msk.f32.gmra.mrb[20].mxu1 %vm1036_vm1, %v6151_v49  ;;  %4906 = vmatprep.mubr.msk.f32.mxu0 %vm1036_vm1, %v7070_v15  ;;  %v7074_v49 = vld [vmem:[#allocation17_spill] sm:$0xff] }
 0x15e   : > { %4674 = vmatprep.mubr.msk.f32.mxu1 %vm1036_vm1, %v6162_v4  ;;  %v7075_v15 = vld [vmem:[#allocation49_spill] sm:$0xff]  ;;  %v7076_v4 = vld [vmem:[#allocation19_spill] sm:$0xff] }
 0x160   : > { %4907 = vmatmul.mubr.msk.f32.gmra.mrb[10].mxu0 %vm1036_vm1, %v7071_v12  ;;  %v7077_v12 = vld [vmem:[#allocation50_spill] sm:$0xff] }
 0x161   : > { %4675 = vmatmul.mubr.msk.f32.gmra.mrb[22].mxu1 %vm1036_vm1, %v6182_v16  ;;  %4909 = vmatprep.mubr.msk.f32.mxu0 %vm1036_vm1, %v7072_v28  ;;  %v7079_v28 = vld [vmem:[#allocation22_spill] sm:$0xff] }
 0x162   : > { %4677 = vmatprep.mubr.msk.f32.mxu1 %vm1036_vm1, %v7073_v38 }
 0x164   : > { %4910 = vmatmul.mubr.msk.f32.gmra.mrb[12].mxu0 %vm1036_vm1, %v7074_v49  ;;  %v7080_v49 = vld [vmem:[#allocation25_spill] sm:$0xff] }
 0x165   : > { %4678 = vmatmul.mubr.msk.f32.gmra.mrb[24].mxu1 %vm1036_vm1, %v7075_v15  ;;  %4912 = vmatprep.mubr.msk.f32.mxu0 %vm1036_vm1, %v7076_v4  ;;  %v7081_v15 = vld [vmem:[#allocation29_spill] sm:$0xff] }
 0x166   : > { %4680 = vmatprep.mubr.msk.f32.mxu1 %vm1036_vm1, %v7077_v12  ;;  %v349_v12 = vld [vmem:[%s5509_s17 + $0x1a8] sm:$0x3]  ;;  %s4241_s17 = sshll.u32 %s7112_s25, 8 }
 0x167   : > { %s6743_s20 = scalar_lea.vmem %s6905_s5, %s4241_s17 }
 0x168   : > { %4913 = vmatmul.mubr.msk.f32.gmra.mrb[14].mxu0 %vm1036_vm1, %v7078_v20 }
 0x169   : > { %4681 = vmatmul.mubr.msk.f32.gmra.mrb[26].mxu1 %vm1036_vm1, %v6230_v56  ;;  %4915 = vmatprep.mubr.msk.f32.mxu0 %vm1036_vm1, %v7079_v28  ;;  %v7082_v56 = vld [vmem:[#allocation30_spill] sm:$0xff] }
 0x16a   : > { %4683 = vmatprep.mubr.msk.f32.mxu1 %vm1036_vm1, %v6239_v37  ;;  %v7083_v37 = vld [vmem:[#allocation32_spill] sm:$0xff]  ;;  %v7085_v28 = vld [vmem:[#allocation34_spill] sm:$0xff] }
 0x16c   : > { %4916 = vmatmul.mubr.msk.f32.gmra.mrb[16].mxu0 %vm1036_vm1, %v7080_v49  ;;  %v7084_v49 = vld [vmem:[#allocation2_spill] sm:$0xff] }
 0x16d   : > { %4684 = vmatmul.mubr.msk.f32.gmra.mrb[28].mxu1 %vm1036_vm1, %v6253_v2  ;;  %4918 = vmatprep.mubr.msk.f32.mxu0 %vm1036_vm1, %v7081_v15  ;;  %v410_v2 = vmul.f32 %v6178_v53, %v349_v12  ;;  %v7086_v15 = vld [vmem:[#allocation3_spill] sm:$0xff]  ;;  %v848_v12 = vpop.permute.xlu1 %847 }
 0x16e   : > { %4686 = vmatprep.mubr.msk.f32.mxu1 %vm1036_vm1, %v6258_v3  ;;  %v7087_v3 = vld [vmem:[#allocation37_spill] sm:$0xff]  ;;  %v7089_v53 = vld [vmem:[#allocation39_spill] sm:$0xff] }
 0x170   : > { %4919 = vmatmul.mubr.msk.f32.gmra.mrb[18].mxu0 %vm1036_vm1, %v7082_v56 }
 0x171   : > { %4687 = vmatmul.mubr.msk.f32.gmra.mrb[30].mxu1 %vm1036_vm1, %v6270_v43  ;;  %4921 = vmatprep.mubr.msk.f32.mxu0 %vm1036_vm1, %v7083_v37  ;;  %v471_v43 = vadd.f32 %v6208_v54, %v410_v2  ;;  %v7088_v37 = vld [vmem:[#allocation38_spill] sm:$0xff]  ;;  %v2286_v54 = vrot.slane %v6232_v50, 1  ;;  %v7091_v2 = vld [vmem:[#allocation44_spill] sm:$0xff] }
 0x172   : > { %4691 = vmatprep.mubr.msk.f32.mxu1 %vm1036_vm1, %v7084_v49  ;;  %v7092_v49 = vld [vmem:[#allocation46_spill] sm:$0xff] }
 0x174   : > { %4922 = vmatmul.mubr.msk.f32.gmra.mrb[20].mxu0 %vm1036_vm1, %v7085_v28 }
 0x175   : > { %4692 = vmatmul.mubr.msk.f32.vlgmr.msra.gmra.mrb[0].mxu1 %vm1036_vm1, %v7086_v15  ;;  %4924 = vmatprep.mubr.msk.f32.mxu0 %vm1036_vm1, %v7087_v3  ;;  %v525_v15 = vmax.f32 %v471_v43, 0.0  ;;  %v3088_v43 = vrot.slane %v6437_v47, 1 }
 0x176   : > { %4990 = vmatpush3.msra.mxu1 %v6399_v23  ;;  %4694 = vmatprep.mubr.msk.f32.mxu1 %vm1036_vm1, %v5584_v7  ;;  %v7090_v23 = vld [vmem:[#allocation42_spill] sm:$0xff]  ;;  %v2285_v7 = vrot.slane %v6234_v57, 1 }
 0x178   : > { %4925 = vmatmul.mubr.msk.f32.gmra.mrb[22].mxu0 %vm1036_vm1, %v7088_v37 }
 0x179   : > { %4695 = vmatmul.mubr.msk.f32.gmra.mrb[2].mxu1 %vm1036_vm1, %v5582_v6  ;;  %4927 = vmatprep.mubr.msk.f32.mxu0 %vm1036_vm1, %v7089_v53  ;;  %v2288_v6 = vrot.slane %v6250_v40, 1 }
 0x17a   : > { %4697 = vmatprep.mubr.msk.f32.mxu1 %vm1036_vm1, %v5622_v34  ;;  %v6561_v34 = vmul.f32 %v848_v12, %v525_v15 }
 0x17b   : > { %v6578_v40 = vsel %vm953_vm0, %v2286_v54, %v2288_v6 }
 0x17c   : > { %4928 = vmatmul.mubr.msk.f32.gmra.mrb[24].mxu0 %vm1036_vm1, %v7090_v23  ;;  %v6567_v23 = vsel %vm953_vm0, %v2285_v7, %v2286_v54 }
 0x17d   : > { %4698 = vmatmul.mubr.msk.f32.gmra.mrb[4].mxu1 %vm1036_vm1, %v5634_v44  ;;  %4930 = vmatprep.mubr.msk.f32.mxu0 %vm1036_vm1, %v7091_v2  ;;  %v3087_v44 = vrot.slane %v6429_v55, 1 }
 0x17e   : > { %4700 = vmatprep.mubr.msk.f32.mxu1 %vm1036_vm1, %v5656_v1  ;;  %v3090_v1 = vrot.slane %v6561_v34, 1 }
 0x17f   : > { %v3089_v15 = vsel %vm953_vm0, %v3087_v44, %v3088_v43 }
 0x180   : > { %4931 = vmatmul.mubr.msk.f32.gmra.mrb[26].mxu0 %vm1036_vm1, %v7092_v49 }
 0x181   : > { %4701 = vmatmul.mubr.msk.f32.gmra.mrb[6].mxu1 %vm1036_vm1, %v5654_v0  ;;  %4933 = vmatprep.mubr.msk.f32.mxu0 %vm1036_vm1, %v6567_v23  ;;  %v3091_v0 = vsel %vm953_vm0, %v3088_v43, %v3090_v1 }
 0x182   : > { %4703 = vmatprep.mubr.msk.f32.mxu1 %vm1036_vm1, %v5690_v31  ;;  %v7094_v31 = vld [vmem:[#allocation45_spill] sm:$0xff] }
 0x184   : > { %4934 = vmatmul.mubr.msk.f32.gmra.mrb[28].mxu0 %vm1036_vm1, %v6578_v40 }
 0x185   : > { %4704 = vmatmul.mubr.msk.f32.gmra.mrb[8].mxu1 %vm1036_vm1, %v5698_v41  ;;  %4936 = vmatprep.mubr.msk.f32.mxu0 %vm1036_vm1, %v3089_v15  ;;  %v7095_v41 = vld [vmem:[#allocation41_spill] sm:$0xff] }
 0x186   : > { %4706 = vmatprep.mubr.msk.f32.mxu1 %vm1036_vm1, %v5719_v5  ;;  %v7098_v5 = vld [vmem:[#allocation50_spill] sm:$0xff] }
 0x188   : > { %4937 = vmatmul.mubr.msk.f32.gmra.mrb[30].mxu0 %vm1036_vm1, %v3091_v0 }
 0x189   : > { %4707 = vmatmul.mubr.msk.f32.gmra.mrb[10].mxu1 %vm1036_vm1, %v5717_v63  ;;  %4941 = vmatprep.mubr.msk.f32.mxu0 %vm1036_vm1, %v7049_v9  ;;  %v7097_v63 = vld [vmem:[#allocation49_spill] sm:$0xff] }
 0x18a   : > { %4709 = vmatprep.mubr.msk.f32.mxu1 %vm1036_vm1, %v5754_v39  ;;  %v7099_v39 = vld [vmem:[#allocation22_spill] sm:$0xff] }
 0x18c   : > { %4942 = vmatmul.mubr.msk.f32.vlgmr.msra.gmra.mrb[0].mxu0 %vm1036_vm1, %v7050_v61 }
 0x18d   : > { %4710 = vmatmul.mubr.msk.f32.gmra.mrb[12].mxu1 %vm1036_vm1, %v5764_v58  ;;  %4944 = vmatprep.mubr.msk.f32.mxu0 %vm1036_vm1, %v7051_v46  ;;  %v7100_v58 = vld [vmem:[#allocation51_spill] sm:$0xff] }
 0x18e   : > { %4712 = vmatprep.mubr.msk.f32.mxu1 %vm1036_vm1, %v5786_v26  ;;  %v7103_v26 = vld [vmem:[#allocation29_spill] sm:$0xff] }
 0x190   : > { %4945 = vmatmul.mubr.msk.f32.gmra.mrb[2].mxu0 %vm1036_vm1, %v7052_v60 }
 0x191   : > { %4713 = vmatmul.mubr.msk.f32.gmra.mrb[14].mxu1 %vm1036_vm1, %v5784_v36  ;;  %4947 = vmatprep.mubr.msk.f32.mxu0 %vm1036_vm1, %v7053_v29  ;;  %v7102_v36 = vld [vmem:[#allocation52_spill] sm:$0xff] }
 0x192   : > { %4715 = vmatprep.mubr.msk.f32.mxu1 %vm1036_vm1, %v5824_v25  ;;  %v7104_v25 = vld [vmem:[#allocation53_spill] sm:$0xff] }
 0x194   : > { %4948 = vmatmul.mubr.msk.f32.gmra.mrb[4].mxu0 %vm1036_vm1, %v7054_v11 }
 0x195   : > { %4716 = vmatmul.mubr.msk.f32.gmra.mrb[16].mxu1 %vm1036_vm1, %v5840_v59  ;;  %4950 = vmatprep.mubr.msk.f32.mxu0 %vm1036_vm1, %v7055_v30  ;;  %v7101_v59 = vld [vmem:[#allocation25_spill] sm:$0xff] }
 0x196   : > { %4718 = vmatprep.mubr.msk.f32.mxu1 %vm1036_vm1, %v5874_v18  ;;  %v7093_v18 = vld [vmem:[#allocation40_spill] sm:$0xff] }
 0x198   : > { %4951 = vmatmul.mubr.msk.f32.gmra.mrb[6].mxu0 %vm1036_vm1, %v7056_v22 }
 0x199   : > { %4719 = vmatmul.mubr.msk.f32.gmra.mrb[18].mxu1 %vm1036_vm1, %v5872_v42  ;;  %4953 = vmatprep.mubr.msk.f32.mxu0 %vm1036_vm1, %v6025_v45  ;;  %v7096_v42 = vld [vmem:[#allocation47_spill] sm:$0xff]  ;;  %v3355_v45 = vrot.slane %v6429_v55, 2 }
 0x19a   : > { %4721 = vmatprep.mubr.msk.f32.mxu1 %vm1036_vm1, %v5936_v14  ;;  %v3356_v14 = vrot.slane %v6437_v47, 2 }
 0x19c   : > { %4954 = vmatmul.mubr.msk.f32.gmra.mrb[8].mxu0 %vm1036_vm1, %v7059_v33 }
 0x19d   : > { %4722 = vmatmul.mubr.msk.f32.gmra.mrb[20].mxu1 %vm1036_vm1, %v5949_v27  ;;  %4956 = vmatprep.mubr.msk.f32.mxu0 %vm1036_vm1, %v7061_v24  ;;  %v7105_v27 = vld [vmem:[#allocation54_spill] sm:$0xff] }
 0x19e   : > { %4724 = vmatprep.mubr.msk.f32.mxu1 %vm1036_vm1, %v5982_v17  ;;  %v7106_v17 = vld [vmem:[#allocation32_spill] sm:$0xff] }
 0x1a0   : > { %4957 = vmatmul.mubr.msk.f32.gmra.mrb[10].mxu0 %vm1036_vm1, %v6066_v52 }
 0x1a1   : > { %4725 = vmatmul.mubr.msk.f32.gmra.mrb[22].mxu1 %vm1036_vm1, %v5980_v10  ;;  %4959 = vmatprep.mubr.msk.f32.mxu0 %vm1036_vm1, %v6085_v13  ;;  %v7107_v10 = vld [vmem:[#allocation55_spill] sm:$0xff]  ;;  %v7110_v13 = vld [vmem:[#allocation42_spill] sm:$0xff] }
 0x1a2   : > { %4727 = vmatprep.mubr.msk.f32.mxu1 %vm1036_vm1, %v6029_v19  ;;  %v3358_v19 = vrot.slane %v6561_v34, 2 }
 0x1a4   : > { %4960 = vmatmul.mubr.msk.f32.gmra.mrb[12].mxu0 %vm1036_vm1, %v6102_v51  ;;  %v3359_v52 = vsel %vm1615_vm2, %v3356_v14, %v3358_v19 }
 0x1a5   : > { %4728 = vmatmul.mubr.msk.f32.gmra.mrb[24].mxu1 %vm1036_vm1, %v6041_v21  ;;  %4962 = vmatprep.mubr.msk.f32.mxu0 %vm1036_vm1, %v6109_v62  ;;  %v7109_v21 = vld [vmem:[#allocation57_spill] sm:$0xff] }
 0x1a6   : > { %4730 = vmatprep.mubr.msk.f32.mxu1 %vm1036_vm1, %v6072_v35  ;;  %v3357_v35 = vsel %vm1615_vm2, %v3355_v45, %v3356_v14 }
 0x1a8   : > { %4963 = vmatmul.mubr.msk.f32.gmra.mrb[14].mxu0 %vm1036_vm1, %v6119_v32 }
 0x1a9   : > { %4731 = vmatmul.mubr.msk.f32.gmra.mrb[26].mxu1 %vm1036_vm1, %v6070_v8  ;;  %4965 = vmatprep.mubr.msk.f32.mxu0 %vm1036_vm1, %v7068_v48  ;;  %v7108_v8 = vld [vmem:[#allocation56_spill] sm:$0xff] }
 0x1aa   : > { %4733 = vmatprep.mubr.msk.f32.mxu1 %vm1036_vm1, %v7093_v18 }
 0x1ac   : > { %4966 = vmatmul.mubr.msk.f32.gmra.mrb[16].mxu0 %vm1036_vm1, %v7094_v31 }
 0x1ad   : > { %4734 = vmatmul.mubr.msk.f32.gmra.mrb[28].mxu1 %vm1036_vm1, %v7095_v41  ;;  %4968 = vmatprep.mubr.msk.f32.mxu0 %vm1036_vm1, %v7096_v42 }
 0x1ae   : > { %4736 = vmatprep.mubr.msk.f32.mxu1 %vm1036_vm1, %v6234_v57 }
 0x1b0   : > { %4969 = vmatmul.mubr.msk.f32.gmra.mrb[18].mxu0 %vm1036_vm1, %v6182_v16 }
 0x1b1   : > { %4737 = vmatmul.mubr.msk.f32.gmra.mrb[30].mxu1 %vm1036_vm1, %v6232_v50  ;;  %4971 = vmatprep.mubr.msk.f32.mxu0 %vm1036_vm1, %v7073_v38 }
 0x1b2   : > { %4765 = vmatprep.mubr.msk.f32.mxu1 %vm1036_vm1, %v7076_v4 }
 0x1b4   : > { %4972 = vmatmul.mubr.msk.f32.gmra.mrb[20].mxu0 %vm1036_vm1, %v7097_v63 }
 0x1b5   : > { %4766 = vmatmul.mubr.msk.f32.vlgmr.msra.gmra.mrb[16].mxu1 %vm1036_vm1, %v7078_v20  ;;  %4974 = vmatprep.mubr.msk.f32.mxu0 %vm1036_vm1, %v7098_v5 }
 0x1b6   : > { %4768 = vmatprep.mubr.msk.f32.mxu1 %vm1036_vm1, %v7099_v39 }
 0x1b8   : > { %4975 = vmatmul.mubr.msk.f32.gmra.mrb[22].mxu0 %vm1036_vm1, %v7100_v58 }
 0x1b9   : > { %4769 = vmatmul.mubr.msk.f32.gmra.mrb[18].mxu1 %vm1036_vm1, %v7101_v59  ;;  %4977 = vmatprep.mubr.msk.f32.mxu0 %vm1036_vm1, %v7102_v36 }
 0x1ba   : > { %4771 = vmatprep.mubr.msk.f32.mxu1 %vm1036_vm1, %v7103_v26 }
 0x1bc   : > { %4978 = vmatmul.mubr.msk.f32.gmra.mrb[24].mxu0 %vm1036_vm1, %v7104_v25 }
 0x1bd   : > { %4772 = vmatmul.mubr.msk.f32.gmra.mrb[20].mxu1 %vm1036_vm1, %v7082_v56  ;;  %4980 = vmatprep.mubr.msk.f32.mxu0 %vm1036_vm1, %v7105_v27 }
 0x1be   : > { %4774 = vmatprep.mubr.msk.f32.mxu1 %vm1036_vm1, %v7106_v17 }
 0x1c0   : > { %4981 = vmatmul.mubr.msk.f32.gmra.mrb[26].mxu0 %vm1036_vm1, %v7107_v10 }
 0x1c1   : > { %4775 = vmatmul.mubr.msk.f32.gmra.mrb[22].mxu1 %vm1036_vm1, %v7085_v28  ;;  %4983 = vmatprep.mubr.msk.f32.mxu0 %vm1036_vm1, %v7108_v8 }
 0x1c2   : > { %4777 = vmatprep.mubr.msk.f32.mxu1 %vm1036_vm1, %v7087_v3 }
 0x1c4   : > { %4984 = vmatmul.mubr.msk.f32.gmra.mrb[28].mxu0 %vm1036_vm1, %v7109_v21 }
 0x1c5   : > { %4778 = vmatmul.mubr.msk.f32.gmra.mrb[24].mxu1 %vm1036_vm1, %v7088_v37  ;;  %4986 = vmatprep.mubr.msk.f32.mxu0 %vm1036_vm1, %v3357_v35 }
 0x1c6   : > { %4780 = vmatprep.mubr.msk.f32.mxu1 %vm1036_vm1, %v7089_v53 }
 0x1c8   : > { %4987 = vmatmul.mubr.msk.f32.gmra.mrb[30].mxu0 %vm1036_vm1, %v3359_v52 }
 0x1c9   : > { %4781 = vmatmul.mubr.msk.f32.gmra.mrb[26].mxu1 %vm1036_vm1, %v7110_v13 }
 0x1ca   : > { %4783 = vmatprep.mubr.msk.f32.mxu1 %vm1036_vm1, %v7091_v2 }
 0x1cd   : > { %4784 = vmatmul.mubr.msk.f32.gmra.mrb[28].mxu1 %vm1036_vm1, %v7092_v49 }
 0x1ce   : > { %4786 = vmatprep.mubr.msk.f32.mxu1 %vm1036_vm1, %v6567_v23 }
 0x1d1   : > { %4787 = vmatmul.mubr.msk.f32.gmra.mrb[30].mxu1 %vm1036_vm1, %v6578_v40 }
 0x248   : > { %v4693_v37 = vpop.f32.mrb[0].mxu1 }
 0x249   : > { %v2093_v51 = vpop.f32.mrb[1].mxu1 }
 0x24c   : > { %v4696_v62 = vpop.f32.mrb[2].mxu1 }
 0x24d   : > { %v2103_v20 = vpop.f32.mrb[3].mxu1 }
 0x250   : > { %v4699_v32 = vpop.f32.mrb[4].mxu1 }
 0x251   : > { %v2113_v4 = vpop.f32.mrb[5].mxu1 }
 0x254   : > { %v4702_v16 = vpop.f32.mrb[6].mxu1 }
 0x255   : > { %v2123_v56 = vpop.f32.mrb[7].mxu1 }
 0x258   : > { %v6731_v50 = vpop.f32.mrb[8].mxu1 }
 0x259   : > { %v6733_v57 = vpop.f32.mrb[9].mxu1 }
 0x25c   : > { %v6735_v3 = vpop.f32.mrb[10].mxu1 }
 0x25d   : > { %v6738_v24 = vpop.f32.mrb[11].mxu1 }
 0x25f   : > { %v4943_v30 = vpop.f32.mrb[0].mxu0 }
 0x260   : > { %v4991_v9 = vadd.f32 %v4943_v30, %v4693_v37  ;;  %v6745_v61 = vpop.f32.mrb[12].mxu1  ;;  %v3432_v46 = vpop.f32.mrb[1].mxu0 }
 0x261   : > { %v4992_v60 = vadd.f32 %v3432_v46, %v2093_v51  ;;  %v6747_v29 = vpop.f32.mrb[13].mxu1 }
 0x262   : > { %3624 = vst.msk [vmem:[%s6743_s20 + $0x8] sm:$0xff] %vm1036_vm1, %v4991_v9  ;;  %v3656_v55 = vsel %vm1036_vm1, %v4991_v9, 0.0  ;;  %v3727_v11 = vmul.f32 %v4991_v9, %v4991_v9 }
 0x263   : > { %3623 = vst.msk [vmem:[%s6743_s20] sm:$0xff] %vm1036_vm1, %v4992_v60  ;;  %v3655_v47 = vsel %vm1036_vm1, %v4992_v60, 0.0  ;;  %v3726_v22 = vmul.f32 %v4992_v60, %v4992_v60  ;;  %v4946_v33 = vpop.f32.mrb[2].mxu0 }
 0x264   : > { %v3759_v48 = vsel %vm1036_vm1, %v3727_v11, 0.0  ;;  %v3657_v38 = vadd.f32 %v3656_v55, %v3655_v47  ;;  %v4993_v28 = vadd.f32 %v4946_v33, %v4696_v62  ;;  %v6756_v53 = vpop.f32.mrb[14].mxu1  ;;  %v3442_v12 = vpop.f32.mrb[3].mxu0 }
 0x265   : > { %v3758_v23 = vsel %vm1036_vm1, %v3726_v22, 0.0  ;;  %v4994_v7 = vadd.f32 %v3442_v12, %v2103_v20  ;;  %v6759_v54 = vpop.f32.mrb[15].mxu1 }
 0x266   : > { %v3760_v2 = vadd.f32 %v3759_v48, %v3758_v23  ;;  %3626 = vst.msk [vmem:[%s6743_s20 + $0x18] sm:$0xff] %vm1036_vm1, %v4993_v28  ;;  %v3729_v6 = vmul.f32 %v4993_v28, %v4993_v28  ;;  %v3660_v15 = vsel %vm1036_vm1, %v4993_v28, 0.0 }
 0x267   : > { %3625 = vst.msk [vmem:[%s6743_s20 + $0x10] sm:$0xff] %vm1036_vm1, %v4994_v7  ;;  %v3658_v34 = vsel %vm1036_vm1, %v4994_v7, 0.0  ;;  %v3728_v43 = vmul.f32 %v4994_v7, %v4994_v7  ;;  %v4949_v49 = vpop.f32.mrb[4].mxu0 }
 0x268   : > { %v3659_v44 = vadd.f32 %v3658_v34, %v3657_v38  ;;  %v4995_v1 = vadd.f32 %v4949_v49, %v4699_v32  ;;  %v3452_v40 = vpop.f32.mrb[5].mxu0  ;;  %v3763_v42 = vsel %vm1036_vm1, %v3729_v6, 0.0 }
 0x269   : > { %v3761_v0 = vsel %vm1036_vm1, %v3728_v43, 0.0  ;;  %v4996_v18 = vadd.f32 %v3452_v40, %v2113_v4 }
 0x26a   : > { %v3762_v31 = vadd.f32 %v3761_v0, %v3760_v2  ;;  %3628 = vst.msk [vmem:[%s6743_s20 + $0x28] sm:$0xff] %vm1036_vm1, %v4995_v1  ;;  %v3661_v41 = vadd.f32 %v3660_v15, %v3659_v44  ;;  %v3731_v63 = vmul.f32 %v4995_v1, %v4995_v1  ;;  %v3664_v27 = vsel %vm1036_vm1, %v4995_v1, 0.0 }
 0x26b   : > { %3627 = vst.msk [vmem:[%s6743_s20 + $0x20] sm:$0xff] %vm1036_vm1, %v4996_v18  ;;  %v3662_v5 = vsel %vm1036_vm1, %v4996_v18, 0.0  ;;  %v3730_v39 = vmul.f32 %v4996_v18, %v4996_v18  ;;  %v4952_v58 = vpop.f32.mrb[6].mxu0 }
 0x26c   : > { %v3663_v59 = vadd.f32 %v3662_v5, %v3661_v41  ;;  %v3764_v36 = vadd.f32 %v3763_v42, %v3762_v31  ;;  %v4997_v26 = vadd.f32 %v4952_v58, %v4702_v16  ;;  %v3462_v25 = vpop.f32.mrb[7].mxu0  ;;  %v3767_v45 = vsel %vm1036_vm1, %v3731_v63, 0.0 }
 0x26d   : > { %v3765_v17 = vsel %vm1036_vm1, %v3730_v39, 0.0  ;;  %v4998_v14 = vadd.f32 %v3462_v25, %v2123_v56 }
 0x26e   : > { %v3766_v10 = vadd.f32 %v3765_v17, %v3764_v36  ;;  %3630 = vst.msk [vmem:[%s6743_s20 + $0x38] sm:$0xff] %vm1036_vm1, %v4997_v26  ;;  %v3665_v8 = vadd.f32 %v3664_v27, %v3663_v59  ;;  %v3733_v19 = vmul.f32 %v4997_v26, %v4997_v26  ;;  %v3668_v20 = vsel %vm1036_vm1, %v4997_v26, 0.0 }
 0x26f   : > { %3629 = vst.msk [vmem:[%s6743_s20 + $0x30] sm:$0xff] %vm1036_vm1, %v4998_v14  ;;  %v3666_v21 = vsel %vm1036_vm1, %v4998_v14, 0.0  ;;  %v3732_v35 = vmul.f32 %v4998_v14, %v4998_v14  ;;  %v4955_v52 = vpop.f32.mrb[8].mxu0 }
 0x270   : > { %v3667_v13 = vadd.f32 %v3666_v21, %v3665_v8  ;;  %v3768_v37 = vadd.f32 %v3767_v45, %v3766_v10  ;;  %v4999_v51 = vadd.f32 %v4955_v52, %v6731_v50  ;;  %v3472_v62 = vpop.f32.mrb[9].mxu0  ;;  %v3771_v30 = vsel %vm1036_vm1, %v3733_v19, 0.0 }
 0x271   : > { %v3769_v32 = vsel %vm1036_vm1, %v3732_v35, 0.0  ;;  %v5000_v4 = vadd.f32 %v3472_v62, %v6733_v57 }
 0x272   : > { %v3770_v16 = vadd.f32 %v3769_v32, %v3768_v37  ;;  %3632 = vst.msk [vmem:[%s6743_s20 + $0x48] sm:$0xff] %vm1036_vm1, %v4999_v51  ;;  %v3669_v56 = vadd.f32 %v3668_v20, %v3667_v13  ;;  %v3735_v9 = vmul.f32 %v4999_v51, %v4999_v51  ;;  %v3672_v22 = vsel %vm1036_vm1, %v4999_v51, 0.0 }
 0x273   : > { %3631 = vst.msk [vmem:[%s6743_s20 + $0x40] sm:$0xff] %vm1036_vm1, %v5000_v4  ;;  %v3670_v50 = vsel %vm1036_vm1, %v5000_v4, 0.0  ;;  %v3734_v46 = vmul.f32 %v5000_v4, %v5000_v4  ;;  %v4958_v60 = vpop.f32.mrb[10].mxu0 }
 0x274   : > { %v3671_v55 = vadd.f32 %v3670_v50, %v3669_v56  ;;  %v3772_v11 = vadd.f32 %v3771_v30, %v3770_v16  ;;  %v5001_v47 = vadd.f32 %v4958_v60, %v6735_v3  ;;  %v3482_v57 = vpop.f32.mrb[11].mxu0  ;;  %v3775_v12 = vsel %vm1036_vm1, %v3735_v9, 0.0 }
 0x275   : > { %v3773_v33 = vsel %vm1036_vm1, %v3734_v46, 0.0  ;;  %v5002_v48 = vadd.f32 %v3482_v57, %v6738_v24 }
 0x276   : > { %v3774_v38 = vadd.f32 %v3773_v33, %v3772_v11  ;;  %3634 = vst.msk [vmem:[%s6743_s20 + $0x58] sm:$0xff] %vm1036_vm1, %v5001_v47  ;;  %v3673_v28 = vadd.f32 %v3672_v22, %v3671_v55  ;;  %v3737_v23 = vmul.f32 %v5001_v47, %v5001_v47  ;;  %v3676_v49 = vsel %vm1036_vm1, %v5001_v47, 0.0 }
 0x277   : > { %3633 = vst.msk [vmem:[%s6743_s20 + $0x50] sm:$0xff] %vm1036_vm1, %v5002_v48  ;;  %v3674_v3 = vsel %vm1036_vm1, %v5002_v48, 0.0  ;;  %v3736_v7 = vmul.f32 %v5002_v48, %v5002_v48  ;;  %v4961_v2 = vpop.f32.mrb[12].mxu0 }
 0x278   : > { %v3675_v6 = vadd.f32 %v3674_v3, %v3673_v28  ;;  %v3776_v34 = vadd.f32 %v3775_v12, %v3774_v38  ;;  %v5003_v43 = vadd.f32 %v4961_v2, %v6745_v61  ;;  %v3492_v24 = vpop.f32.mrb[13].mxu0  ;;  %v3779_v0 = vsel %vm1036_vm1, %v3737_v23, 0.0 }
 0x279   : > { %v3777_v44 = vsel %vm1036_vm1, %v3736_v7, 0.0  ;;  %v5004_v1 = vadd.f32 %v3492_v24, %v6747_v29 }
 0x27a   : > { %v3778_v40 = vadd.f32 %v3777_v44, %v3776_v34  ;;  %3636 = vst.msk [vmem:[%s6743_s20 + $0x68] sm:$0xff] %vm1036_vm1, %v5003_v43  ;;  %v3677_v15 = vadd.f32 %v3676_v49, %v3675_v6  ;;  %v3739_v18 = vmul.f32 %v5003_v43, %v5003_v43  ;;  %v3680_v39 = vsel %vm1036_vm1, %v5003_v43, 0.0 }
 0x27b   : > { %3635 = vst.msk [vmem:[%s6743_s20 + $0x60] sm:$0xff] %vm1036_vm1, %v5004_v1  ;;  %v3678_v61 = vsel %vm1036_vm1, %v5004_v1, 0.0  ;;  %v3738_v31 = vmul.f32 %v5004_v1, %v5004_v1  ;;  %v4964_v41 = vpop.f32.mrb[14].mxu0 }
 0x27c   : > { %v3679_v42 = vadd.f32 %v3678_v61, %v3677_v15  ;;  %v3780_v63 = vadd.f32 %v3779_v0, %v3778_v40  ;;  %v5005_v5 = vadd.f32 %v4964_v41, %v6756_v53  ;;  %v3502_v29 = vpop.f32.mrb[15].mxu0  ;;  %v3783_v25 = vsel %vm1036_vm1, %v3739_v18, 0.0 }
 0x27d   : > { %v3781_v58 = vsel %vm1036_vm1, %v3738_v31, 0.0  ;;  %v5006_v59 = vadd.f32 %v3502_v29, %v6759_v54 }
 0x27e   : > { %v3782_v36 = vadd.f32 %v3781_v58, %v3780_v63  ;;  %3638 = vst.msk [vmem:[%s6743_s20 + $0x78] sm:$0xff] %vm1036_vm1, %v5005_v5  ;;  %v3681_v26 = vadd.f32 %v3680_v39, %v3679_v42  ;;  %v3741_v27 = vmul.f32 %v5005_v5, %v5005_v5  ;;  %v3684_v19 = vsel %vm1036_vm1, %v5005_v5, 0.0 }
 0x27f   : > { %3637 = vst.msk [vmem:[%s6743_s20 + $0x70] sm:$0xff] %vm1036_vm1, %v5006_v59  ;;  %v3682_v17 = vsel %vm1036_vm1, %v5006_v59, 0.0  ;;  %v3740_v14 = vmul.f32 %v5006_v59, %v5006_v59  ;;  %v4967_v53 = vpop.f32.mrb[16].mxu0 }
 0x280   : > { %v3683_v10 = vadd.f32 %v3682_v17, %v3681_v26  ;;  %v3784_v8 = vadd.f32 %v3783_v25, %v3782_v36  ;;  %v3512_v45 = vpop.f32.mrb[17].mxu0  ;;  %v3787_v52 = vsel %vm1036_vm1, %v3741_v27, 0.0 }
 0x281   : > { %v3785_v54 = vsel %vm1036_vm1, %v3740_v14, 0.0 }
 0x282   : > { %v3786_v21 = vadd.f32 %v3785_v54, %v3784_v8  ;;  %v3685_v35 = vadd.f32 %v3684_v19, %v3683_v10 }
 0x283   : > { %v4970_v13 = vpop.f32.mrb[18].mxu0 }
 0x284   : > { %v3522_v37 = vpop.f32.mrb[19].mxu0  ;;  %v3788_v51 = vadd.f32 %v3787_v52, %v3786_v21 }
 0x287   : > { %v4973_v62 = vpop.f32.mrb[20].mxu0 }
 0x288   : > { %v4767_v20 = vpop.f32.mrb[16].mxu1  ;;  %v3532_v32 = vpop.f32.mrb[21].mxu0 }
 0x289   : > { %v5007_v4 = vadd.f32 %v4967_v53, %v4767_v20  ;;  %v2442_v16 = vpop.f32.mrb[17].mxu1 }
 0x28a   : > { %v5008_v56 = vadd.f32 %v3512_v45, %v2442_v16 }
 0x28b   : > { %3640 = vst.msk [vmem:[%s6743_s20 + $0x88] sm:$0xff] %vm1036_vm1, %v5007_v4  ;;  %v4976_v30 = vpop.f32.mrb[22].mxu0  ;;  %v3743_v9 = vmul.f32 %v5007_v4, %v5007_v4  ;;  %v3688_v22 = vsel %vm1036_vm1, %v5007_v4, 0.0 }
 0x28c   : > { %3639 = vst.msk [vmem:[%s6743_s20 + $0x80] sm:$0xff] %vm1036_vm1, %v5008_v56  ;;  %v3686_v50 = vsel %vm1036_vm1, %v5008_v56, 0.0  ;;  %v3742_v46 = vmul.f32 %v5008_v56, %v5008_v56  ;;  %v4770_v60 = vpop.f32.mrb[18].mxu1  ;;  %v3542_v55 = vpop.f32.mrb[23].mxu0 }
 0x28d   : > { %v3687_v11 = vadd.f32 %v3686_v50, %v3685_v35  ;;  %v5009_v47 = vadd.f32 %v4970_v13, %v4770_v60  ;;  %v2452_v57 = vpop.f32.mrb[19].mxu1  ;;  %v3791_v23 = vsel %vm1036_vm1, %v3743_v9, 0.0 }
 0x28e   : > { %v3789_v33 = vsel %vm1036_vm1, %v3742_v46, 0.0  ;;  %v5010_v48 = vadd.f32 %v3522_v37, %v2452_v57 }
 0x28f   : > { %v3790_v38 = vadd.f32 %v3789_v33, %v3788_v51  ;;  %3642 = vst.msk [vmem:[%s6743_s20 + $0x98] sm:$0xff] %vm1036_vm1, %v5009_v47  ;;  %v3689_v28 = vadd.f32 %v3688_v22, %v3687_v11  ;;  %v4979_v12 = vpop.f32.mrb[24].mxu0  ;;  %v3745_v3 = vmul.f32 %v5009_v47, %v5009_v47  ;;  %v3692_v1 = vsel %vm1036_vm1, %v5009_v47, 0.0 }
 0x290   : > { %3641 = vst.msk [vmem:[%s6743_s20 + $0x90] sm:$0xff] %vm1036_vm1, %v5010_v48  ;;  %v3690_v7 = vsel %vm1036_vm1, %v5010_v48, 0.0  ;;  %v3744_v2 = vmul.f32 %v5010_v48, %v5010_v48  ;;  %v4773_v6 = vpop.f32.mrb[20].mxu1  ;;  %v3552_v34 = vpop.f32.mrb[25].mxu0 }
 0x291   : > { %v3691_v43 = vadd.f32 %v3690_v7, %v3689_v28  ;;  %v3792_v24 = vadd.f32 %v3791_v23, %v3790_v38  ;;  %v5011_v49 = vadd.f32 %v4973_v62, %v4773_v6  ;;  %v2462_v44 = vpop.f32.mrb[21].mxu1  ;;  %v3795_v31 = vsel %vm1036_vm1, %v3745_v3, 0.0 }
 0x292   : > { %v3793_v40 = vsel %vm1036_vm1, %v3744_v2, 0.0  ;;  %v5012_v15 = vadd.f32 %v3532_v32, %v2462_v44 }
 0x293   : > { %v3794_v0 = vadd.f32 %v3793_v40, %v3792_v24  ;;  %3644 = vst.msk [vmem:[%s6743_s20 + $0xa8] sm:$0xff] %vm1036_vm1, %v5011_v49  ;;  %v3693_v18 = vadd.f32 %v3692_v1, %v3691_v43  ;;  %v4982_v61 = vpop.f32.mrb[26].mxu0  ;;  %v3747_v41 = vmul.f32 %v5011_v49, %v5011_v49  ;;  %v3696_v26 = vsel %vm1036_vm1, %v5011_v49, 0.0 }
 0x294   : > { %3643 = vst.msk [vmem:[%s6743_s20 + $0xa0] sm:$0xff] %vm1036_vm1, %v5012_v15  ;;  %v3694_v42 = vsel %vm1036_vm1, %v5012_v15, 0.0  ;;  %v3746_v63 = vmul.f32 %v5012_v15, %v5012_v15  ;;  %v4776_v5 = vpop.f32.mrb[22].mxu1  ;;  %v3562_v29 = vpop.f32.mrb[27].mxu0 }
 0x295   : > { %v3695_v39 = vadd.f32 %v3694_v42, %v3693_v18  ;;  %v3796_v58 = vadd.f32 %v3795_v31, %v3794_v0  ;;  %v5013_v59 = vadd.f32 %v4976_v30, %v4776_v5  ;;  %v2472_v36 = vpop.f32.mrb[23].mxu1  ;;  %v3799_v10 = vsel %vm1036_vm1, %v3747_v41, 0.0 }
 0x296   : > { %v3797_v25 = vsel %vm1036_vm1, %v3746_v63, 0.0  ;;  %v5014_v27 = vadd.f32 %v3542_v55, %v2472_v36 }
 0x297   : > { %v3798_v17 = vadd.f32 %v3797_v25, %v3796_v58  ;;  %3646 = vst.msk [vmem:[%s6743_s20 + $0xb8] sm:$0xff] %vm1036_vm1, %v5013_v59  ;;  %v3697_v14 = vadd.f32 %v3696_v26, %v3695_v39  ;;  %v4985_v53 = vpop.f32.mrb[28].mxu0  ;;  %v3749_v8 = vmul.f32 %v5013_v59, %v5013_v59  ;;  %v3700_v51 = vsel %vm1036_vm1, %v5013_v59, 0.0 }
 0x298   : > { %3645 = vst.msk [vmem:[%s6743_s20 + $0xb0] sm:$0xff] %vm1036_vm1, %v5014_v27  ;;  %v3698_v45 = vsel %vm1036_vm1, %v5014_v27, 0.0  ;;  %v3748_v19 = vmul.f32 %v5014_v27, %v5014_v27  ;;  %v4779_v54 = vpop.f32.mrb[24].mxu1  ;;  %v3572_v21 = vpop.f32.mrb[29].mxu0 }
 0x299   : > { %v3699_v35 = vadd.f32 %v3698_v45, %v3697_v14  ;;  %v3800_v52 = vadd.f32 %v3799_v10, %v3798_v17  ;;  %v5015_v13 = vadd.f32 %v4979_v12, %v4779_v54  ;;  %v2482_v37 = vpop.f32.mrb[25].mxu1  ;;  %v3803_v56 = vsel %vm1036_vm1, %v3749_v8, 0.0 }
 0x29a   : > { %v3801_v62 = vsel %vm1036_vm1, %v3748_v19, 0.0  ;;  %v5016_v20 = vadd.f32 %v3552_v34, %v2482_v37 }
 0x29b   : > { %v3802_v32 = vadd.f32 %v3801_v62, %v3800_v52  ;;  %3648 = vst.msk [vmem:[%s6743_s20 + $0xc8] sm:$0xff] %vm1036_vm1, %v5015_v13  ;;  %v3701_v4 = vadd.f32 %v3700_v51, %v3699_v35  ;;  %v4988_v16 = vpop.f32.mrb[30].mxu0  ;;  %v3751_v30 = vmul.f32 %v5015_v13, %v5015_v13  ;;  %v3704_v22 = vsel %vm1036_vm1, %v5015_v13, 0.0 }
 0x29c   : > { %3647 = vst.msk [vmem:[%s6743_s20 + $0xc0] sm:$0xff] %vm1036_vm1, %v5016_v20  ;;  %v3702_v9 = vsel %vm1036_vm1, %v5016_v20, 0.0  ;;  %v3750_v50 = vmul.f32 %v5016_v20, %v5016_v20  ;;  %v4782_v46 = vpop.f32.mrb[26].mxu1  ;;  %v3582_v60 = vpop.f32.mrb[31].mxu0 }
 0x29d   : > { %v3703_v55 = vadd.f32 %v3702_v9, %v3701_v4  ;;  %v3804_v11 = vadd.f32 %v3803_v56, %v3802_v32  ;;  %v5017_v47 = vadd.f32 %v4982_v61, %v4782_v46  ;;  %v2492_v57 = vpop.f32.mrb[27].mxu1  ;;  %v3807_v12 = vsel %vm1036_vm1, %v3751_v30, 0.0 }
 0x29e   : > { %v3805_v33 = vsel %vm1036_vm1, %v3750_v50, 0.0  ;;  %v5018_v48 = vadd.f32 %v3562_v29, %v2492_v57 }
 0x29f   : > { %v3806_v38 = vadd.f32 %v3805_v33, %v3804_v11  ;;  %3650 = vst.msk [vmem:[%s6743_s20 + $0xd8] sm:$0xff] %vm1036_vm1, %v5017_v47  ;;  %v3705_v28 = vadd.f32 %v3704_v22, %v3703_v55  ;;  %v3753_v23 = vmul.f32 %v5017_v47, %v5017_v47  ;;  %v3708_v49 = vsel %vm1036_vm1, %v5017_v47, 0.0 }
 0x2a0   : > { %3649 = vst.msk [vmem:[%s6743_s20 + $0xd0] sm:$0xff] %vm1036_vm1, %v5018_v48  ;;  %v3706_v3 = vsel %vm1036_vm1, %v5018_v48, 0.0  ;;  %v3752_v7 = vmul.f32 %v5018_v48, %v5018_v48  ;;  %v4785_v2 = vpop.f32.mrb[28].mxu1 }
 0x2a1   : > { %v3707_v6 = vadd.f32 %v3706_v3, %v3705_v28  ;;  %v3808_v34 = vadd.f32 %v3807_v12, %v3806_v38  ;;  %v5019_v43 = vadd.f32 %v4985_v53, %v4785_v2  ;;  %v2502_v24 = vpop.f32.mrb[29].mxu1  ;;  %v3811_v0 = vsel %vm1036_vm1, %v3753_v23, 0.0 }
 0x2a2   : > { %v3809_v44 = vsel %vm1036_vm1, %v3752_v7, 0.0  ;;  %v5020_v1 = vadd.f32 %v3572_v21, %v2502_v24 }
 0x2a3   : > { %v3810_v40 = vadd.f32 %v3809_v44, %v3808_v34  ;;  %3652 = vst.msk [vmem:[%s6743_s20 + $0xe8] sm:$0xff] %vm1036_vm1, %v5019_v43  ;;  %v3709_v15 = vadd.f32 %v3708_v49, %v3707_v6  ;;  %v3755_v18 = vmul.f32 %v5019_v43, %v5019_v43  ;;  %v3712_v39 = vsel %vm1036_vm1, %v5019_v43, 0.0 }
 0x2a4   : > { %3651 = vst.msk [vmem:[%s6743_s20 + $0xe0] sm:$0xff] %vm1036_vm1, %v5020_v1  ;;  %v3710_v61 = vsel %vm1036_vm1, %v5020_v1, 0.0  ;;  %v3754_v31 = vmul.f32 %v5020_v1, %v5020_v1  ;;  %v4788_v41 = vpop.f32.mrb[30].mxu1 }
 0x2a5   : > { %v3711_v42 = vadd.f32 %v3710_v61, %v3709_v15  ;;  %v3812_v63 = vadd.f32 %v3811_v0, %v3810_v40  ;;  %v5021_v5 = vadd.f32 %v4988_v16, %v4788_v41  ;;  %v2512_v29 = vpop.f32.mrb[31].mxu1  ;;  %v3815_v25 = vsel %vm1036_vm1, %v3755_v18, 0.0 }
 0x2a6   : > { %v3813_v58 = vsel %vm1036_vm1, %v3754_v31, 0.0  ;;  %v5022_v59 = vadd.f32 %v3582_v60, %v2512_v29 }
 0x2a7   : > { %v3814_v36 = vadd.f32 %v3813_v58, %v3812_v63  ;;  %3654 = vst.msk [vmem:[%s6743_s20 + $0xf8] sm:$0xff] %vm1036_vm1, %v5021_v5  ;;  %v3713_v26 = vadd.f32 %v3712_v39, %v3711_v42  ;;  %v3757_v27 = vmul.f32 %v5021_v5, %v5021_v5  ;;  %v3716_v8 = vsel %vm1036_vm1, %v5021_v5, 0.0 }
 0x2a8   : > { %3653 = vst.msk [vmem:[%s6743_s20 + $0xf0] sm:$0xff] %vm1036_vm1, %v5022_v59  ;;  %v3714_v17 = vsel %vm1036_vm1, %v5022_v59, 0.0  ;;  %v3756_v14 = vmul.f32 %v5022_v59, %v5022_v59 }
 0x2a9   : > { %v3715_v53 = vadd.f32 %v3714_v17, %v3713_v26  ;;  %v3816_v10 = vadd.f32 %v3815_v25, %v3814_v36  ;;  %v3819_v21 = vsel %vm1036_vm1, %v3757_v27, 0.0 }
 0x2aa   : > { %v3817_v45 = vsel %vm1036_vm1, %v3756_v14, 0.0 }
 0x2ab   : > { %v3717_v19 = vadd.f32 %v3716_v8, %v3715_v53  ;;  %v3818_v54 = vadd.f32 %v3817_v45, %v3816_v10 }
 0x2ad   : > { %v3718_v35 = vrot.slane %v3717_v19, 4  ;;  %v3820_v52 = vadd.f32 %v3819_v21, %v3818_v54 }
 0x2af   : > { %v3719_v13 = vadd.f32 %v3718_v35, %v3717_v19  ;;  %v3821_v37 = vrot.slane %v3820_v52, 4 }
 0x2b1   : > { %v3720_v51 = vrot.slane %v3719_v13, 2  ;;  %v3822_v62 = vadd.f32 %v3821_v37, %v3820_v52 }
 0x2b3   : > { %v3721_v20 = vadd.f32 %v3720_v51, %v3719_v13  ;;  %v3823_v32 = vrot.slane %v3822_v62, 2 }
 0x2b5   : > { %v3722_v4 = vrot.slane %v3721_v20, 1  ;;  %v3824_v16 = vadd.f32 %v3823_v32, %v3822_v62 }
 0x2b7   : > { %v3723_v56 = vadd.f32 %v3722_v4, %v3721_v20  ;;  %v3825_v30 = vrot.slane %v3824_v16, 1 }
 0x2b9   : > { %3725 = vst.msk [vmem:[%s292_s23] sm:$0x1] %vm3724_vm3, %v3723_v56  ;;  %v3826_v9 = vadd.f32 %v3825_v30, %v3824_v16 }
 0x2bb   : > { %3827 = vst.msk [vmem:[%s295_s28] sm:$0x1] %vm3724_vm3, %v3826_v9 }
 0x2bc PF: > { %s18_s24 = sadd.s32 1, %s5268_s24  }
 0x2bd   : > { %p15_p4 = scmp.ge.s32.totalorder %s18_s24, 4  }
 0x2bf   :  { %17 = sbr.rel (!%p15_p4) target bundleno = 1 (0x1), region = 102 }

</bundles_post_ra>
